<compile_context>
chip_gen: v7x
topology: tpu7x:2x2x1
jax: 0.10.0
libtpu: 0.0.40
codegen_flags: <defaults>
</compile_context>

<pallas_src>
import functools

import numpy as np
import jax
import jax.numpy as jnp
from jax.experimental import pallas as pl
from jax.experimental.pallas import tpu as pltpu

# ---- Swin-Tiny config (from swin_tiny_cfg) ----
PATCH = 4
WS = 7
EMBED = 96
DEPTHS = (2, 2, 6, 2)
HEADS = (3, 6, 12, 24)
MLP_RATIO = 4
IMG = 224          # smallest size consistent with patch=4, window=7, 4 stages
LN_EPS = 1e-5

TM_LIN = 256       # matmul row tile
TM_LN = 1024       # layernorm row tile
W_BLK_MAX = 8      # windows per attention grid step
VMEM_LIMIT = 32 * 1024 * 1024


def _round_up(x, m):
    return (x + m - 1) // m * m


def _largest_divisor_leq(n, cap):
    for d in range(min(n, cap), 0, -1):
        if n % d == 0:
            return d
    return 1


def _pick_tn(N, K):
    """Full-N block when it fits; otherwise largest 128-multiple divisor of N."""
    cap = 384 if K >= 2048 else 1024
    if N <= cap:
        return N
    t = (cap // 128) * 128
    while t >= 128:
        if N % t == 0:
            return t
        t -= 128
    return N


# ============================ Pallas kernels ============================

def _erf_poly(z):
    # Abramowitz & Stegun 7.1.26 rational approximation, |err| < 1.5e-7 (f32-exact).
    a = jnp.abs(z)
    t = 1.0 / (1.0 + 0.3275911 * a)
    poly = t * (0.254829592 + t * (-0.284496736 + t * (1.421413741
                + t * (-1.453152027 + t * 1.061405429))))
    e = 1.0 - poly * jnp.exp(-a * a)
    return jnp.where(z < 0.0, -e, e)


def _gelu_exact(x):
    # GELU(x) = 0.5 * x * (1 + erf(x / sqrt(2)))   (matches nn.GELU default)
    return 0.5 * x * (1.0 + _erf_poly(x * 0.7071067811865476))


def _linear_kernel(*refs, act, has_ln, has_res):
    it = iter(refs)
    x_ref = next(it)
    w_ref = next(it)
    b_ref = next(it)
    g_ref = bb_ref = r_ref = None
    if has_ln:
        g_ref = next(it)
        bb_ref = next(it)
    if has_res:
        r_ref = next(it)
    o_ref = next(it)

    x = x_ref[...]
    if has_ln:
        xf = x.astype(jnp.float32)
        mu = jnp.mean(xf, axis=-1, keepdims=True)
        xc = xf - mu
        var = jnp.mean(xc * xc, axis=-1, keepdims=True)
        x = xc * jax.lax.rsqrt(var + LN_EPS) * g_ref[...] + bb_ref[...]

    acc = jnp.dot(x.astype(w_ref.dtype), w_ref[...],
                  preferred_element_type=jnp.float32)
    acc = acc + b_ref[...]
    if act == "relu":
        acc = jnp.maximum(acc, 0.0)
    elif act == "gelu":
        acc = _gelu_exact(acc)
    if has_res:
        acc = acc + r_ref[...].astype(jnp.float32)
    o_ref[...] = acc.astype(o_ref.dtype)


def linear(x, w, b=None, *, act=None, ln=None, res=None, out_dtype=jnp.float32):
    """y = [opt LayerNorm](x) @ w + b, fused activation / residual-add epilogue.

    x:(M,K), w:(K,N) bf16, b:(N,) f32 or None, ln=(gamma, beta) over K, res:(M,N).
    """
    M, K = x.shape
    Kw, N = w.shape
    assert Kw == K
    tm = min(TM_LIN, _round_up(M, 8))
    tn = _pick_tn(N, K)
    grid = (pl.cdiv(M, tm), N // tn)

    bvec = jnp.zeros((N,), jnp.float32) if b is None else b.astype(jnp.float32)
    args = [x, w, bvec.reshape(1, N)]
    in_specs = [
        pl.BlockSpec((tm, K), lambda i, j: (i, 0)),
        pl.BlockSpec((K, tn), lambda i, j: (0, j)),
        pl.BlockSpec((1, tn), lambda i, j: (0, j)),
    ]
    if ln is not None:
        g, bb = ln
        args += [g.astype(jnp.float32).reshape(1, K),
                 bb.astype(jnp.float32).reshape(1, K)]
        in_specs += [pl.BlockSpec((1, K), lambda i, j: (0, 0)),
                     pl.BlockSpec((1, K), lambda i, j: (0, 0))]
    if res is not None:
        args.append(res)
        in_specs.append(pl.BlockSpec((tm, tn), lambda i, j: (i, j)))

    return pl.pallas_call(
        functools.partial(_linear_kernel, act=act,
                          has_ln=ln is not None, has_res=res is not None),
        out_shape=jax.ShapeDtypeStruct((M, N), out_dtype),
        grid_spec=pltpu.PrefetchScalarGridSpec(
            num_scalar_prefetch=0,
            grid=grid,
            in_specs=in_specs,
            out_specs=pl.BlockSpec((tm, tn), lambda i, j: (i, j)),
        ),
        compiler_params=pltpu.CompilerParams(
            dimension_semantics=("parallel", "parallel"),
            vmem_limit_bytes=VMEM_LIMIT),
    )(*args)


def _layernorm_kernel(x_ref, g_ref, b_ref, o_ref):
    x = x_ref[...]
    mu = jnp.mean(x, axis=-1, keepdims=True)
    xc = x - mu
    var = jnp.mean(xc * xc, axis=-1, keepdims=True)
    o_ref[...] = xc * jax.lax.rsqrt(var + LN_EPS) * g_ref[...] + b_ref[...]


def layernorm(x, g, b):
    """Row-wise LayerNorm over the last dim.  x:(M,C) f32, g,b:(C,)."""
    M, C = x.shape
    tm = min(TM_LN, _round_up(M, 8))
    return pl.pallas_call(
        _layernorm_kernel,
        out_shape=jax.ShapeDtypeStruct((M, C), jnp.float32),
        grid_spec=pltpu.PrefetchScalarGridSpec(
            num_scalar_prefetch=0,
            grid=(pl.cdiv(M, tm),),
            in_specs=[pl.BlockSpec((tm, C), lambda i: (i, 0)),
                      pl.BlockSpec((1, C), lambda i: (0, 0)),
                      pl.BlockSpec((1, C), lambda i: (0, 0))],
            out_specs=pl.BlockSpec((tm, C), lambda i: (i, 0)),
        ),
        compiler_params=pltpu.CompilerParams(
            dimension_semantics=("parallel",),
            vmem_limit_bytes=VMEM_LIMIT),
    )(x, g.reshape(1, C), b.reshape(1, C))


def _wattn_kernel(*refs, nH, scale, has_mask):
    if has_mask:
        qkv_ref, rel_ref, mask_ref, o_ref = refs
    else:
        qkv_ref, rel_ref, o_ref = refs
        mask_ref = None
    Wb, N, threeC = qkv_ref.shape
    C = threeC // 3
    Dh = C // nH
    msk = mask_ref[...] if has_mask else None            # (Wb, N, N) f32

    for h in range(nH):
        q = qkv_ref[:, :, h * Dh:(h + 1) * Dh]            # (Wb, N, Dh) bf16
        k = qkv_ref[:, :, C + h * Dh:C + (h + 1) * Dh]
        v = qkv_ref[:, :, 2 * C + h * Dh:2 * C + (h + 1) * Dh]

        s = jnp.einsum("bnd,bmd->bnm", q, k,
                       preferred_element_type=jnp.float32) * scale
        s = s + rel_ref[h][None]                          # (Wb, N, N) + (1, N, N)
        if has_mask:
            s = s + msk
        s = s - jnp.max(s, axis=-1, keepdims=True)
        p = jnp.exp(s)
        l = jnp.sum(p, axis=-1, keepdims=True)
        o = jnp.einsum("bnm,bmd->bnd", p.astype(q.dtype), v,
                       preferred_element_type=jnp.float32)
        o = o * pl.reciprocal(l, approx=True)
        o_ref[:, :, h * Dh:(h + 1) * Dh] = o.astype(o_ref.dtype)


def window_attn(qkv, rel, mask, *, nH, scale):
    """Fused windowed MHSA.

    qkv:(Bw, N, 3C) bf16 packed [q|k|v] with heads contiguous inside each C chunk,
    rel:(nH, N, N) f32, mask:(nW, N, N) f32 or None.  Returns (Bw, N, C) bf16.
    """
    Bw, N, threeC = qkv.shape
    C = threeC // 3
    if mask is not None:
        nW = mask.shape[0]
        wblk = _largest_divisor_leq(nW, W_BLK_MAX)
    else:
        wblk = _largest_divisor_leq(Bw, W_BLK_MAX)
    grid = (Bw // wblk,)

    args = [qkv, rel]
    in_specs = [pl.BlockSpec((wblk, N, threeC), lambda i: (i, 0, 0)),
                pl.BlockSpec((nH, N, N), lambda i: (0, 0, 0))]
    if mask is not None:
        nwb = mask.shape[0] // wblk
        args.append(mask)
        in_specs.append(pl.BlockSpec((wblk, N, N), lambda i: (i % nwb, 0, 0)))

    return pl.pallas_call(
        functools.partial(_wattn_kernel, nH=nH, scale=scale,
                          has_mask=mask is not None),
        out_shape=jax.ShapeDtypeStruct((Bw, N, C), jnp.bfloat16),
        grid_spec=pltpu.PrefetchScalarGridSpec(
            num_scalar_prefetch=0,
            grid=grid,
            in_specs=in_specs,
            out_specs=pl.BlockSpec((wblk, N, C), lambda i: (i, 0, 0)),
        ),
        compiler_params=pltpu.CompilerParams(
            dimension_semantics=("parallel",),
            vmem_limit_bytes=VMEM_LIMIT),
    )(*args)


# ============================ Swin glue (host constants + XLA) ============================

def _rel_pos_index(ws):
    coords = np.stack(np.meshgrid(np.arange(ws), np.arange(ws), indexing="ij"))
    cf = coords.reshape(2, -1)
    rel = (cf[:, :, None] - cf[:, None, :]).transpose(1, 2, 0).astype(np.int64)
    rel[:, :, 0] += ws - 1
    rel[:, :, 1] += ws - 1
    rel[:, :, 0] *= 2 * ws - 1
    return rel.sum(-1)                                    # (N, N)


REL_INDEX = _rel_pos_index(WS).astype(np.int32)


def _window_partition_np(x, ws):
    B, H, W, C = x.shape
    x = x.reshape(B, H // ws, ws, W // ws, ws, C).transpose(0, 1, 3, 2, 4, 5)
    return x.reshape(-1, ws, ws, C)


def _attn_mask(H, W, ws, shift):
    img = np.zeros((1, H, W, 1), np.float32)
    cnt = 0
    for hs in (slice(0, -ws), slice(-ws, -shift), slice(-shift, None)):
        for wsl in (slice(0, -ws), slice(-ws, -shift), slice(-shift, None)):
            img[:, hs, wsl, :] = cnt
            cnt += 1
    mw = _window_partition_np(img, ws).reshape(-1, ws * ws)
    am = mw[:, None, :] - mw[:, :, None]
    return np.where(am != 0, -100.0, 0.0).astype(np.float32)   # (nW, N, N)


def window_partition(x, ws):
    B, H, W, C = x.shape
    x = x.reshape(B, H // ws, ws, W // ws, ws, C).transpose(0, 1, 3, 2, 4, 5)
    return x.reshape(-1, ws * ws, C)


def window_reverse(xw, ws, H, W, B):
    x = xw.reshape(B, H // ws, W // ws, ws, ws, -1).transpose(0, 1, 3, 2, 4, 5)
    return x.reshape(B, H, W, -1)


# ============================ Model pieces (jitted) ============================

@jax.jit
def patch_embed(x, w, b, g, bn):
    """Conv2d(3, 96, k=4, s=4) as unfold + matmul, then LayerNorm."""
    B, Cin, Hi, Wi = x.shape
    H, Wd = Hi // PATCH, Wi // PATCH
    xp = x.reshape(B, Cin, H, PATCH, Wd, PATCH).transpose(0, 2, 4, 1, 3, 5)
    xp = xp.reshape(B * H * Wd, Cin * PATCH * PATCH)
    h = linear(xp, w, b)
    return layernorm(h, g, bn)                             # (B*H*W, EMBED) f32


@functools.partial(jax.jit, static_argnames=("H", "W", "nH", "ws", "shift"))
def swin_block(h, p, mask, *, H, W, nH, ws, shift):
    M, C = h.shape
    B = M // (H * W)
    N = ws * ws
    shortcut = h

    xim = h.reshape(B, H, W, C)
    if shift > 0:
        xim = jnp.roll(xim, (-shift, -shift), axis=(1, 2))
    xw = window_partition(xim, ws)                          # (Bw, N, C)
    Bw = xw.shape[0]

    # fused LayerNorm(norm1) + qkv projection (LN commutes with the row permutation)
    qkv = linear(xw.reshape(Bw * N, C), p["qkv_w"], p["qkv_b"],
                 ln=(p["norm1_g"], p["norm1_b"]), out_dtype=jnp.bfloat16)
    qkv = qkv.reshape(Bw, N, 3 * C)

    rel = p["rel_table"][REL_INDEX.reshape(-1)].reshape(N, N, nH)
    rel = jnp.transpose(rel, (2, 0, 1))                     # (nH, N, N) f32

    attn = window_attn(qkv, rel, mask, nH=nH, scale=float(C // nH) ** -0.5)

    aim = window_reverse(attn, ws, H, W, B)                 # (B, H, W, C) bf16
    if shift > 0:
        aim = jnp.roll(aim, (shift, shift), axis=(1, 2))
    # proj + residual fused
    h = linear(aim.reshape(M, C), p["proj_w"], p["proj_b"], res=shortcut)

    # MLP: fused norm2 + fc1 + GELU, then fc2 + residual
    y = linear(h, p["fc1_w"], p["fc1_b"],
               ln=(p["norm2_g"], p["norm2_b"]), act="gelu", out_dtype=jnp.bfloat16)
    h = linear(y, p["fc2_w"], p["fc2_b"], res=h)
    return h                                                # (M, C) f32


@functools.partial(jax.jit, static_argnames=("H", "W"))
def patch_merging(h, p, *, H, W):
    M, C = h.shape
    B = M // (H * W)
    x = h.reshape(B, H, W, C)
    x = jnp.concatenate([x[:, 0::2, 0::2, :], x[:, 1::2, 0::2, :],
                         x[:, 0::2, 1::2, :], x[:, 1::2, 1::2, :]], axis=-1)
    x = x.reshape(B * (H // 2) * (W // 2), 4 * C)
    # fused LayerNorm + Linear(4C, 2C, bias=False)
    return linear(x, p["red_w"], None, ln=(p["norm_g"], p["norm_b"]))


@functools.partial(jax.jit, static_argnames=("tokens",))
def head_forward(h, norm_g, norm_b, w1, b1, w2, b2, w3, b3, *, tokens):
    M, C = h.shape
    B = M // tokens
    h = layernorm(h, norm_g, norm_b)
    feat = jnp.mean(h.reshape(B, tokens, C), axis=1)        # AdaptiveAvgPool1d(1)
    # head: Linear(768,256) -> Dropout -> Linear(256,128) -> ReLU -> Dropout
    #       -> Linear(128,2) -> ReLU -> Softmax   (dropouts = identity)
    z = linear(feat, w1, b1)
    z = linear(z, w2, b2, act="relu")
    z = linear(z, w3, b3, act="relu")
    return jax.nn.softmax(z, axis=-1)


def swintrans_forward(x, params):
    B, Cin, Hi, Wi = x.shape
    H, W = Hi // PATCH, Wi // PATCH
    h = patch_embed(x, params["patch_w"], params["patch_b"],
                    params["patch_norm_g"], params["patch_norm_b"])

    for si, (depth, nH) in enumerate(zip(DEPTHS, HEADS)):
        ws = WS if min(H, W) > WS else min(H, W)
        can_shift = min(H, W) > WS
        stage_mask = (jnp.asarray(_attn_mask(H, W, ws, WS // 2))
                      if (can_shift and depth > 1) else None)
        for bi in range(depth):
            shift = WS // 2 if (bi % 2 == 1 and can_shift) else 0
            h = swin_block(h, params["stages"][si]["blocks"][bi],
                           stage_mask if shift > 0 else None,
                           H=H, W=W, nH=nH, ws=ws, shift=shift)
        if si < len(DEPTHS) - 1:
            h = patch_merging(h, params["stages"][si]["merge"], H=H, W=W)
            H, W = H // 2, W // 2

    return head_forward(h, params["norm_g"], params["norm_b"],
                        params["h1_w"], params["h1_b"],
                        params["h2_w"], params["h2_b"],
                        params["h3_w"], params["h3_b"], tokens=H * W)


# ============================ Parameter init ============================

def init_params(seed=42):
    key = jax.random.PRNGKey(seed)
    counter = [0]

    def nrm(shape, std=0.02, dtype=jnp.bfloat16):
        counter[0] += 1
        v = std * jax.random.normal(jax.random.fold_in(key, counter[0]),
                                    shape, jnp.float32)
        return v.astype(dtype)

    p = dict(
        patch_w=nrm((3 * PATCH * PATCH, EMBED)),
        patch_b=jnp.zeros((EMBED,), jnp.float32),
        patch_norm_g=jnp.ones((EMBED,), jnp.float32),
        patch_norm_b=jnp.zeros((EMBED,), jnp.float32),
        stages=[],
        norm_g=jnp.ones((768,), jnp.float32),
        norm_b=jnp.zeros((768,), jnp.float32),
        h1_w=nrm((768, 256)), h1_b=jnp.zeros((256,), jnp.float32),
        h2_w=nrm((256, 128)), h2_b=jnp.zeros((128,), jnp.float32),
        h3_w=nrm((128, 2)), h3_b=jnp.zeros((2,), jnp.float32),
    )
    for si, (depth, nH) in enumerate(zip(DEPTHS, HEADS)):
        C = EMBED * (2 ** si)
        blocks = []
        for _ in range(depth):
            blocks.append(dict(
                norm1_g=jnp.ones((C,), jnp.float32), norm1_b=jnp.zeros((C,), jnp.float32),
                qkv_w=nrm((C, 3 * C)), qkv_b=jnp.zeros((3 * C,), jnp.float32),
                rel_table=nrm(((2 * WS - 1) ** 2, nH), dtype=jnp.float32),
                proj_w=nrm((C, C)), proj_b=jnp.zeros((C,), jnp.float32),
                norm2_g=jnp.ones((C,), jnp.float32), norm2_b=jnp.zeros((C,), jnp.float32),
                fc1_w=nrm((C, MLP_RATIO * C)), fc1_b=jnp.zeros((MLP_RATIO * C,), jnp.float32),
                fc2_w=nrm((MLP_RATIO * C, C)), fc2_b=jnp.zeros((C,), jnp.float32),
            ))
        stage = dict(blocks=blocks)
        if si < len(DEPTHS) - 1:
            stage["merge"] = dict(
                norm_g=jnp.ones((4 * C,), jnp.float32),
                norm_b=jnp.zeros((4 * C,), jnp.float32),
                red_w=nrm((4 * C, 2 * C)),
            )
        p["stages"].append(stage)
    return p


# ============================ Main ============================

if __name__ == "__main__":
    params = init_params(seed=42)
    x = jax.random.normal(jax.random.PRNGKey(0), (2, 3, IMG, IMG), jnp.float32)

    out = swintrans_forward(x, params)
    out = jax.block_until_ready(out)

    assert out.shape == (2, 2), out.shape
    assert bool(jnp.all(jnp.isfinite(out)))
    # softmax rows sum to 1
    assert bool(jnp.allclose(jnp.sum(out, axis=-1), 1.0, atol=1e-4))
    print("KERNEL_OK")
</pallas_src>

<mosaic_0001>
module attributes {stable_mosaic.version = 11 : i64} {
  func.func @_linear_kernel(%arg0: i32, %arg1: i32, %arg2: memref<256x48xf32, #tpu.memory_space<vmem>>, %arg3: memref<48x96xbf16, #tpu.memory_space<vmem>>, %arg4: memref<1x96xf32, #tpu.memory_space<vmem>>, %arg5: memref<256x96xf32, #tpu.memory_space<vmem>>) attributes {dimension_semantics = [#tpu.dimension_semantics<parallel>, #tpu.dimension_semantics<parallel>], iteration_bounds = array<i64: 25, 1>, scalar_prefetch = 0 : i64, scratch_operands = 0 : i64, tpu.core_type = #tpu.core_type<tc>, window_params = [{transform_indices = @transform_0, window_bounds = array<i64: 256, 48>}, {transform_indices = @transform_1, window_bounds = array<i64: 48, 96>}, {transform_indices = @transform_2, window_bounds = array<i64: 1, 96>}, {transform_indices = @transform_3, window_bounds = array<i64: 256, 96>}]} {
    %c0 = arith.constant 0 : index
    %c0_0 = arith.constant 0 : index
    %0 = vector.load %arg2[%c0, %c0_0] : memref<256x48xf32, #tpu.memory_space<vmem>>, vector<256x48xf32>
    %1 = arith.truncf %0 : vector<256x48xf32> to vector<256x48xbf16>
    %c0_1 = arith.constant 0 : index
    %c0_2 = arith.constant 0 : index
    %2 = vector.load %arg3[%c0_1, %c0_2] : memref<48x96xbf16, #tpu.memory_space<vmem>>, vector<48x96xbf16>
    %cst = arith.constant dense<0.000000e+00> : vector<256x96xf32>
    %3 = tpu.matmul %1, %2, %cst {dimension_numbers = #tpu.dot_dimension_numbers<[1], [0], [0], [1], [0, 0, 1, 1], [], []>} : vector<256x48xbf16>, vector<48x96xbf16>, vector<256x96xf32> -> vector<256x96xf32>
    %c0_3 = arith.constant 0 : index
    %c0_4 = arith.constant 0 : index
    %4 = vector.load %arg4[%c0_3, %c0_4] : memref<1x96xf32, #tpu.memory_space<vmem>>, vector<1x96xf32>
    %5 = vector.broadcast %4 : vector<1x96xf32> to vector<256x96xf32>
    %6 = arith.addf %3, %5 : vector<256x96xf32>
    %c0_5 = arith.constant 0 : index
    %c0_6 = arith.constant 0 : index
    %7 = vector.load %arg5[%c0_5, %c0_6] : memref<256x96xf32, #tpu.memory_space<vmem>>, vector<256x96xf32>
    tpu.vector_store %arg5[%c0_5, %c0_6], %6 {strides = array<i32>} : memref<256x96xf32, #tpu.memory_space<vmem>>, vector<256x96xf32>,
    return
  }
  func.func @transform_0(%arg0: i32, %arg1: i32) -> (i32, i32) {
    %c0_i32 = arith.constant 0 : i32
    %c0_i32_0 = arith.constant 0 : i32
    return %arg0, %c0_i32 : i32, i32
  }
  func.func @transform_1(%arg0: i32, %arg1: i32) -> (i32, i32) {
    %c0_i32 = arith.constant 0 : i32
    %c0_i32_0 = arith.constant 0 : i32
    return %c0_i32, %arg1 : i32, i32
  }
  func.func @transform_2(%arg0: i32, %arg1: i32) -> (i32, i32) {
    %c0_i32 = arith.constant 0 : i32
    %c0_i32_0 = arith.constant 0 : i32
    return %c0_i32, %arg1 : i32, i32
  }
  func.func @transform_3(%arg0: i32, %arg1: i32) -> (i32, i32) {
    %c0_i32 = arith.constant 0 : i32
    return %arg0, %arg1 : i32, i32
  }
}

module attributes {stable_mosaic.version = 11 : i64} {
  func.func @_layernorm_kernel(%arg0: i32, %arg1: memref<1024x96xf32, #tpu.memory_space<vmem>>, %arg2: memref<1x96xf32, #tpu.memory_space<vmem>>, %arg3: memref<1x96xf32, #tpu.memory_space<vmem>>, %arg4: memref<1024x96xf32, #tpu.memory_space<vmem>>) attributes {dimension_semantics = [#tpu.dimension_semantics<parallel>], iteration_bounds = array<i64: 7>, scalar_prefetch = 0 : i64, scratch_operands = 0 : i64, tpu.core_type = #tpu.core_type<tc>, window_params = [{transform_indices = @transform_0, window_bounds = array<i64: 1024, 96>}, {pipeline_mode = #tpu.pipeline_mode<synchronous>, transform_indices = @transform_1, window_bounds = array<i64: 1, 96>}, {pipeline_mode = #tpu.pipeline_mode<synchronous>, transform_indices = @transform_2, window_bounds = array<i64: 1, 96>}, {transform_indices = @transform_3, window_bounds = array<i64: 1024, 96>}]} {
    %c0 = arith.constant 0 : index
    %c0_0 = arith.constant 0 : index
    %0 = vector.load %arg1[%c0, %c0_0] : memref<1024x96xf32, #tpu.memory_space<vmem>>, vector<1024x96xf32>
    %cst = arith.constant dense<0.000000e+00> : vector<1024xf32>
    %1 = vector.multi_reduction <add>, %0, %cst [1] : vector<1024x96xf32> to vector<1024xf32>
    %2 = vector.shape_cast %1 : vector<1024xf32> to vector<1024x1xf32>
    %cst_1 = arith.constant 9.600000e+01 : f32
    %3 = vector.broadcast %cst_1 : f32 to vector<1024x1xf32>
    %4 = arith.divf %2, %3 : vector<1024x1xf32>
    %5 = vector.broadcast %4 : vector<1024x1xf32> to vector<1024x96xf32>
    %6 = arith.subf %0, %5 : vector<1024x96xf32>
    %7 = arith.mulf %6, %6 : vector<1024x96xf32>
    %cst_2 = arith.constant dense<0.000000e+00> : vector<1024xf32>
    %8 = vector.multi_reduction <add>, %7, %cst_2 [1] : vector<1024x96xf32> to vector<1024xf32>
    %9 = vector.shape_cast %8 : vector<1024xf32> to vector<1024x1xf32>
    %cst_3 = arith.constant 9.600000e+01 : f32
    %10 = vector.broadcast %cst_3 : f32 to vector<1024x1xf32>
    %11 = arith.divf %9, %10 : vector<1024x1xf32>
    %cst_4 = arith.constant 9.99999974E-6 : f32
    %12 = vector.broadcast %cst_4 : f32 to vector<1024x1xf32>
    %13 = arith.addf %11, %12 : vector<1024x1xf32>
    %14 = math.rsqrt %13 : vector<1024x1xf32>
    %15 = vector.broadcast %14 : vector<1024x1xf32> to vector<1024x96xf32>
    %16 = arith.mulf %6, %15 : vector<1024x96xf32>
    %c0_5 = arith.constant 0 : index
    %c0_6 = arith.constant 0 : index
    %17 = vector.load %arg2[%c0_5, %c0_6] : memref<1x96xf32, #tpu.memory_space<vmem>>, vector<1x96xf32>
    %18 = vector.broadcast %17 : vector<1x96xf32> to vector<1024x96xf32>
    %19 = arith.mulf %16, %18 : vector<1024x96xf32>
    %c0_7 = arith.constant 0 : index
    %c0_8 = arith.constant 0 : index
    %20 = vector.load %arg3[%c0_7, %c0_8] : memref<1x96xf32, #tpu.memory_space<vmem>>, vector<1x96xf32>
    %21 = vector.broadcast %20 : vector<1x96xf32> to vector<1024x96xf32>
    %22 = arith.addf %19, %21 : vector<1024x96xf32>
    %c0_9 = arith.constant 0 : index
    %c0_10 = arith.constant 0 : index
    %23 = vector.load %arg4[%c0_9, %c0_10] : memref<1024x96xf32, #tpu.memory_space<vmem>>, vector<1024x96xf32>
    tpu.vector_store %arg4[%c0_9, %c0_10], %22 {strides = array<i32>} : memref<1024x96xf32, #tpu.memory_space<vmem>>, vector<1024x96xf32>,
    return
  }
  func.func @transform_0(%arg0: i32) -> (i32, i32) {
    %c0_i32 = arith.constant 0 : i32
    %c0_i32_0 = arith.constant 0 : i32
    return %arg0, %c0_i32 : i32, i32
  }
  func.func @transform_1(%arg0: i32) -> (i32, i32) {
    %c0_i32 = arith.constant 0 : i32
    %c0_i32_0 = arith.constant 0 : i32
    %c0_i32_1 = arith.constant 0 : i32
    return %c0_i32, %c0_i32_0 : i32, i32
  }
  func.func @transform_2(%arg0: i32) -> (i32, i32) {
    %c0_i32 = arith.constant 0 : i32
    %c0_i32_0 = arith.constant 0 : i32
    %c0_i32_1 = arith.constant 0 : i32
    return %c0_i32, %c0_i32_0 : i32, i32
  }
  func.func @transform_3(%arg0: i32) -> (i32, i32) {
    %c0_i32 = arith.constant 0 : i32
    %c0_i32_0 = arith.constant 0 : i32
    return %arg0, %c0_i32 : i32, i32
  }
}

</mosaic_0001>

<bundles_post_ra>
// kernel: patch_embed.2
= control target key start
LH: loop header
LB: loop body
LE: loop exit
PB: predicated region body
PF: predicated region fallthrough
CT: control target
= control target key end

     0   :  { %s1281_s12 = smov 0   ;;  %s1283_s13 = smov 0   ;;  %s1639_s0 = inlined_call_operand.vmem [shape: f32[6272,48], index: 0, kind: input, shape index: {}]   ;;  %s1640_s1 = inlined_call_operand.vmem [shape: bf16[48,96], index: 1, kind: input, shape index: {}]   ;;  %s1641_s2 = inlined_call_operand.vmem [shape: f32[1,96], index: 2, kind: input, shape index: {}]   ;;  %s1642_s3 = inlined_call_operand.vmem [shape: f32[6272,96], index: 3, kind: output, shape index: {}]  }
   0x1   :  { %s1285_s14 = smov 0   ;;  %s1287_s15 = smov 0  }
   0x2   :  { %s1289_s16 = smov 0  }
   0x3 LB: > { %s937_s17 = sadd.s32 4294967295, %s1227_s16   ;;  %s25_s18 = sadd.s32 1, %s1223_s15  ;;  %s1227_s16 = sphi %s1289_s16, %s13_s16   ;;  %s1223_s15 = sphi %s1287_s15, %s1652_s15   ;;  %s1219_s14 = sphi %s1285_s14, %s1651_s14   ;;  %s1215_s13 = sphi %s1283_s13, %s1650_s13   ;;  %s1211_s12 = sphi %s1281_s12, %s1649_s12  }
   0x4   : > { %p27_p0 = scmp.ge.s32.totalorder %s25_s18, 25  ;;  %s112_s19 = sadd.s32 1, %s1215_s13 }
   0x5   : > { %p122_p1 = scmp.ne.s32.totalorder %s1215_s13, %s1211_s12  ;;  %p123_p2 = scmp.eq.s32.totalorder %s937_s17, 24 }
   0x6   : > { %s1654_s18 = smov (%p27_p0, %s25_s18), 0  ;;  %p943_p4 = scmp.ge.s32.totalorder %s1227_s16, 1 }
   0x7   : > { %p1313_p3 = por %p123_p2, %p122_p1  ;;  %s107_s21 = ssub.s32 %s1223_s15, %s1654_s18 }
   0x8   : > { %p177_p5 = scmp.lt.s32.totalorder %s1227_s16, 26  ;;  %p110_p6 = scmp.eq.s32.totalorder %s107_s21, 0 }
   0xa   : > { %p178_p7 = pnand %p943_p4, %p177_p5 }
   0xb   : > { %s1322_s22 = scalar_select %p110_p6, %s1215_s13, %s112_s19  }
   0xc   : > { %181 = sbr.rel (%p178_p7) target bundleno = 326 (0x146), region = 32  ;;  %v1154_v0 = vld [vmem:[%s1640_s1] sm:$0xff] (!%p178_p7)   ;;  %s1328_s25 = sshll.u32 (!%p178_p7), %s1219_s14, 5  ;;  %v1155_v1 = vld [vmem:[%s1640_s1 + $0x8] sm:$0xff] (!%p178_p7)   ;;  %v1156_v2 = vld [vmem:[%s1640_s1 + $0x10] sm:$0xff] (!%p178_p7)   ;;  %vm317_vm0 = vcmask (!%p178_p7), 392192  }
   0xd   : > { %p216_p8 = scmp.lt.s32.totalorder (!%p178_p7), %s1328_s25, 783  ;;  %1006 = vmatprep.subr.bf16.mxu0 (!%p178_p7), %v1154_v0  ;;  %1044 = vmatprep.subr.bf16.mxu1 (!%p178_p7), %v1154_v0  ;;  %s208_s8 = sand.u32 (!%p178_p7), 1, %s1211_s12   ;;  %v1395_v51 = vld [vmem:[%s1641_s2] ss:$0 sm:$0xff] (!%p178_p7)  ;;  %vm527_vm1 = vcmask (!%p178_p7), 785408  }
   0xe   : > { %1007 = vmatpush3.bf16.msra.mxu0 (!%p178_p7), %v1154_v0  ;;  %1047 = vmatpush3.bf16.msra.mxu1 (!%p178_p7), %v1154_v0  ;;  %s944_s9 = sshll.u32 (!%p178_p7), %s208_s8, 8 }
   0xf   : > { %1008 = vmatprep.subr.bf16.mxu0 (!%p178_p7), %v1155_v1  ;;  %1045 = vmatprep.subr.bf16.mxu1 (!%p178_p7), %v1155_v1  ;;  %s1401_s12 = scalar_lea.vmem (!%p178_p7), [#allocation2], %s944_s9  }
  0x12   : > { %1009 = vmatpush3.bf16.msra.mxu0 (!%p178_p7), %v1155_v1  ;;  %1048 = vmatpush3.bf16.msra.mxu1 (!%p178_p7), %v1155_v1 }
  0x13   : > { %s217_s28 = scalar_select %p216_p8, %s1328_s25, 783  ;;  %1010 = vmatprep.subr.bf16.mxu0 %v1156_v2  ;;  %1046 = vmatprep.subr.bf16.mxu1 %v1156_v2 }
  0x14   : > { %s568_s17 = ssub.s32 (%p1313_p3), 784, %s1328_s25  ;;  %s984_s19 = sshll.u32 (%p1313_p3), %s1219_s14, 8 }
  0x15   : > { %s946_s4 = sshll.u32 %s217_s28, 3  ;;  %p569_p9 = scmp.lt.s32.totalorder (%p1313_p3), %s568_s17, 32 }
  0x16   : > { %s1341_s7 = scalar_lea.vmem %s1639_s0, %s946_s4  ;;  %1011 = vmatpush3.bf16.msra.mxu0 %v1156_v2  ;;  %1049 = vmatpush3.bf16.msra.mxu1 %v1156_v2  ;;  %s1502_s24 = scalar_lea.vmem (%p1313_p3), %s1642_s3, %s984_s19  }
  0x17   : > { %v238_v3 = vld [vmem:[%s1341_s7] sm:$0xff]  ;;  %v239_v4 = vld [vmem:[%s1341_s7 + $0x8] sm:$0xff]  ;;  %v240_v8 = vld [vmem:[%s1341_s7 + $0x10] sm:$0xff] }
  0x18   : > { %v254_v5 = vld [vmem:[%s1341_s7 + $0x80] sm:$0xff]  ;;  %v270_v6 = vpack.c.bf16 %v239_v4, %v238_v3  ;;  %v255_v7 = vld [vmem:[%s1341_s7 + $0x88] sm:$0xff]  ;;  %v241_v9 = vld [vmem:[%s1341_s7 + $0x18] sm:$0xff] }
  0x19   : > { %v278_v10 = vpack.c.bf16 %v255_v7, %v254_v5  ;;  %v256_v11 = vld [vmem:[%s1341_s7 + $0x90] sm:$0xff]  ;;  %v257_v12 = vld [vmem:[%s1341_s7 + $0x98] sm:$0xff]  ;;  %v242_v13 = vld [vmem:[%s1341_s7 + $0x20] sm:$0xff]  ;;  %v271_v14 = vpack.c.bf16 %v241_v9, %v240_v8 }
  0x1a   : > { %1012 = vmatprep.mubr.msk.bf16.mxu0 %vm317_vm0, %v270_v6  ;;  %v279_v15 = vpack.c.bf16 %v257_v12, %v256_v11  ;;  %v243_v16 = vld [vmem:[%s1341_s7 + $0x28] sm:$0xff]  ;;  %v258_v17 = vld [vmem:[%s1341_s7 + $0xa0] sm:$0xff]  ;;  %v244_v21 = vld [vmem:[%s1341_s7 + $0x30] sm:$0xff] }
  0x1b   : > { %v259_v18 = vld [vmem:[%s1341_s7 + $0xa8] sm:$0xff]  ;;  %v272_v19 = vpack.c.bf16 %v243_v16, %v242_v13  ;;  %1028 = vmatprep.mubr.msk.bf16.mxu1 %vm317_vm0, %v278_v10  ;;  %1013 = vmatmul.mubr.msk.bf16.vlgmr.msra.gmra.mrb[0].mxu0 %vm317_vm0, %v271_v14  ;;  %v245_v22 = vld [vmem:[%s1341_s7 + $0x38] sm:$0xff]  ;;  %v260_v23 = vld [vmem:[%s1341_s7 + $0xb0] sm:$0xff] }
  0x1c   : > { %v280_v20 = vpack.c.bf16 %v259_v18, %v258_v17  ;;  %1029 = vmatmul.mubr.msk.bf16.vlgmr.msra.gmra.mrb[0].mxu1 %vm317_vm0, %v279_v15  ;;  %v261_v24 = vld [vmem:[%s1341_s7 + $0xb8] sm:$0xff]  ;;  %v246_v25 = vld [vmem:[%s1341_s7 + $0x40] sm:$0xff]  ;;  %v247_v26 = vld [vmem:[%s1341_s7 + $0x48] sm:$0xff]  ;;  %v273_v29 = vpack.c.bf16 %v245_v22, %v244_v21 }
  0x1d   : > { %1016 = vmatprep.mubr.msk.bf16.mxu0 %vm317_vm0, %v272_v19  ;;  %v262_v27 = vld [vmem:[%s1341_s7 + $0xc0] sm:$0xff]  ;;  %v263_v28 = vld [vmem:[%s1341_s7 + $0xc8] sm:$0xff]  ;;  %v281_v30 = vpack.c.bf16 %v261_v24, %v260_v23  ;;  %v274_v31 = vpack.c.bf16 %v247_v26, %v246_v25  ;;  %v248_v33 = vld [vmem:[%s1341_s7 + $0x50] sm:$0xff] }
  0x1e   : > { %1032 = vmatprep.mubr.msk.bf16.mxu1 %vm317_vm0, %v280_v20  ;;  %v282_v32 = vpack.c.bf16 %v263_v28, %v262_v27  ;;  %v249_v34 = vld [vmem:[%s1341_s7 + $0x58] sm:$0xff]  ;;  %v264_v35 = vld [vmem:[%s1341_s7 + $0xd0] sm:$0xff]  ;;  %v250_v37 = vld [vmem:[%s1341_s7 + $0x60] sm:$0xff] }
  0x1f   : > { %v265_v36 = vld [vmem:[%s1341_s7 + $0xd8] sm:$0xff]  ;;  %v251_v38 = vld [vmem:[%s1341_s7 + $0x68] sm:$0xff]  ;;  %v266_v39 = vld [vmem:[%s1341_s7 + $0xe0] sm:$0xff]  ;;  %v275_v41 = vpack.c.bf16 %v249_v34, %v248_v33 }
  0x20   : > { %v267_v40 = vld [vmem:[%s1341_s7 + $0xe8] sm:$0xff]  ;;  %v283_v42 = vpack.c.bf16 %v265_v36, %v264_v35  ;;  %v276_v43 = vpack.c.bf16 %v251_v38, %v250_v37  ;;  %v252_v45 = vld [vmem:[%s1341_s7 + $0x70] sm:$0xff]  ;;  %v253_v46 = vld [vmem:[%s1341_s7 + $0x78] sm:$0xff] }
  0x21   : > { %v284_v44 = vpack.c.bf16 %v267_v40, %v266_v39  ;;  %v268_v47 = vld [vmem:[%s1341_s7 + $0xf0] sm:$0xff]  ;;  %v269_v48 = vld [vmem:[%s1341_s7 + $0xf8] sm:$0xff]  ;;  %v277_v49 = vpack.c.bf16 %v253_v46, %v252_v45 }
  0x22   : > { %v285_v50 = vpack.c.bf16 %v269_v48, %v268_v47 }
  0x23   : > { %1017 = vmatmul.mubr.msk.bf16.gmra.mrb[4].mxu0 %vm317_vm0, %v273_v29 }
  0x24   : > { %1033 = vmatmul.mubr.msk.bf16.gmra.mrb[4].mxu1 %vm317_vm0, %v281_v30  ;;  %1020 = vmatprep.mubr.msk.bf16.mxu0 %vm317_vm0, %v274_v31 }
  0x25   : > { %1036 = vmatprep.mubr.msk.bf16.mxu1 %vm317_vm0, %v282_v32 }
  0x2b   : > { %1021 = vmatmul.mubr.msk.bf16.gmra.mrb[8].mxu0 %vm317_vm0, %v275_v41 }
  0x2c   : > { %1037 = vmatmul.mubr.msk.bf16.gmra.mrb[8].mxu1 %vm317_vm0, %v283_v42  ;;  %1024 = vmatprep.mubr.msk.bf16.mxu0 %vm317_vm0, %v276_v43 }
  0x2d   : > { %1040 = vmatprep.mubr.msk.bf16.mxu1 %vm317_vm0, %v284_v44 }
  0x33   : > { %1025 = vmatmul.mubr.msk.bf16.gmra.mrb[12].mxu0 %vm317_vm0, %v277_v49 }
  0x34   : > { %1041 = vmatmul.mubr.msk.bf16.gmra.mrb[12].mxu1 %vm317_vm0, %v285_v50 }
  0xee   : > { %v1014_v52 = vpop.f32.mrb[0].mxu0 }
  0xef   : > { %v1030_v53 = vpop.f32.mrb[0].mxu1  ;;  %v409_v54 = vadd.f32 %v1014_v52, %v1395_v51  ;;  %v400_v56 = vpop.f32.mrb[1].mxu0 }
  0xf0   : > { %v473_v55 = vadd.f32 %v1030_v53, %v1395_v51  ;;  %v464_v57 = vpop.f32.mrb[1].mxu1  ;;  %v401_v58 = vadd.f32 %v1395_v51, %v400_v56  ;;  %v1015_v60 = vpop.f32.mrb[2].mxu0 }
  0xf1   : > { %v465_v59 = vadd.f32 %v1395_v51, %v464_v57  ;;  %v1031_v61 = vpop.f32.mrb[2].mxu1  ;;  %530 = vst.msk [vmem:[%s1401_s12 + $0x10] sm:$0xff] %vm527_vm1, %v409_v54  ;;  %v412_v62 = vadd.f32 %v1015_v60, %v1395_v51  ;;  %v403_v0 = vpop.f32.mrb[3].mxu0 }
  0xf2   : > { %546 = vst.msk [vmem:[%s1401_s12 + $0x90] sm:$0xff] %vm527_vm1, %v473_v55  ;;  %v476_v63 = vadd.f32 %v1031_v61, %v1395_v51  ;;  %v467_v1 = vpop.f32.mrb[3].mxu1  ;;  %528 = vst.msk [vmem:[%s1401_s12] sm:$0xff] %vm527_vm1, %v401_v58  ;;  %v404_v2 = vadd.f32 %v1395_v51, %v403_v0 }
  0xf3   : > { %544 = vst.msk [vmem:[%s1401_s12 + $0x80] sm:$0xff] %vm527_vm1, %v465_v59  ;;  %v468_v3 = vadd.f32 %v1395_v51, %v467_v1  ;;  %531 = vst.msk [vmem:[%s1401_s12 + $0x18] sm:$0xff] %vm527_vm1, %v412_v62 }
  0xf4   : > { %547 = vst.msk [vmem:[%s1401_s12 + $0x98] sm:$0xff] %vm527_vm1, %v476_v63  ;;  %529 = vst.msk [vmem:[%s1401_s12 + $0x8] sm:$0xff] %vm527_vm1, %v404_v2 }
  0xf5   : > { %545 = vst.msk [vmem:[%s1401_s12 + $0x88] sm:$0xff] %vm527_vm1, %v468_v3 }
  0xf6   : > { %v1018_v4 = vpop.f32.mrb[4].mxu0 }
  0xf7   : > { %v1034_v5 = vpop.f32.mrb[4].mxu1  ;;  %v425_v6 = vadd.f32 %v1018_v4, %v1395_v51  ;;  %v416_v8 = vpop.f32.mrb[5].mxu0 }
  0xf8   : > { %v489_v7 = vadd.f32 %v1034_v5, %v1395_v51  ;;  %v480_v9 = vpop.f32.mrb[5].mxu1  ;;  %v417_v10 = vadd.f32 %v1395_v51, %v416_v8  ;;  %v1019_v12 = vpop.f32.mrb[6].mxu0 }
  0xf9   : > { %v481_v11 = vadd.f32 %v1395_v51, %v480_v9  ;;  %v1035_v13 = vpop.f32.mrb[6].mxu1  ;;  %534 = vst.msk [vmem:[%s1401_s12 + $0x30] sm:$0xff] %vm527_vm1, %v425_v6  ;;  %v428_v14 = vadd.f32 %v1019_v12, %v1395_v51  ;;  %v419_v16 = vpop.f32.mrb[7].mxu0 }
  0xfa   : > { %550 = vst.msk [vmem:[%s1401_s12 + $0xb0] sm:$0xff] %vm527_vm1, %v489_v7  ;;  %v492_v15 = vadd.f32 %v1035_v13, %v1395_v51  ;;  %v483_v17 = vpop.f32.mrb[7].mxu1  ;;  %532 = vst.msk [vmem:[%s1401_s12 + $0x20] sm:$0xff] %vm527_vm1, %v417_v10  ;;  %v420_v18 = vadd.f32 %v1395_v51, %v419_v16 }
  0xfb   : > { %548 = vst.msk [vmem:[%s1401_s12 + $0xa0] sm:$0xff] %vm527_vm1, %v481_v11  ;;  %v484_v19 = vadd.f32 %v1395_v51, %v483_v17  ;;  %535 = vst.msk [vmem:[%s1401_s12 + $0x38] sm:$0xff] %vm527_vm1, %v428_v14 }
  0xfc   : > { %551 = vst.msk [vmem:[%s1401_s12 + $0xb8] sm:$0xff] %vm527_vm1, %v492_v15  ;;  %533 = vst.msk [vmem:[%s1401_s12 + $0x28] sm:$0xff] %vm527_vm1, %v420_v18 }
  0xfd   : > { %549 = vst.msk [vmem:[%s1401_s12 + $0xa8] sm:$0xff] %vm527_vm1, %v484_v19 }
  0xfe   : > { %v1022_v20 = vpop.f32.mrb[8].mxu0 }
  0xff   : > { %v1038_v21 = vpop.f32.mrb[8].mxu1  ;;  %v441_v22 = vadd.f32 %v1022_v20, %v1395_v51  ;;  %v432_v24 = vpop.f32.mrb[9].mxu0 }
 0x100   : > { %v505_v23 = vadd.f32 %v1038_v21, %v1395_v51  ;;  %v496_v25 = vpop.f32.mrb[9].mxu1  ;;  %v433_v26 = vadd.f32 %v1395_v51, %v432_v24  ;;  %v1023_v28 = vpop.f32.mrb[10].mxu0 }
 0x101   : > { %v497_v27 = vadd.f32 %v1395_v51, %v496_v25  ;;  %v1039_v29 = vpop.f32.mrb[10].mxu1  ;;  %538 = vst.msk [vmem:[%s1401_s12 + $0x50] sm:$0xff] %vm527_vm1, %v441_v22  ;;  %v444_v30 = vadd.f32 %v1023_v28, %v1395_v51  ;;  %v435_v32 = vpop.f32.mrb[11].mxu0 }
 0x102   : > { %554 = vst.msk [vmem:[%s1401_s12 + $0xd0] sm:$0xff] %vm527_vm1, %v505_v23  ;;  %v508_v31 = vadd.f32 %v1039_v29, %v1395_v51  ;;  %v499_v33 = vpop.f32.mrb[11].mxu1  ;;  %536 = vst.msk [vmem:[%s1401_s12 + $0x40] sm:$0xff] %vm527_vm1, %v433_v26  ;;  %v436_v34 = vadd.f32 %v1395_v51, %v435_v32 }
 0x103   : > { %552 = vst.msk [vmem:[%s1401_s12 + $0xc0] sm:$0xff] %vm527_vm1, %v497_v27  ;;  %v500_v35 = vadd.f32 %v1395_v51, %v499_v33  ;;  %539 = vst.msk [vmem:[%s1401_s12 + $0x58] sm:$0xff] %vm527_vm1, %v444_v30 }
 0x104   : > { %555 = vst.msk [vmem:[%s1401_s12 + $0xd8] sm:$0xff] %vm527_vm1, %v508_v31  ;;  %537 = vst.msk [vmem:[%s1401_s12 + $0x48] sm:$0xff] %vm527_vm1, %v436_v34 }
 0x105   : > { %553 = vst.msk [vmem:[%s1401_s12 + $0xc8] sm:$0xff] %vm527_vm1, %v500_v35 }
 0x106   : > { %v1026_v36 = vpop.f32.mrb[12].mxu0 }
 0x107   : > { %v1042_v37 = vpop.f32.mrb[12].mxu1  ;;  %v457_v38 = vadd.f32 %v1026_v36, %v1395_v51  ;;  %v448_v40 = vpop.f32.mrb[13].mxu0  ;;  %566 = sbr.rel (!%p1313_p3) target bundleno = 326 (0x146), region = 36 }
 0x108   : > { %v521_v39 = vadd.f32 %v1042_v37, %v1395_v51  ;;  %v512_v41 = vpop.f32.mrb[13].mxu1  ;;  %v449_v42 = vadd.f32 %v1395_v51, %v448_v40  ;;  %v1027_v44 = vpop.f32.mrb[14].mxu0 }
 0x109   : > { %v513_v43 = vadd.f32 %v1395_v51, %v512_v41  ;;  %v1043_v45 = vpop.f32.mrb[14].mxu1  ;;  %542 = vst.msk [vmem:[%s1401_s12 + $0x70] sm:$0xff] %vm527_vm1, %v457_v38  ;;  %v460_v46 = vadd.f32 %v1027_v44, %v1395_v51  ;;  %v451_v48 = vpop.f32.mrb[15].mxu0 }
 0x10a   : > { %558 = vst.msk [vmem:[%s1401_s12 + $0xf0] sm:$0xff] %vm527_vm1, %v521_v39  ;;  %v524_v47 = vadd.f32 %v1043_v45, %v1395_v51  ;;  %v515_v49 = vpop.f32.mrb[15].mxu1  ;;  %540 = vst.msk [vmem:[%s1401_s12 + $0x60] sm:$0xff] %vm527_vm1, %v449_v42  ;;  %v452_v50 = vadd.f32 %v1395_v51, %v451_v48 }
 0x10b   : > { %556 = vst.msk [vmem:[%s1401_s12 + $0xe0] sm:$0xff] %vm527_vm1, %v513_v43  ;;  %v516_v52 = vadd.f32 %v1395_v51, %v515_v49  ;;  %543 = vst.msk [vmem:[%s1401_s12 + $0x78] sm:$0xff] %vm527_vm1, %v460_v46 }
 0x10c   : > { %559 = vst.msk [vmem:[%s1401_s12 + $0xf8] sm:$0xff] %vm527_vm1, %v524_v47  ;;  %541 = vst.msk [vmem:[%s1401_s12 + $0x68] sm:$0xff] %vm527_vm1, %v452_v50 }
 0x10d   : > { %557 = vst.msk [vmem:[%s1401_s12 + $0xe8] sm:$0xff] %vm527_vm1, %v516_v52 }
 0x10e   : > { %s1656_s17 = smov (!%p569_p9, %s568_s17), 32 }
 0x10f   : > { %s969_s26 = sshll.u32 %s1656_s17, 7 }
 0x110   : > { %p972_p10 = scmp.eq.s32.totalorder %s969_s26, 0 }
 0x111   : > { %s1508_s27 = sshrl.u32 (!%p972_p10), %s1656_s17, 5 }
 0x112   : > { %578 = sbr.rel (%p972_p10) target bundleno = 326 (0x146), region = 40  ;;  %p973_p11 = scmp.le.s32.totalorder (!%p972_p10), %s1508_s27, 0 }
 0x119   : > { %867 = sbr.rel (%p973_p11) target bundleno = 305 (0x131), region = 122  ;;  %s1644_s14 = smov (!%p973_p11), %s1502_s24 }
 0x11a   : > { %s1645_s20 = smov (!%p973_p11), %s1401_s12  ;;  %s1517_s25 = smov (!%p973_p11), 0  }
 0x11b   : > { %s1519_s28 = smov (!%p973_p11), 0  }
 0x120 LB: >> { %v702_v51 = vld [vmem:[%s1235_s20] sm:$0xff]  ;;  %v704_v53 = vld [vmem:[%s1235_s20 + $0x8] sm:$0xff]  ;;  %v706_v54 = vld [vmem:[%s1235_s20 + $0x10] sm:$0xff]  ;;  %s766_s29 = sadd.s32 1, %s1239_s25  ;;  %s696_s28 = sadd.s32 1, %s1243_s28   ;;  %s1243_s28 = sphi %s1519_s28, %s696_s28   ;;  %s1239_s25 = sphi %s1517_s25, %s1648_s25   ;;  %s1235_s20 = sphi %s1645_s20, %s1647_s20   ;;  %s1231_s14 = sphi %s1644_s14, %s1646_s14  }
 0x121   : >> { %703 = vst [vmem:[%s1231_s14] sm:$0xff] %v702_v51  ;;  %705 = vst [vmem:[%s1231_s14 + $0x8] sm:$0xff] %v704_v53  ;;  %v708_v55 = vld [vmem:[%s1235_s20 + $0x18] sm:$0xff]  ;;  %v710_v56 = vld [vmem:[%s1235_s20 + $0x20] sm:$0xff]  ;;  %p767_p12 = scmp.ge.s32.totalorder %s766_s29, %s1508_s27  ;;  %p695_p13 = scmp.ge.s32.totalorder %s696_s28, %s1508_s27 }
 0x122   : >> { %707 = vst [vmem:[%s1231_s14 + $0x10] sm:$0xff] %v706_v54  ;;  %v712_v57 = vld [vmem:[%s1235_s20 + $0x28] sm:$0xff]  ;;  %709 = vst [vmem:[%s1231_s14 + $0x18] sm:$0xff] %v708_v55  ;;  %v714_v58 = vld [vmem:[%s1235_s20 + $0x30] sm:$0xff] }
 0x123   : >> { %711 = vst [vmem:[%s1231_s14 + $0x20] sm:$0xff] %v710_v56  ;;  %713 = vst [vmem:[%s1231_s14 + $0x28] sm:$0xff] %v712_v57  ;;  %v716_v59 = vld [vmem:[%s1235_s20 + $0x38] sm:$0xff]  ;;  %v718_v60 = vld [vmem:[%s1235_s20 + $0x40] sm:$0xff]  ;;  %s1658_s29 = smov (%p767_p12, %s766_s29), 0 }
 0x124   : >> { %715 = vst [vmem:[%s1231_s14 + $0x30] sm:$0xff] %v714_v58  ;;  %717 = vst [vmem:[%s1231_s14 + $0x38] sm:$0xff] %v716_v59  ;;  %v720_v61 = vld [vmem:[%s1235_s20 + $0x48] sm:$0xff]  ;;  %v722_v62 = vld [vmem:[%s1235_s20 + $0x50] sm:$0xff]  ;;  %s974_s30 = sshll.u32 %s1658_s29, 8  ;;  %s1648_s25 = smov %s1658_s29 }
 0x125   : >> { %719 = vst [vmem:[%s1231_s14 + $0x40] sm:$0xff] %v718_v60  ;;  %v724_v63 = vld [vmem:[%s1235_s20 + $0x58] sm:$0xff]  ;;  %721 = vst [vmem:[%s1231_s14 + $0x48] sm:$0xff] %v720_v61  ;;  %v726_v0 = vld [vmem:[%s1235_s20 + $0x60] sm:$0xff]  ;;  %s1575_s4 = scalar_lea.vmem %s1401_s12, %s974_s30 [#allocation2]   ;;  %s772_s5 = scalar_lea.vmem %s1502_s24, %s974_s30  }
 0x126   : >> { %723 = vst [vmem:[%s1231_s14 + $0x50] sm:$0xff] %v722_v62  ;;  %725 = vst [vmem:[%s1231_s14 + $0x58] sm:$0xff] %v724_v63  ;;  %v728_v1 = vld [vmem:[%s1235_s20 + $0x68] sm:$0xff]  ;;  %v730_v2 = vld [vmem:[%s1235_s20 + $0x70] sm:$0xff] }
 0x127   : >> { %727 = vst [vmem:[%s1231_s14 + $0x60] sm:$0xff] %v726_v0  ;;  %729 = vst [vmem:[%s1231_s14 + $0x68] sm:$0xff] %v728_v1  ;;  %v732_v3 = vld [vmem:[%s1235_s20 + $0x78] sm:$0xff]  ;;  %v734_v4 = vld [vmem:[%s1235_s20 + $0x80] sm:$0xff] }
 0x128   : >> { %731 = vst [vmem:[%s1231_s14 + $0x70] sm:$0xff] %v730_v2  ;;  %v736_v5 = vld [vmem:[%s1235_s20 + $0x88] sm:$0xff]  ;;  %733 = vst [vmem:[%s1231_s14 + $0x78] sm:$0xff] %v732_v3  ;;  %v738_v6 = vld [vmem:[%s1235_s20 + $0x90] sm:$0xff] }
 0x129   : >> { %735 = vst [vmem:[%s1231_s14 + $0x80] sm:$0xff] %v734_v4  ;;  %737 = vst [vmem:[%s1231_s14 + $0x88] sm:$0xff] %v736_v5  ;;  %v740_v7 = vld [vmem:[%s1235_s20 + $0x98] sm:$0xff]  ;;  %v742_v8 = vld [vmem:[%s1235_s20 + $0xa0] sm:$0xff] }
 0x12a   : >> { %739 = vst [vmem:[%s1231_s14 + $0x90] sm:$0xff] %v738_v6  ;;  %741 = vst [vmem:[%s1231_s14 + $0x98] sm:$0xff] %v740_v7  ;;  %v744_v9 = vld [vmem:[%s1235_s20 + $0xa8] sm:$0xff]  ;;  %v746_v10 = vld [vmem:[%s1235_s20 + $0xb0] sm:$0xff]  ;;  %698 = sbr.rel (!%p695_p13) target bundleno = 288 (0x120), region = 128 }
 0x12b   : >> { %743 = vst [vmem:[%s1231_s14 + $0xa0] sm:$0xff] %v742_v8  ;;  %v748_v11 = vld [vmem:[%s1235_s20 + $0xb8] sm:$0xff]  ;;  %745 = vst [vmem:[%s1231_s14 + $0xa8] sm:$0xff] %v744_v9  ;;  %v750_v12 = vld [vmem:[%s1235_s20 + $0xc0] sm:$0xff] }
 0x12c   : >> { %747 = vst [vmem:[%s1231_s14 + $0xb0] sm:$0xff] %v746_v10  ;;  %749 = vst [vmem:[%s1231_s14 + $0xb8] sm:$0xff] %v748_v11  ;;  %v752_v13 = vld [vmem:[%s1235_s20 + $0xc8] sm:$0xff]  ;;  %v754_v14 = vld [vmem:[%s1235_s20 + $0xd0] sm:$0xff] }
 0x12d   : >> { %751 = vst [vmem:[%s1231_s14 + $0xc0] sm:$0xff] %v750_v12  ;;  %753 = vst [vmem:[%s1231_s14 + $0xc8] sm:$0xff] %v752_v13  ;;  %v756_v15 = vld [vmem:[%s1235_s20 + $0xd8] sm:$0xff]  ;;  %v758_v16 = vld [vmem:[%s1235_s20 + $0xe0] sm:$0xff] }
 0x12e   : >> { %755 = vst [vmem:[%s1231_s14 + $0xd0] sm:$0xff] %v754_v14  ;;  %v760_v17 = vld [vmem:[%s1235_s20 + $0xe8] sm:$0xff]  ;;  %757 = vst [vmem:[%s1231_s14 + $0xd8] sm:$0xff] %v756_v15  ;;  %v762_v18 = vld [vmem:[%s1235_s20 + $0xf0] sm:$0xff] }
 0x12f   : >> { %759 = vst [vmem:[%s1231_s14 + $0xe0] sm:$0xff] %v758_v16  ;;  %761 = vst [vmem:[%s1231_s14 + $0xe8] sm:$0xff] %v760_v17  ;;  %v764_v19 = vld [vmem:[%s1235_s20 + $0xf8] sm:$0xff]  ;;  %s1647_s20 = smov %s1575_s4 }
 0x130   : >> { %763 = vst [vmem:[%s1231_s14 + $0xf0] sm:$0xff] %v762_v18  ;;  %765 = vst [vmem:[%s1231_s14 + $0xf8] sm:$0xff] %v764_v19  ;;  %s1646_s14 = smov %s772_s5 }
 0x131 PF: > { %s1616_s6 = sand.u32 31, %s1656_s17   ;;  %s985_s7 = sshll.u32 %s1508_s27, 8 }
 0x132   : > { %s777_s8 = scalar_lea.vmem %s1401_s12, %s985_s7 [#allocation2]   ;;  %s779_s9 = scalar_lea.vmem %s1502_s24, %s985_s7  }
 0x133   : > { %p979_p0 = scmp.le.s32.totalorder %s1616_s6, 0 }
 0x134   : > { %s1245_s10 = smov (!%p979_p0), %s779_s9   ;;  %s1249_s11 = smov (!%p979_p0), %s777_s8  }
 0x135   : > { %881 = sbr.rel (%p979_p0) target bundleno = 326 (0x146), region = 133  ;;  %s1253_s19 = smov (!%p979_p0), 0  }
 0x136   : > { %s1257_s21 = smov (!%p979_p0), 0  }
 0x13c LB: >> { %v789_v20 = vld [vmem:[%s1251_s11] sm:$0xff]  ;;  %s791_s17 = sadd.s32 1, %s1255_s19  ;;  %s783_s21 = sadd.s32 1, %s1259_s21   ;;  %s1259_s21 = sphi %s1257_s21, %s783_s21   ;;  %s1255_s19 = sphi %s1253_s19, %s1254_s19   ;;  %s1251_s11 = sphi %s1249_s11, %s796_s11   ;;  %s1247_s10 = sphi %s1245_s10, %s797_s10  }
 0x13d   : >> { %790 = vst [vmem:[%s1247_s10] sm:$0xff] %v789_v20  ;;  %p792_p1 = scmp.ge.s32.totalorder %s791_s17, %s1616_s6  ;;  %p782_p2 = scmp.ge.s32.totalorder %s783_s21, %s1616_s6 }
 0x13f   : >> { %s1660_s17 = smov (%p792_p1, %s791_s17), 0  ;;  %785 = sbr.rel (!%p782_p2) target bundleno = 316 (0x13c), region = 139 }
 0x140   : >> { %s980_s12 = sshll.u32 %s1660_s17, 3  ;;  %s1254_s19 = smov %s1660_s17  }
 0x141   : >> { %s796_s11 = scalar_lea.vmem %s777_s8, %s980_s12 [#allocation2]   ;;  %s797_s10 = scalar_lea.vmem %s779_s9, %s980_s12  }
 0x146 PF: > { %s13_s16 = sadd.s32 1, %s1227_s16   ;;  %s1649_s12 = smov %s1215_s13 }
 0x147   : > { %p10_p3 = scmp.ge.s32.totalorder %s13_s16, 27   ;;  %s1650_s13 = smov %s1322_s22 }
 0x148   : > { %s1651_s14 = smov %s1223_s15  ;;  %s1652_s15 = smov %s1654_s18 }
 0x149   :  { %12 = sbr.rel (!%p10_p3) target bundleno = 3 (0x3), region = 150 }

// kernel: patch_embed.3
= control target key start
LH: loop header
LB: loop body
LE: loop exit
PB: predicated region body
PF: predicated region fallthrough
CT: control target
= control target key end

     0   :  { %s3437_s12 = smov 0   ;;  %s3439_s13 = smov 0   ;;  %s6015_s0 = inlined_call_operand.vmem [shape: f32[6272,96], index: 0, kind: input, shape index: {}]   ;;  %s6016_s1 = inlined_call_operand.vmem [shape: f32[1,96], index: 1, kind: input, shape index: {}]   ;;  %s6017_s2 = inlined_call_operand.vmem [shape: f32[1,96], index: 2, kind: input, shape index: {}]   ;;  %s6018_s3 = inlined_call_operand.vmem [shape: f32[6272,96], index: 3, kind: output, shape index: {}]  }
   0x1   :  { %s3441_s14 = smov 0  }
   0x2 LB: > { %s3450_s15 = sadd.s32 4294967295, %s3383_s14   ;;  %s3452_s16 = sadd.s32 1, %s3383_s14   ;;  %s3383_s14 = sphi %s3441_s14, %s6426_s14   ;;  %s3379_s13 = sphi %s3439_s13, %s6425_s13   ;;  %s3375_s12 = sphi %s3437_s12, %s6424_s12  }
   0x3   : > { %s85_s17 = ssub.s32 %s3383_s14, %s3452_s16  ;;  %s88_s18 = sadd.s32 1, %s3379_s13 }
   0x4   : > { %p86_p0 = scmp.eq.s32.totalorder %s85_s17, 0  ;;  %p98_p1 = scmp.ne.s32.totalorder %s3379_s13, %s3375_s12 }
   0x5   : > { %p99_p2 = scmp.eq.s32.totalorder %s3450_s15, 6  ;;  %p2854_p3 = scmp.ge.s32.totalorder %s3383_s14, 1 }
   0x6   : > { %s3460_s19 = scalar_select %p86_p0, %s3379_s13, %s88_s18  }
   0x7   : > { %p3462_p4 = por %p99_p2, %p98_p1  ;;  %p146_p5 = scmp.lt.s32.totalorder %s3383_s14, 8 }
   0x9   : > { %p147_p6 = pnand %p2854_p3, %p146_p5 }
   0xb   : > { %150 = sbr.rel (%p147_p6) target bundleno = 772 (0x304), region = 32 }
  0x12   : > { %s3467_s21 = sshll.u32 %s3450_s15, 7  ;;  %vm320_vm0 = vcmask 785408   ;;  %s170_s27 = sand.u32 1, %s3375_s12  }
  0x13   : > { %p178_p7 = scmp.lt.s32.totalorder %s3467_s21, 783  ;;  %s4894_s30 = sshll.u32 %s170_s27, 10 }
  0x14   : > { %s4931_s6 = scalar_lea.vmem [#allocation2], %s4894_s30   ;;  %s2392_s18 = ssub.s32 (%p3462_p4), 784, %s3467_s21 }
  0x15   : > { %s179_s22 = scalar_select %p178_p7, %s3467_s21, 783 }
  0x16   : > { %p2393_p8 = scmp.lt.s32.totalorder (%p3462_p4), %s2392_s18, 128 }
  0x17   : > { %s2857_s23 = sshll.u32 %s179_s22, 3  ;;  %s2877_s22 = sshll.u32 (%p3462_p4), %s3450_s15, 10 }
  0x18   : > { %s3474_s26 = scalar_lea.vmem %s6015_s0, %s2857_s23  ;;  %s5816_s25 = scalar_lea.vmem (%p3462_p4), %s6018_s3, %s2877_s22  }
  0x19   : > { %v3477_v0 = vld [vmem:[%s3474_s26 + $0x10] sm:$0xff]  ;;  %v3480_v1 = vld [vmem:[%s3474_s26] sm:$0xff]  ;;  %v3483_v2 = vld [vmem:[%s3474_s26 + $0x18] sm:$0xff] }
  0x1a   : > { %v327_v3 = vsel %vm320_vm0, %v3477_v0, 0.0  ;;  %v321_v4 = vsel %vm320_vm0, %v3480_v1, 0.0  ;;  %v3490_v5 = vld [vmem:[%s3474_s26 + $0x8] sm:$0xff]  ;;  %v330_v6 = vsel %vm320_vm0, %v3483_v2, 0.0  ;;  %v3500_v9 = vld [vmem:[%s3474_s26 + $0x20] sm:$0xff]  ;;  %v3507_v12 = vld [vmem:[%s3474_s26 + $0x38] sm:$0xff] }
  0x1b   : > { %328 = vadd.xlane.f32.xlu1 %v327_v3  ;;  %322 = vadd.xlane.f32.xlu0 %v321_v4  ;;  %v324_v7 = vsel %vm320_vm0, %v3490_v5, 0.0  ;;  %v3497_v8 = vld [vmem:[%s3474_s26 + $0x28] sm:$0xff]  ;;  %v333_v11 = vsel %vm320_vm0, %v3500_v9, 0.0  ;;  %v3510_v13 = vld [vmem:[%s3474_s26 + $0x30] sm:$0xff]  ;;  %v342_v14 = vsel %vm320_vm0, %v3507_v12, 0.0  ;;  %v3520_v17 = vld [vmem:[%s3474_s26 + $0x40] sm:$0xff] }
  0x1c   : > { %v336_v10 = vsel %vm320_vm0, %v3497_v8, 0.0  ;;  %v339_v15 = vsel %vm320_vm0, %v3510_v13, 0.0  ;;  %v3517_v16 = vld [vmem:[%s3474_s26 + $0x48] sm:$0xff]  ;;  %v345_v19 = vsel %vm320_vm0, %v3520_v17, 0.0  ;;  %v3527_v20 = vld [vmem:[%s3474_s26 + $0x58] sm:$0xff]  ;;  %v3530_v21 = vld [vmem:[%s3474_s26 + $0x50] sm:$0xff] }
  0x1d   : > { %v348_v18 = vsel %vm320_vm0, %v3517_v16, 0.0  ;;  %v354_v22 = vsel %vm320_vm0, %v3527_v20, 0.0  ;;  %v351_v23 = vsel %vm320_vm0, %v3530_v21, 0.0  ;;  %v3537_v24 = vld [vmem:[%s3474_s26 + $0x68] sm:$0xff]  ;;  %v3540_v25 = vld [vmem:[%s3474_s26 + $0x60] sm:$0xff]  ;;  %v3547_v28 = vld [vmem:[%s3474_s26 + $0x78] sm:$0xff] }
  0x1e   : > { %v360_v26 = vsel %vm320_vm0, %v3537_v24, 0.0  ;;  %v357_v27 = vsel %vm320_vm0, %v3540_v25, 0.0  ;;  %v3550_v29 = vld [vmem:[%s3474_s26 + $0x70] sm:$0xff]  ;;  %v366_v30 = vsel %vm320_vm0, %v3547_v28, 0.0  ;;  %v3557_v32 = vld [vmem:[%s3474_s26 + $0x88] sm:$0xff]  ;;  %v3560_v33 = vld [vmem:[%s3474_s26 + $0x80] sm:$0xff] }
  0x1f   : > { %331 = vadd.xlane.f32.xlu1 %v330_v6  ;;  %325 = vadd.xlane.f32.xlu0 %v324_v7  ;;  %v363_v31 = vsel %vm320_vm0, %v3550_v29, 0.0  ;;  %v372_v34 = vsel %vm320_vm0, %v3557_v32, 0.0  ;;  %v369_v35 = vsel %vm320_vm0, %v3560_v33, 0.0  ;;  %v3567_v36 = vld [vmem:[%s3474_s26 + $0x98] sm:$0xff]  ;;  %v3570_v37 = vld [vmem:[%s3474_s26 + $0x90] sm:$0xff]  ;;  %v3577_v40 = vld [vmem:[%s3474_s26 + $0xa8] sm:$0xff] }
  0x20   : > { %v378_v38 = vsel %vm320_vm0, %v3567_v36, 0.0  ;;  %v375_v39 = vsel %vm320_vm0, %v3570_v37, 0.0  ;;  %v3580_v41 = vld [vmem:[%s3474_s26 + $0xa0] sm:$0xff]  ;;  %v384_v42 = vsel %vm320_vm0, %v3577_v40, 0.0  ;;  %v3587_v44 = vld [vmem:[%s3474_s26 + $0xb8] sm:$0xff]  ;;  %v3590_v45 = vld [vmem:[%s3474_s26 + $0xb0] sm:$0xff] }
  0x21   : > { %v381_v43 = vsel %vm320_vm0, %v3580_v41, 0.0  ;;  %v390_v46 = vsel %vm320_vm0, %v3587_v44, 0.0  ;;  %v387_v47 = vsel %vm320_vm0, %v3590_v45, 0.0  ;;  %v3597_v48 = vld [vmem:[%s3474_s26 + $0xc8] sm:$0xff]  ;;  %v3600_v49 = vld [vmem:[%s3474_s26 + $0xc0] sm:$0xff]  ;;  %v3607_v52 = vld [vmem:[%s3474_s26 + $0xd8] sm:$0xff] }
  0x22   : > { %6129 = vst [vmem:[#allocation3_spill] sm:$0xff] %v3597_v48  ;;  %6130 = vst [vmem:[#allocation4_spill] sm:$0xff] %v3600_v49  ;;  %v396_v50 = vsel %vm320_vm0, %v3597_v48, 0.0  ;;  %v393_v51 = vsel %vm320_vm0, %v3600_v49, 0.0  ;;  %v218_v53 = vld [vmem:[%s3474_s26 + $0xd0] sm:$0xff]  ;;  %v402_v54 = vsel %vm320_vm0, %v3607_v52, 0.0 }
  0x23   : > { %337 = vadd.xlane.f32.xlu1 %v336_v10  ;;  %334 = vadd.xlane.f32.xlu0 %v333_v11  ;;  %6131 = vst [vmem:[#allocation5_spill] sm:$0xff] %v3607_v52  ;;  %v399_v55 = vsel %vm320_vm0, %v218_v53, 0.0  ;;  %v221_v56 = vld [vmem:[%s3474_s26 + $0xe8] sm:$0xff]  ;;  %v220_v57 = vld [vmem:[%s3474_s26 + $0xe0] sm:$0xff]  ;;  %v223_v60 = vld [vmem:[%s3474_s26 + $0xf8] sm:$0xff] }
  0x24   : > { %v408_v58 = vsel %vm320_vm0, %v221_v56, 0.0  ;;  %v405_v59 = vsel %vm320_vm0, %v220_v57, 0.0  ;;  %v222_v61 = vld [vmem:[%s3474_s26 + $0xf0] sm:$0xff]  ;;  %v414_v62 = vsel %vm320_vm0, %v223_v60, 0.0  ;;  %v225_v3 = vld [vmem:[%s3474_s26 + $0x108] sm:$0xff]  ;;  %v224_v4 = vld [vmem:[%s3474_s26 + $0x100] sm:$0xff] }
  0x25   : > { %v411_v63 = vsel %vm320_vm0, %v222_v61, 0.0  ;;  %v420_v6 = vsel %vm320_vm0, %v225_v3, 0.0  ;;  %v417_v7 = vsel %vm320_vm0, %v224_v4, 0.0  ;;  %v227_v10 = vld [vmem:[%s3474_s26 + $0x118] sm:$0xff]  ;;  %v226_v11 = vld [vmem:[%s3474_s26 + $0x110] sm:$0xff]  ;;  %v240_v60 = vld [vmem:[%s3474_s26 + $0x180] sm:$0xff] }
  0x26   : > { %v238_v56 = vld [vmem:[%s3474_s26 + $0x170] sm:$0xff]  ;;  %v292_v52 = vld [vmem:[%s3474_s26 + $0x320] sm:$0xff]  ;;  %v295_v49 = vld [vmem:[%s3474_s26 + $0x338] sm:$0xff] }
  0x27   : > { %343 = vadd.xlane.f32.xlu1 %v342_v14  ;;  %340 = vadd.xlane.f32.xlu0 %v339_v15  ;;  %v426_v14 = vsel %vm320_vm0, %v227_v10, 0.0  ;;  %v423_v15 = vsel %vm320_vm0, %v226_v11, 0.0  ;;  %v242_v3 = vld [vmem:[%s3474_s26 + $0x190] sm:$0xff]  ;;  %v244_v10 = vld [vmem:[%s3474_s26 + $0x1a0] sm:$0xff] }
  0x2b   : > { %349 = vadd.xlane.f32.xlu1 %v348_v18  ;;  %346 = vadd.xlane.f32.xlu0 %v345_v19  ;;  %v229_v18 = vld [vmem:[%s3474_s26 + $0x128] sm:$0xff]  ;;  %v228_v19 = vld [vmem:[%s3474_s26 + $0x120] sm:$0xff] }
  0x2f   : > { %355 = vadd.xlane.f32.xlu1 %v354_v22  ;;  %352 = vadd.xlane.f32.xlu0 %v351_v23  ;;  %v432_v22 = vsel %vm320_vm0, %v229_v18, 0.0  ;;  %v429_v23 = vsel %vm320_vm0, %v228_v19, 0.0  ;;  %v246_v18 = vld [vmem:[%s3474_s26 + $0x1b0] sm:$0xff] }
  0x33   : > { %361 = vadd.xlane.f32.xlu1 %v360_v26  ;;  %358 = vadd.xlane.f32.xlu0 %v357_v27  ;;  %v231_v26 = vld [vmem:[%s3474_s26 + $0x138] sm:$0xff]  ;;  %v230_v27 = vld [vmem:[%s3474_s26 + $0x130] sm:$0xff] }
  0x37   : > { %367 = vadd.xlane.f32.xlu1 %v366_v30  ;;  %364 = vadd.xlane.f32.xlu0 %v363_v31  ;;  %v438_v30 = vsel %vm320_vm0, %v231_v26, 0.0  ;;  %v435_v31 = vsel %vm320_vm0, %v230_v27, 0.0  ;;  %v248_v26 = vld [vmem:[%s3474_s26 + $0x1c0] sm:$0xff] }
  0x3b   : > { %373 = vadd.xlane.f32.xlu1 %v372_v34  ;;  %370 = vadd.xlane.f32.xlu0 %v369_v35  ;;  %v233_v34 = vld [vmem:[%s3474_s26 + $0x148] sm:$0xff]  ;;  %v232_v35 = vld [vmem:[%s3474_s26 + $0x140] sm:$0xff] }
  0x3f   : > { %379 = vadd.xlane.f32.xlu1 %v378_v38  ;;  %376 = vadd.xlane.f32.xlu0 %v375_v39  ;;  %v444_v38 = vsel %vm320_vm0, %v233_v34, 0.0  ;;  %v441_v39 = vsel %vm320_vm0, %v232_v35, 0.0  ;;  %v250_v34 = vld [vmem:[%s3474_s26 + $0x1d0] sm:$0xff] }
  0x43   : > { %385 = vadd.xlane.f32.xlu1 %v384_v42  ;;  %382 = vadd.xlane.f32.xlu0 %v381_v43  ;;  %v235_v42 = vld [vmem:[%s3474_s26 + $0x158] sm:$0xff]  ;;  %v234_v43 = vld [vmem:[%s3474_s26 + $0x150] sm:$0xff] }
  0x47   : > { %391 = vadd.xlane.f32.xlu1 %v390_v46  ;;  %388 = vadd.xlane.f32.xlu0 %v387_v47  ;;  %v450_v46 = vsel %vm320_vm0, %v235_v42, 0.0  ;;  %v447_v47 = vsel %vm320_vm0, %v234_v43, 0.0  ;;  %v252_v42 = vld [vmem:[%s3474_s26 + $0x1e0] sm:$0xff] }
  0x4b   : > { %397 = vadd.xlane.f32.xlu1 %v396_v50  ;;  %394 = vadd.xlane.f32.xlu0 %v393_v51  ;;  %v237_v50 = vld [vmem:[%s3474_s26 + $0x168] sm:$0xff]  ;;  %v236_v51 = vld [vmem:[%s3474_s26 + $0x160] sm:$0xff] }
  0x4c   : > { %v456_v53 = vsel %vm320_vm0, %v237_v50, 0.0  ;;  %v254_v50 = vld [vmem:[%s3474_s26 + $0x1f0] sm:$0xff] }
  0x4f   : > { %403 = vadd.xlane.f32.xlu1 %v402_v54  ;;  %400 = vadd.xlane.f32.xlu0 %v399_v55  ;;  %v453_v54 = vsel %vm320_vm0, %v236_v51, 0.0  ;;  %v239_v55 = vld [vmem:[%s3474_s26 + $0x178] sm:$0xff] }
  0x50   : > { %v462_v57 = vsel %vm320_vm0, %v239_v55, 0.0  ;;  %v256_v55 = vld [vmem:[%s3474_s26 + $0x200] sm:$0xff] }
  0x53   : > { %409 = vadd.xlane.f32.xlu1 %v408_v58  ;;  %406 = vadd.xlane.f32.xlu0 %v405_v59  ;;  %v459_v58 = vsel %vm320_vm0, %v238_v56, 0.0  ;;  %v241_v59 = vld [vmem:[%s3474_s26 + $0x188] sm:$0xff] }
  0x54   : > { %v468_v61 = vsel %vm320_vm0, %v241_v59, 0.0  ;;  %v258_v59 = vld [vmem:[%s3474_s26 + $0x210] sm:$0xff] }
  0x57   : > { %415 = vadd.xlane.f32.xlu1 %v414_v62  ;;  %412 = vadd.xlane.f32.xlu0 %v411_v63  ;;  %v465_v62 = vsel %vm320_vm0, %v240_v60, 0.0  ;;  %v243_v63 = vld [vmem:[%s3474_s26 + $0x198] sm:$0xff] }
  0x58   : > { %v474_v4 = vsel %vm320_vm0, %v243_v63, 0.0  ;;  %v260_v63 = vld [vmem:[%s3474_s26 + $0x220] sm:$0xff] }
  0x5b   : > { %421 = vadd.xlane.f32.xlu1 %v420_v6  ;;  %418 = vadd.xlane.f32.xlu0 %v417_v7  ;;  %v471_v6 = vsel %vm320_vm0, %v242_v3, 0.0  ;;  %v245_v7 = vld [vmem:[%s3474_s26 + $0x1a8] sm:$0xff] }
  0x5c   : > { %v480_v11 = vsel %vm320_vm0, %v245_v7, 0.0  ;;  %v262_v7 = vld [vmem:[%s3474_s26 + $0x230] sm:$0xff] }
  0x5f   : > { %427 = vadd.xlane.f32.xlu1 %v426_v14  ;;  %424 = vadd.xlane.f32.xlu0 %v423_v15  ;;  %v477_v14 = vsel %vm320_vm0, %v244_v10, 0.0  ;;  %v247_v15 = vld [vmem:[%s3474_s26 + $0x1b8] sm:$0xff] }
  0x60   : > { %v486_v19 = vsel %vm320_vm0, %v247_v15, 0.0  ;;  %v264_v15 = vld [vmem:[%s3474_s26 + $0x240] sm:$0xff] }
  0x63   : > { %433 = vadd.xlane.f32.xlu1 %v432_v22  ;;  %430 = vadd.xlane.f32.xlu0 %v429_v23  ;;  %v483_v22 = vsel %vm320_vm0, %v246_v18, 0.0  ;;  %v249_v23 = vld [vmem:[%s3474_s26 + $0x1c8] sm:$0xff] }
  0x64   : > { %v492_v27 = vsel %vm320_vm0, %v249_v23, 0.0  ;;  %v537_v23 = vsel %vm320_vm0, %v264_v15, 0.0 }
  0x67   : > { %439 = vadd.xlane.f32.xlu1 %v438_v30  ;;  %436 = vadd.xlane.f32.xlu0 %v435_v31  ;;  %v489_v30 = vsel %vm320_vm0, %v248_v26, 0.0  ;;  %v251_v31 = vld [vmem:[%s3474_s26 + $0x1d8] sm:$0xff] }
  0x68   : > { %v498_v35 = vsel %vm320_vm0, %v251_v31, 0.0  ;;  %v267_v26 = vld [vmem:[%s3474_s26 + $0x258] sm:$0xff] }
  0x6b   : > { %445 = vadd.xlane.f32.xlu1 %v444_v38  ;;  %442 = vadd.xlane.f32.xlu0 %v441_v39  ;;  %v495_v38 = vsel %vm320_vm0, %v250_v34, 0.0  ;;  %v253_v39 = vld [vmem:[%s3474_s26 + $0x1e8] sm:$0xff]  ;;  %v546_v34 = vsel %vm320_vm0, %v267_v26, 0.0 }
  0x6c   : > { %v504_v43 = vsel %vm320_vm0, %v253_v39, 0.0  ;;  %v268_v39 = vld [vmem:[%s3474_s26 + $0x260] sm:$0xff] }
  0x6f   : > { %451 = vadd.xlane.f32.xlu1 %v450_v46  ;;  %448 = vadd.xlane.f32.xlu0 %v447_v47  ;;  %v501_v46 = vsel %vm320_vm0, %v252_v42, 0.0  ;;  %v255_v47 = vld [vmem:[%s3474_s26 + $0x1f8] sm:$0xff] }
  0x70   : > { %v510_v51 = vsel %vm320_vm0, %v255_v47, 0.0  ;;  %v549_v47 = vsel %vm320_vm0, %v268_v39, 0.0 }
  0x73   : > { %457 = vadd.xlane.f32.xlu1 %v456_v53  ;;  %454 = vadd.xlane.f32.xlu0 %v453_v54  ;;  %v507_v53 = vsel %vm320_vm0, %v254_v50, 0.0  ;;  %v257_v54 = vld [vmem:[%s3474_s26 + $0x208] sm:$0xff]  ;;  %v271_v50 = vld [vmem:[%s3474_s26 + $0x278] sm:$0xff] }
  0x74   : > { %v516_v56 = vsel %vm320_vm0, %v257_v54, 0.0 }
  0x77   : > { %463 = vadd.xlane.f32.xlu1 %v462_v57  ;;  %460 = vadd.xlane.f32.xlu0 %v459_v58  ;;  %v513_v57 = vsel %vm320_vm0, %v256_v55, 0.0  ;;  %v259_v58 = vld [vmem:[%s3474_s26 + $0x218] sm:$0xff]  ;;  %v558_v55 = vsel %vm320_vm0, %v271_v50, 0.0  ;;  %v280_v50 = vld [vmem:[%s3474_s26 + $0x2c0] sm:$0xff] }
  0x78   : > { %v522_v60 = vsel %vm320_vm0, %v259_v58, 0.0  ;;  %v272_v58 = vld [vmem:[%s3474_s26 + $0x280] sm:$0xff] }
  0x7b   : > { %469 = vadd.xlane.f32.xlu1 %v468_v61  ;;  %466 = vadd.xlane.f32.xlu0 %v465_v62  ;;  %v519_v61 = vsel %vm320_vm0, %v258_v59, 0.0  ;;  %v261_v62 = vld [vmem:[%s3474_s26 + $0x228] sm:$0xff] }
  0x7c   : > { %v528_v3 = vsel %vm320_vm0, %v261_v62, 0.0  ;;  %v561_v62 = vsel %vm320_vm0, %v272_v58, 0.0  ;;  %v283_v58 = vld [vmem:[%s3474_s26 + $0x2d8] sm:$0xff] }
  0x7f   : > { %475 = vadd.xlane.f32.xlu1 %v474_v4  ;;  %472 = vadd.xlane.f32.xlu0 %v471_v6  ;;  %v525_v4 = vsel %vm320_vm0, %v260_v63, 0.0  ;;  %v263_v6 = vld [vmem:[%s3474_s26 + $0x238] sm:$0xff] }
  0x80   : > { %v534_v10 = vsel %vm320_vm0, %v263_v6, 0.0  ;;  %v275_v63 = vld [vmem:[%s3474_s26 + $0x298] sm:$0xff] }
  0x83   : > { %481 = vadd.xlane.f32.xlu1 %v480_v11  ;;  %478 = vadd.xlane.f32.xlu0 %v477_v14  ;;  %v531_v11 = vsel %vm320_vm0, %v262_v7, 0.0  ;;  %v265_v14 = vld [vmem:[%s3474_s26 + $0x248] sm:$0xff]  ;;  %v570_v7 = vsel %vm320_vm0, %v275_v63, 0.0 }
  0x87   : > { %487 = vadd.xlane.f32.xlu1 %v486_v19  ;;  %484 = vadd.xlane.f32.xlu0 %v483_v22  ;;  %v540_v22 = vsel %vm320_vm0, %v265_v14, 0.0  ;;  %v276_v14 = vld [vmem:[%s3474_s26 + $0x2a0] sm:$0xff] }
  0x88   : > { %v573_v26 = vsel %vm320_vm0, %v276_v14, 0.0 }
  0x8b   : > { %493 = vadd.xlane.f32.xlu1 %v492_v27  ;;  %490 = vadd.xlane.f32.xlu0 %v489_v30  ;;  %v266_v27 = vld [vmem:[%s3474_s26 + $0x250] sm:$0xff] }
  0x8f   : > { %499 = vadd.xlane.f32.xlu1 %v498_v35  ;;  %496 = vadd.xlane.f32.xlu0 %v495_v38  ;;  %v543_v35 = vsel %vm320_vm0, %v266_v27, 0.0  ;;  %v269_v38 = vld [vmem:[%s3474_s26 + $0x268] sm:$0xff]  ;;  %v279_v27 = vld [vmem:[%s3474_s26 + $0x2b8] sm:$0xff] }
  0x90   : > { %v582_v39 = vsel %vm320_vm0, %v279_v27, 0.0 }
  0x93   : > { %505 = vadd.xlane.f32.xlu1 %v504_v43  ;;  %502 = vadd.xlane.f32.xlu0 %v501_v46  ;;  %v552_v46 = vsel %vm320_vm0, %v269_v38, 0.0 }
  0x97   : > { %511 = vadd.xlane.f32.xlu1 %v510_v51  ;;  %508 = vadd.xlane.f32.xlu0 %v507_v53  ;;  %v270_v51 = vld [vmem:[%s3474_s26 + $0x270] sm:$0xff] }
  0x9b   : > { %517 = vadd.xlane.f32.xlu1 %v516_v56  ;;  %514 = vadd.xlane.f32.xlu0 %v513_v57  ;;  %v555_v56 = vsel %vm320_vm0, %v270_v51, 0.0  ;;  %v273_v57 = vld [vmem:[%s3474_s26 + $0x288] sm:$0xff] }
  0x9f   : > { %523 = vadd.xlane.f32.xlu1 %v522_v60  ;;  %520 = vadd.xlane.f32.xlu0 %v519_v61  ;;  %v564_v61 = vsel %vm320_vm0, %v273_v57, 0.0  ;;  %v585_v57 = vsel %vm320_vm0, %v280_v50, 0.0 }
  0xa3   : > { %529 = vadd.xlane.f32.xlu1 %v528_v3  ;;  %526 = vadd.xlane.f32.xlu0 %v525_v4  ;;  %v274_v3 = vld [vmem:[%s3474_s26 + $0x290] sm:$0xff] }
  0xa7   : > { %535 = vadd.xlane.f32.xlu1 %v534_v10  ;;  %532 = vadd.xlane.f32.xlu0 %v531_v11  ;;  %v567_v10 = vsel %vm320_vm0, %v274_v3, 0.0  ;;  %v277_v11 = vld [vmem:[%s3474_s26 + $0x2a8] sm:$0xff]  ;;  %v594_v3 = vsel %vm320_vm0, %v283_v58, 0.0  ;;  %v288_v58 = vld [vmem:[%s3474_s26 + $0x300] sm:$0xff] }
  0xa8   : > { %v3703_v18 = vpop.xlane.xlu1 %328  ;;  %v3705_v19 = vpop.xlane.xlu0 %322 }
  0xab   : > { %541 = vadd.xlane.f32.xlu1 %v540_v22  ;;  %538 = vadd.xlane.f32.xlu0 %v537_v23  ;;  %v576_v23 = vsel %vm320_vm0, %v277_v11, 0.0  ;;  %v284_v11 = vld [vmem:[%s3474_s26 + $0x2e0] sm:$0xff] }
  0xac   : > { %v3711_v30 = vpop.xlane.xlu1 %331  ;;  %v3713_v31 = vpop.xlane.xlu0 %325  ;;  %v597_v27 = vsel %vm320_vm0, %v284_v11, 0.0  ;;  %v291_v11 = vld [vmem:[%s3474_s26 + $0x318] sm:$0xff] }
  0xad   : > { %v709_v48 = vmul.f32 0.010416667, %v3711_v30 }
  0xaf   : > { %547 = vadd.xlane.f32.xlu1 %v546_v34  ;;  %544 = vadd.xlane.f32.xlu0 %v543_v35  ;;  %v278_v34 = vld [vmem:[%s3474_s26 + $0x2b0] sm:$0xff] }
  0xb0   : > { %v3719_v42 = vpop.xlane.xlu1 %337  ;;  %v3721_v43 = vpop.xlane.xlu0 %334 }
  0xb1   : > { %v710_v30 = vmul.f32 0.010416667, %v3721_v43 }
  0xb3   : > { %553 = vadd.xlane.f32.xlu1 %v552_v46  ;;  %550 = vadd.xlane.f32.xlu0 %v549_v47  ;;  %v579_v46 = vsel %vm320_vm0, %v278_v34, 0.0  ;;  %v281_v47 = vld [vmem:[%s3474_s26 + $0x2c8] sm:$0xff]  ;;  %v287_v34 = vld [vmem:[%s3474_s26 + $0x2f8] sm:$0xff] }
  0xb4   : > { %v3727_v53 = vpop.xlane.xlu1 %343  ;;  %v3729_v54 = vpop.xlane.xlu0 %340  ;;  %v606_v50 = vsel %vm320_vm0, %v287_v34, 0.0 }
  0xb7   : > { %559 = vadd.xlane.f32.xlu1 %v558_v55  ;;  %556 = vadd.xlane.f32.xlu0 %v555_v56  ;;  %v588_v56 = vsel %vm320_vm0, %v281_v47, 0.0 }
  0xb8   : > { %v3735_v59 = vpop.xlane.xlu1 %349  ;;  %v3737_v60 = vpop.xlane.xlu0 %346 }
  0xbb   : > { %565 = vadd.xlane.f32.xlu1 %v564_v61  ;;  %562 = vadd.xlane.f32.xlu0 %v561_v62  ;;  %v282_v61 = vld [vmem:[%s3474_s26 + $0x2d0] sm:$0xff] }
  0xbc   : > { %v3743_v4 = vpop.xlane.xlu1 %355  ;;  %v3745_v6 = vpop.xlane.xlu0 %352 }
  0xbf   : > { %571 = vadd.xlane.f32.xlu1 %v570_v7  ;;  %568 = vadd.xlane.f32.xlu0 %v567_v10  ;;  %v591_v7 = vsel %vm320_vm0, %v282_v61, 0.0  ;;  %v285_v10 = vld [vmem:[%s3474_s26 + $0x2e8] sm:$0xff] }
  0xc0   : > { %v3751_v15 = vpop.xlane.xlu1 %361  ;;  %v3753_v22 = vpop.xlane.xlu0 %358 }
  0xc3   : > { %577 = vadd.xlane.f32.xlu1 %v576_v23  ;;  %574 = vadd.xlane.f32.xlu0 %v573_v26  ;;  %v600_v26 = vsel %vm320_vm0, %v285_v10, 0.0  ;;  %v609_v10 = vsel %vm320_vm0, %v288_v58, 0.0 }
  0xc4   : > { %v3759_v35 = vpop.xlane.xlu1 %367  ;;  %v3761_v38 = vpop.xlane.xlu0 %364 }
  0xc7   : > { %583 = vadd.xlane.f32.xlu1 %v582_v39  ;;  %580 = vadd.xlane.f32.xlu0 %v579_v46  ;;  %v286_v39 = vld [vmem:[%s3474_s26 + $0x2f0] sm:$0xff] }
  0xc8   : > { %v3767_v51 = vpop.xlane.xlu1 %373  ;;  %v3769_v55 = vpop.xlane.xlu0 %370 }
  0xcb   : > { %589 = vadd.xlane.f32.xlu1 %v588_v56  ;;  %586 = vadd.xlane.f32.xlu0 %v585_v57  ;;  %v603_v56 = vsel %vm320_vm0, %v286_v39, 0.0  ;;  %v289_v57 = vld [vmem:[%s3474_s26 + $0x308] sm:$0xff]  ;;  %v618_v39 = vsel %vm320_vm0, %v291_v11, 0.0 }
  0xcc   : > { %v3775_v62 = vpop.xlane.xlu1 %379  ;;  %v3777_v63 = vpop.xlane.xlu0 %376 }
  0xcf   : > { %595 = vadd.xlane.f32.xlu1 %v594_v3  ;;  %592 = vadd.xlane.f32.xlu0 %v591_v7  ;;  %v612_v7 = vsel %vm320_vm0, %v289_v57, 0.0 }
  0xd0   : > { %v3783_v14 = vpop.xlane.xlu1 %385  ;;  %v3785_v23 = vpop.xlane.xlu0 %382 }
  0xd3   : > { %601 = vadd.xlane.f32.xlu1 %v600_v26  ;;  %598 = vadd.xlane.f32.xlu0 %v597_v27  ;;  %v290_v26 = vld [vmem:[%s3474_s26 + $0x310] sm:$0xff] }
  0xd4   : > { %v3791_v46 = vpop.xlane.xlu1 %391  ;;  %v3793_v47 = vpop.xlane.xlu0 %388 }
  0xd7   : > { %607 = vadd.xlane.f32.xlu1 %v606_v50  ;;  %604 = vadd.xlane.f32.xlu0 %v603_v56  ;;  %v615_v50 = vsel %vm320_vm0, %v290_v26, 0.0  ;;  %v293_v56 = vld [vmem:[%s3474_s26 + $0x328] sm:$0xff] }
  0xd8   : > { %v3799_v61 = vpop.xlane.xlu1 %397  ;;  %v3801_v3 = vpop.xlane.xlu0 %394 }
  0xdb   : > { %613 = vadd.xlane.f32.xlu1 %v612_v7  ;;  %610 = vadd.xlane.f32.xlu0 %v609_v10  ;;  %v624_v7 = vsel %vm320_vm0, %v293_v56, 0.0  ;;  %v621_v10 = vsel %vm320_vm0, %v292_v52, 0.0 }
  0xdc   : > { %v3807_v27 = vpop.xlane.xlu1 %403  ;;  %v3809_v34 = vpop.xlane.xlu0 %400 }
  0xdd   : > { %6132 = vst [vmem:[#allocation6_spill] sm:$0xff] %v3807_v27  ;;  %6133 = vst [vmem:[#allocation7_spill] sm:$0xff] %v3809_v34  ;;  %v294_v34 = vld [vmem:[%s3474_s26 + $0x330] sm:$0xff] }
  0xde   : > { %v318_v27 = vld [vmem:[%s3474_s26 + $0x3f0] sm:$0xff] }
  0xdf   : > { %619 = vadd.xlane.f32.xlu1 %v618_v39  ;;  %616 = vadd.xlane.f32.xlu0 %v615_v50  ;;  %v630_v39 = vsel %vm320_vm0, %v295_v49, 0.0  ;;  %v627_v50 = vsel %vm320_vm0, %v294_v34, 0.0 }
  0xe0   : > { %v3815_v57 = vpop.xlane.xlu1 %409  ;;  %v3817_v58 = vpop.xlane.xlu0 %406 }
  0xe1   : > { %6134 = vst [vmem:[#allocation8_spill] sm:$0xff] %v3815_v57  ;;  %6135 = vst [vmem:[#allocation9_spill] sm:$0xff] %v3817_v58  ;;  %v297_v57 = vld [vmem:[%s3474_s26 + $0x348] sm:$0xff]  ;;  %v296_v58 = vld [vmem:[%s3474_s26 + $0x340] sm:$0xff] }
  0xe3   : > { %625 = vadd.xlane.f32.xlu1 %v624_v7  ;;  %622 = vadd.xlane.f32.xlu0 %v621_v10  ;;  %v636_v7 = vsel %vm320_vm0, %v297_v57, 0.0  ;;  %v633_v10 = vsel %vm320_vm0, %v296_v58, 0.0 }
  0xe4   : > { %v3823_v11 = vpop.xlane.xlu1 %415  ;;  %v3825_v26 = vpop.xlane.xlu0 %412 }
  0xe5   : > { %6136 = vst [vmem:[#allocation10_spill] sm:$0xff] %v3823_v11  ;;  %6137 = vst [vmem:[#allocation11_spill] sm:$0xff] %v3825_v26  ;;  %v299_v11 = vld [vmem:[%s3474_s26 + $0x358] sm:$0xff]  ;;  %v298_v26 = vld [vmem:[%s3474_s26 + $0x350] sm:$0xff] }
  0xe7   : > { %631 = vadd.xlane.f32.xlu1 %v630_v39  ;;  %628 = vadd.xlane.f32.xlu0 %v627_v50  ;;  %v642_v39 = vsel %vm320_vm0, %v299_v11, 0.0  ;;  %v639_v50 = vsel %vm320_vm0, %v298_v26, 0.0 }
  0xe8   : > { %v3831_v52 = vpop.xlane.xlu1 %421  ;;  %v3833_v56 = vpop.xlane.xlu0 %418 }
  0xe9   : > { %6138 = vst [vmem:[#allocation12_spill] sm:$0xff] %v3831_v52  ;;  %6139 = vst [vmem:[#allocation13_spill] sm:$0xff] %v3833_v56  ;;  %v301_v52 = vld [vmem:[%s3474_s26 + $0x368] sm:$0xff]  ;;  %v300_v56 = vld [vmem:[%s3474_s26 + $0x360] sm:$0xff] }
  0xeb   : > { %637 = vadd.xlane.f32.xlu1 %v636_v7  ;;  %634 = vadd.xlane.f32.xlu0 %v633_v10  ;;  %v648_v7 = vsel %vm320_vm0, %v301_v52, 0.0  ;;  %v645_v10 = vsel %vm320_vm0, %v300_v56, 0.0 }
  0xec   : > { %v3839_v49 = vpop.xlane.xlu1 %427  ;;  %v3841_v34 = vpop.xlane.xlu0 %424 }
  0xed   : > { %6140 = vst [vmem:[#allocation14_spill] sm:$0xff] %v3839_v49  ;;  %6141 = vst [vmem:[#allocation15_spill] sm:$0xff] %v3841_v34  ;;  %v303_v49 = vld [vmem:[%s3474_s26 + $0x378] sm:$0xff]  ;;  %v302_v34 = vld [vmem:[%s3474_s26 + $0x370] sm:$0xff] }
  0xef   : > { %643 = vadd.xlane.f32.xlu1 %v642_v39  ;;  %640 = vadd.xlane.f32.xlu0 %v639_v50  ;;  %v654_v39 = vsel %vm320_vm0, %v303_v49, 0.0  ;;  %v651_v50 = vsel %vm320_vm0, %v302_v34, 0.0 }
  0xf0   : > { %v3847_v57 = vpop.xlane.xlu1 %433  ;;  %v3849_v58 = vpop.xlane.xlu0 %430 }
  0xf1   : > { %6142 = vst [vmem:[#allocation16_spill] sm:$0xff] %v3847_v57  ;;  %6143 = vst [vmem:[#allocation17_spill] sm:$0xff] %v3849_v58  ;;  %v305_v57 = vld [vmem:[%s3474_s26 + $0x388] sm:$0xff]  ;;  %v304_v58 = vld [vmem:[%s3474_s26 + $0x380] sm:$0xff] }
  0xf3   : > { %649 = vadd.xlane.f32.xlu1 %v648_v7  ;;  %646 = vadd.xlane.f32.xlu0 %v645_v10  ;;  %v660_v7 = vsel %vm320_vm0, %v305_v57, 0.0  ;;  %v657_v10 = vsel %vm320_vm0, %v304_v58, 0.0 }
  0xf4   : > { %v3855_v11 = vpop.xlane.xlu1 %439  ;;  %v3857_v26 = vpop.xlane.xlu0 %436 }
  0xf5   : > { %6144 = vst [vmem:[#allocation18_spill] sm:$0xff] %v3855_v11  ;;  %6145 = vst [vmem:[#allocation19_spill] sm:$0xff] %v3857_v26  ;;  %v307_v11 = vld [vmem:[%s3474_s26 + $0x398] sm:$0xff]  ;;  %v306_v26 = vld [vmem:[%s3474_s26 + $0x390] sm:$0xff] }
  0xf7   : > { %655 = vadd.xlane.f32.xlu1 %v654_v39  ;;  %652 = vadd.xlane.f32.xlu0 %v651_v50  ;;  %v666_v39 = vsel %vm320_vm0, %v307_v11, 0.0  ;;  %v663_v50 = vsel %vm320_vm0, %v306_v26, 0.0 }
  0xf8   : > { %v3863_v52 = vpop.xlane.xlu1 %445  ;;  %v3865_v56 = vpop.xlane.xlu0 %442 }
  0xf9   : > { %6146 = vst [vmem:[#allocation20_spill] sm:$0xff] %v3863_v52  ;;  %6147 = vst [vmem:[#allocation21_spill] sm:$0xff] %v3865_v56  ;;  %v309_v52 = vld [vmem:[%s3474_s26 + $0x3a8] sm:$0xff]  ;;  %v308_v56 = vld [vmem:[%s3474_s26 + $0x3a0] sm:$0xff] }
  0xfb   : > { %661 = vadd.xlane.f32.xlu1 %v660_v7  ;;  %658 = vadd.xlane.f32.xlu0 %v657_v10  ;;  %v672_v7 = vsel %vm320_vm0, %v309_v52, 0.0  ;;  %v669_v10 = vsel %vm320_vm0, %v308_v56, 0.0 }
  0xfc   : > { %v3871_v49 = vpop.xlane.xlu1 %451  ;;  %v3873_v34 = vpop.xlane.xlu0 %448 }
  0xfd   : > { %6148 = vst [vmem:[#allocation22_spill] sm:$0xff] %v3871_v49  ;;  %6149 = vst [vmem:[#allocation23_spill] sm:$0xff] %v3873_v34  ;;  %v311_v49 = vld [vmem:[%s3474_s26 + $0x3b8] sm:$0xff]  ;;  %v310_v34 = vld [vmem:[%s3474_s26 + $0x3b0] sm:$0xff] }
  0xff   : > { %667 = vadd.xlane.f32.xlu1 %v666_v39  ;;  %664 = vadd.xlane.f32.xlu0 %v663_v50  ;;  %v678_v39 = vsel %vm320_vm0, %v311_v49, 0.0  ;;  %v675_v50 = vsel %vm320_vm0, %v310_v34, 0.0 }
 0x100   : > { %v3879_v57 = vpop.xlane.xlu1 %457  ;;  %v3881_v58 = vpop.xlane.xlu0 %454 }
 0x101   : > { %6150 = vst [vmem:[#allocation24_spill] sm:$0xff] %v3879_v57  ;;  %6151 = vst [vmem:[#allocation25_spill] sm:$0xff] %v3881_v58  ;;  %v313_v57 = vld [vmem:[%s3474_s26 + $0x3c8] sm:$0xff]  ;;  %v312_v58 = vld [vmem:[%s3474_s26 + $0x3c0] sm:$0xff] }
 0x103   : > { %673 = vadd.xlane.f32.xlu1 %v672_v7  ;;  %670 = vadd.xlane.f32.xlu0 %v669_v10  ;;  %v684_v7 = vsel %vm320_vm0, %v313_v57, 0.0  ;;  %v681_v10 = vsel %vm320_vm0, %v312_v58, 0.0  ;;  %v316_v57 = vld [vmem:[%s3474_s26 + $0x3e0] sm:$0xff]  ;;  %v707_v58 = vmul.f32 0.010416667, %v3713_v31 }
 0x104   : > { %v3887_v11 = vpop.xlane.xlu1 %463  ;;  %v3889_v26 = vpop.xlane.xlu0 %460 }
 0x105   : > { %6152 = vst [vmem:[#allocation26_spill] sm:$0xff] %v3887_v11  ;;  %6153 = vst [vmem:[#allocation27_spill] sm:$0xff] %v3889_v26  ;;  %v315_v11 = vld [vmem:[%s3474_s26 + $0x3d8] sm:$0xff]  ;;  %v314_v26 = vld [vmem:[%s3474_s26 + $0x3d0] sm:$0xff]  ;;  %v3927_v31 = vsub.f32 %v3490_v5, %v707_v58  ;;  %v712_v58 = vmul.f32 0.010416667, %v3729_v54 }
 0x107   : > { %679 = vadd.xlane.f32.xlu1 %v678_v39  ;;  %676 = vadd.xlane.f32.xlu0 %v675_v50  ;;  %v690_v39 = vsel %vm320_vm0, %v315_v11, 0.0  ;;  %v687_v50 = vsel %vm320_vm0, %v314_v26, 0.0  ;;  %v708_v11 = vmul.f32 0.010416667, %v3703_v18  ;;  %6159 = vst [vmem:[#allocation33_spill] sm:$0xff] %v3927_v31  ;;  %v699_v18 = vsel %vm320_vm0, %v318_v27, 0.0 }
 0x108   : > { %v3895_v52 = vpop.xlane.xlu1 %469  ;;  %v3897_v56 = vpop.xlane.xlu0 %466 }
 0x109   : > { %6154 = vst [vmem:[#allocation28_spill] sm:$0xff] %v3895_v52  ;;  %6155 = vst [vmem:[#allocation29_spill] sm:$0xff] %v3897_v56  ;;  %v706_v56 = vmul.f32 0.010416667, %v3705_v19  ;;  %v317_v52 = vld [vmem:[%s3474_s26 + $0x3e8] sm:$0xff]  ;;  %v319_v19 = vld [vmem:[%s3474_s26 + $0x3f8] sm:$0xff] }
 0x10b   : > { %685 = vadd.xlane.f32.xlu1 %v684_v7  ;;  %682 = vadd.xlane.f32.xlu0 %v681_v10  ;;  %v3921_v26 = vsub.f32 %v3480_v1, %v706_v56  ;;  %v3936_v1 = vsub.f32 %v3477_v0, %v708_v11  ;;  %v711_v56 = vmul.f32 0.010416667, %v3719_v42  ;;  %v3955_v42 = vsub.f32 %v3500_v9, %v710_v30 }
 0x10c   : > { %v3903_v49 = vpop.xlane.xlu1 %475  ;;  %v3905_v34 = vpop.xlane.xlu0 %472  ;;  %v3979_v30 = vsub.f32 %v3510_v13, %v712_v58 }
 0x10d   : > { %6156 = vst [vmem:[#allocation30_spill] sm:$0xff] %v3903_v49  ;;  %6157 = vst [vmem:[#allocation31_spill] sm:$0xff] %v3905_v34  ;;  %v696_v49 = vsel %vm320_vm0, %v317_v52, 0.0  ;;  %v693_v34 = vsel %vm320_vm0, %v316_v57, 0.0  ;;  %v702_v52 = vsel %vm320_vm0, %v319_v19, 0.0  ;;  %v962_v5 = vmul.f32 %v3921_v26, %v3921_v26 }
 0x10e   : > { %6158 = vst [vmem:[#allocation32_spill] sm:$0xff] %v3921_v26  ;;  %6160 = vst [vmem:[#allocation34_spill] sm:$0xff] %v3936_v1  ;;  %v3952_v0 = vsub.f32 %v3497_v8, %v711_v56  ;;  %v966_v54 = vmul.f32 %v3955_v42, %v3955_v42 }
 0x10f   : > { %691 = vadd.xlane.f32.xlu1 %v690_v39  ;;  %688 = vadd.xlane.f32.xlu0 %v687_v50  ;;  %6163 = vst [vmem:[#allocation37_spill] sm:$0xff] %v3955_v42  ;;  %v1090_v43 = vsel %vm320_vm0, %v962_v5, 0.0  ;;  %6165 = vst [vmem:[#allocation39_spill] sm:$0xff] %v3979_v30  ;;  %v714_v5 = vmul.f32 0.010416667, %v3737_v60  ;;  %v6218_v42 = vld [vmem:[#allocation22_spill] sm:$0xff] }
 0x110   : > { %v3913_v7 = vpop.xlane.xlu1 %481  ;;  %v3915_v10 = vpop.xlane.xlu0 %478  ;;  %6162 = vst [vmem:[#allocation36_spill] sm:$0xff] %v3952_v0  ;;  %v1102_v13 = vsel %vm320_vm0, %v966_v54, 0.0  ;;  %v716_v60 = vmul.f32 0.010416667, %v3745_v6 }
 0x113   : > { %697 = vadd.xlane.f32.xlu1 %v696_v49  ;;  %694 = vadd.xlane.f32.xlu0 %v693_v34  ;;  %v3943_v49 = vsub.f32 %v3483_v2, %v709_v48  ;;  %v963_v34 = vmul.f32 %v3927_v31, %v3927_v31  ;;  %v964_v2 = vmul.f32 %v3936_v1, %v3936_v1  ;;  %v713_v48 = vmul.f32 0.010416667, %v3727_v53  ;;  %v3240_v1 = vld [vmem:[%s3474_s26 + $0x150] sm:$0xff] }
 0x114   : > { %v3929_v39 = vpop.xlane.xlu1 %487  ;;  %v3931_v50 = vpop.xlane.xlu0 %484  ;;  %v967_v53 = vmul.f32 %v3952_v0, %v3952_v0 }
 0x115   : > { %6161 = vst [vmem:[#allocation35_spill] sm:$0xff] %v3943_v49  ;;  %v1093_v11 = vsel %vm320_vm0, %v963_v34, 0.0  ;;  %v965_v19 = vmul.f32 %v3943_v49, %v3943_v49  ;;  %v3976_v56 = vsub.f32 %v3507_v12, %v713_v48  ;;  %v3994_v48 = vsub.f32 %v3520_v17, %v714_v5 }
 0x116   : > { %v1105_v12 = vsel %vm320_vm0, %v967_v53, 0.0  ;;  %v719_v17 = vmul.f32 0.010416667, %v3751_v15  ;;  %v4013_v53 = vsub.f32 %v3530_v21, %v716_v60  ;;  %v720_v60 = vmul.f32 0.010416667, %v3761_v38 }
 0x117   : > { %703 = vadd.xlane.f32.xlu1 %v702_v52  ;;  %700 = vadd.xlane.f32.xlu0 %v699_v18  ;;  %v715_v52 = vmul.f32 0.010416667, %v3735_v59  ;;  %v1096_v18 = vsel %vm320_vm0, %v964_v2, 0.0  ;;  %6164 = vst [vmem:[#allocation38_spill] sm:$0xff] %v3976_v56  ;;  %v1099_v34 = vsel %vm320_vm0, %v965_v19, 0.0  ;;  %6167 = vst [vmem:[#allocation41_spill] sm:$0xff] %v3994_v48  ;;  %v969_v58 = vmul.f32 %v3976_v56, %v3976_v56 }
 0x118   : > { %v3947_v57 = vpop.xlane.xlu1 %493  ;;  %v3949_v27 = vpop.xlane.xlu0 %490  ;;  %v968_v19 = vmul.f32 %v3979_v30, %v3979_v30  ;;  %6169 = vst [vmem:[#allocation43_spill] sm:$0xff] %v4013_v53 }
 0x119   : > { %v3988_v2 = vsub.f32 %v3517_v16, %v715_v52  ;;  %v1111_v54 = vsel %vm320_vm0, %v969_v58, 0.0 }
 0x11a   : > { %v1108_v5 = vsel %vm320_vm0, %v968_v19, 0.0  ;;  %v972_v19 = vmul.f32 %v4013_v53, %v4013_v53  ;;  %v3232_v53 = vld [vmem:[%s3474_s26 + $0x110] sm:$0xff] }
 0x11b   : > { %1094 = vadd.xlane.f32.xlu1 %v1093_v11  ;;  %1091 = vadd.xlane.f32.xlu0 %v1090_v43  ;;  %6166 = vst [vmem:[#allocation40_spill] sm:$0xff] %v3988_v2  ;;  %v717_v11 = vmul.f32 0.010416667, %v3743_v4  ;;  %v971_v6 = vmul.f32 %v3988_v2, %v3988_v2  ;;  %v6216_v2 = vld [vmem:[#allocation21_spill] sm:$0xff] }
 0x11c   : > { %v3965_v8 = vpop.xlane.xlu1 %499  ;;  %v3967_v9 = vpop.xlane.xlu0 %496  ;;  %v746_v30 = vmul.f32 0.010416667, %v6216_v2  ;;  %v3238_v2 = vld [vmem:[%s3474_s26 + $0x140] sm:$0xff] }
 0x11d   : > { %v4006_v52 = vsub.f32 %v3527_v20, %v717_v11  ;;  %v1117_v21 = vsel %vm320_vm0, %v971_v6, 0.0 }
 0x11f   : > { %1100 = vadd.xlane.f32.xlu1 %v1099_v34  ;;  %1097 = vadd.xlane.f32.xlu0 %v1096_v18  ;;  %6168 = vst [vmem:[#allocation42_spill] sm:$0xff] %v4006_v52  ;;  %v718_v18 = vmul.f32 0.010416667, %v3753_v22  ;;  %v970_v34 = vmul.f32 %v3994_v48, %v3994_v48  ;;  %v4024_v22 = vsub.f32 %v3537_v24, %v719_v17  ;;  %v723_v17 = vmul.f32 0.010416667, %v3767_v51 }
 0x120   : > { %v3983_v59 = vpop.xlane.xlu1 %505  ;;  %v3985_v43 = vpop.xlane.xlu0 %502 }
 0x121   : > { %6170 = vst [vmem:[#allocation44_spill] sm:$0xff] %v4024_v22  ;;  %v4027_v11 = vsub.f32 %v3540_v25, %v718_v18  ;;  %v1114_v58 = vsel %vm320_vm0, %v970_v34, 0.0  ;;  %v1120_v34 = vsel %vm320_vm0, %v972_v19, 0.0 }
 0x123   : > { %1106 = vadd.xlane.f32.xlu1 %v1105_v12  ;;  %1103 = vadd.xlane.f32.xlu0 %v1102_v13  ;;  %6171 = vst [vmem:[#allocation45_spill] sm:$0xff] %v4027_v11  ;;  %v973_v12 = vmul.f32 %v4006_v52, %v4006_v52  ;;  %v721_v13 = vmul.f32 0.010416667, %v3759_v35  ;;  %v975_v35 = vmul.f32 %v4024_v22, %v4024_v22 }
 0x124   : > { %v4001_v16 = vpop.xlane.xlu1 %511  ;;  %v4003_v4 = vpop.xlane.xlu0 %508  ;;  %v974_v38 = vmul.f32 %v4027_v11, %v4027_v11  ;;  %v6202_v11 = vld [vmem:[#allocation14_spill] sm:$0xff] }
 0x125   : > { %v1123_v18 = vsel %vm320_vm0, %v973_v12, 0.0  ;;  %v4048_v6 = vsub.f32 %v3547_v28, %v721_v13  ;;  %v4060_v12 = vsub.f32 %v3557_v32, %v723_v17  ;;  %v1129_v28 = vsel %vm320_vm0, %v975_v35, 0.0 }
 0x127   : > { %1112 = vadd.xlane.f32.xlu1 %v1111_v54  ;;  %1109 = vadd.xlane.f32.xlu0 %v1108_v5  ;;  %6172 = vst [vmem:[#allocation46_spill] sm:$0xff] %v4048_v6  ;;  %v4051_v54 = vsub.f32 %v3550_v29, %v720_v60  ;;  %v722_v5 = vmul.f32 0.010416667, %v3769_v55  ;;  %6174 = vst [vmem:[#allocation48_spill] sm:$0xff] %v4060_v12  ;;  %v1126_v29 = vsel %vm320_vm0, %v974_v38, 0.0 }
 0x128   : > { %v4019_v20 = vpop.xlane.xlu1 %517  ;;  %v4021_v15 = vpop.xlane.xlu0 %514  ;;  %v724_v55 = vmul.f32 0.010416667, %v3777_v63  ;;  %v977_v60 = vmul.f32 %v4048_v6, %v4048_v6  ;;  %v979_v63 = vmul.f32 %v4060_v12, %v4060_v12  ;;  %v6200_v12 = vld [vmem:[#allocation13_spill] sm:$0xff] }
 0x129   : > { %6173 = vst [vmem:[#allocation47_spill] sm:$0xff] %v4051_v54  ;;  %v4066_v13 = vsub.f32 %v3560_v33, %v722_v5  ;;  %v976_v19 = vmul.f32 %v4051_v54, %v4051_v54  ;;  %v727_v33 = vmul.f32 0.010416667, %v3783_v14  ;;  %v738_v54 = vmul.f32 0.010416667, %v6200_v12  ;;  %v3230_v12 = vld [vmem:[%s3474_s26 + $0x100] sm:$0xff] }
 0x12a   : > { %v4085_v35 = vsub.f32 %v3570_v37, %v724_v55  ;;  %v1135_v38 = vsel %vm320_vm0, %v977_v60, 0.0  ;;  %v1141_v37 = vsel %vm320_vm0, %v979_v63, 0.0  ;;  %v728_v55 = vmul.f32 0.010416667, %v3793_v47 }
 0x12b   : > { %1118 = vadd.xlane.f32.xlu1 %v1117_v21  ;;  %1115 = vadd.xlane.f32.xlu0 %v1114_v58  ;;  %v725_v58 = vmul.f32 0.010416667, %v3775_v62  ;;  %6175 = vst [vmem:[#allocation49_spill] sm:$0xff] %v4066_v13  ;;  %v1132_v5 = vsel %vm320_vm0, %v976_v19, 0.0 }
 0x12c   : > { %v4037_v24 = vpop.xlane.xlu1 %523  ;;  %v4039_v25 = vpop.xlane.xlu0 %520  ;;  %6177 = vst [vmem:[#allocation51_spill] sm:$0xff] %v4085_v35  ;;  %v980_v19 = vmul.f32 %v4085_v35, %v4085_v35  ;;  %v3224_v35 = vld [vmem:[%s3474_s26 + $0xd0] sm:$0xff] }
 0x12d   : > { %v4078_v17 = vsub.f32 %v3567_v36, %v725_v58 }
 0x12f   : > { %1124 = vadd.xlane.f32.xlu1 %v1123_v18  ;;  %1121 = vadd.xlane.f32.xlu0 %v1120_v34  ;;  %6176 = vst [vmem:[#allocation50_spill] sm:$0xff] %v4078_v17  ;;  %v726_v18 = vmul.f32 0.010416667, %v3785_v23  ;;  %v978_v34 = vmul.f32 %v4066_v13, %v4066_v13  ;;  %v4096_v23 = vsub.f32 %v3577_v40, %v727_v33  ;;  %v731_v33 = vmul.f32 0.010416667, %v3799_v61 }
 0x130   : > { %v4055_v51 = vpop.xlane.xlu1 %529  ;;  %v4057_v21 = vpop.xlane.xlu0 %526 }
 0x131   : > { %6178 = vst [vmem:[#allocation52_spill] sm:$0xff] %v4096_v23  ;;  %v4099_v58 = vsub.f32 %v3580_v41, %v726_v18  ;;  %v1138_v60 = vsel %vm320_vm0, %v978_v34, 0.0  ;;  %v1144_v34 = vsel %vm320_vm0, %v980_v19, 0.0  ;;  %v6187_v19 = vld [vmem:[#allocation7_spill] sm:$0xff] }
 0x133   : > { %1130 = vadd.xlane.f32.xlu1 %v1129_v28  ;;  %1127 = vadd.xlane.f32.xlu0 %v1126_v29  ;;  %6179 = vst [vmem:[#allocation53_spill] sm:$0xff] %v4099_v58  ;;  %v981_v28 = vmul.f32 %v4078_v17, %v4078_v17  ;;  %v729_v29 = vmul.f32 0.010416667, %v3791_v46  ;;  %v983_v46 = vmul.f32 %v4096_v23, %v4096_v23 }
 0x134   : > { %v4073_v32 = vpop.xlane.xlu1 %535  ;;  %v4075_v62 = vpop.xlane.xlu0 %532  ;;  %v982_v47 = vmul.f32 %v4099_v58, %v4099_v58  ;;  %v6184_v58 = vld [vmem:[#allocation6_spill] sm:$0xff] }
 0x135   : > { %v1147_v18 = vsel %vm320_vm0, %v981_v28, 0.0  ;;  %v4120_v63 = vsub.f32 %v3587_v44, %v729_v29  ;;  %v6182_v28 = vld [vmem:[#allocation3_spill] sm:$0xff]  ;;  %v733_v44 = vmul.f32 0.010416667, %v6184_v58  ;;  %v1153_v29 = vsel %vm320_vm0, %v983_v46, 0.0  ;;  %v6188_v46 = vld [vmem:[#allocation5_spill] sm:$0xff] }
 0x137   : > { %1136 = vadd.xlane.f32.xlu1 %v1135_v38  ;;  %1133 = vadd.xlane.f32.xlu0 %v1132_v5  ;;  %6180 = vst [vmem:[#allocation54_spill] sm:$0xff] %v4120_v63  ;;  %v4123_v38 = vsub.f32 %v3590_v45, %v728_v55  ;;  %v730_v5 = vmul.f32 0.010416667, %v3801_v3  ;;  %v1150_v45 = vsel %vm320_vm0, %v982_v47, 0.0  ;;  %v6185_v55 = vld [vmem:[#allocation4_spill] sm:$0xff]  ;;  %v4150_v47 = vsub.f32 %v6188_v46, %v733_v44 }
 0x138   : > { %v4091_v36 = vpop.xlane.xlu1 %541  ;;  %v4093_v14 = vpop.xlane.xlu0 %538 }
 0x139   : > { %6181 = vst [vmem:[#allocation55_spill] sm:$0xff] %v4123_v38  ;;  %v4138_v3 = vsub.f32 %v6185_v55, %v730_v5  ;;  %v984_v23 = vmul.f32 %v4123_v38, %v4123_v38  ;;  %6189 = vst [vmem:[#allocation4_spill] sm:$0xff] %v4150_v47  ;;  %v6190_v5 = vld [vmem:[#allocation8_spill] sm:$0xff]  ;;  %v6191_v55 = vld [vmem:[#allocation9_spill] sm:$0xff] }
 0x13b   : > { %1142 = vadd.xlane.f32.xlu1 %v1141_v37  ;;  %1139 = vadd.xlane.f32.xlu0 %v1138_v60  ;;  %v4132_v60 = vsub.f32 %v6182_v28, %v731_v33  ;;  %6186 = vst [vmem:[#allocation6_spill] sm:$0xff] %v4138_v3  ;;  %v735_v28 = vmul.f32 0.010416667, %v6190_v5  ;;  %v986_v17 = vmul.f32 %v4138_v3, %v4138_v3  ;;  %v3225_v5 = vld [vmem:[%s3474_s26 + $0xe8] sm:$0xff] }
 0x13c   : > { %v4109_v40 = vpop.xlane.xlu1 %547  ;;  %v4111_v41 = vpop.xlane.xlu0 %544 }
 0x13d   : > { %6183 = vst [vmem:[#allocation3_spill] sm:$0xff] %v4132_v60  ;;  %v1162_v13 = vsel %vm320_vm0, %v986_v17, 0.0 }
 0x13f   : > { %1148 = vadd.xlane.f32.xlu1 %v1147_v18  ;;  %1145 = vadd.xlane.f32.xlu0 %v1144_v34  ;;  %v732_v18 = vmul.f32 0.010416667, %v6187_v19  ;;  %v985_v34 = vmul.f32 %v4120_v63, %v4120_v63  ;;  %v734_v19 = vmul.f32 0.010416667, %v6191_v55  ;;  %v987_v63 = vmul.f32 %v4132_v60, %v4132_v60  ;;  %v3226_v60 = vld [vmem:[%s3474_s26 + $0xe0] sm:$0xff] }
 0x140   : > { %v4127_v61 = vpop.xlane.xlu1 %553  ;;  %v4129_v37 = vpop.xlane.xlu0 %550  ;;  %v4168_v55 = vsub.f32 %v3225_v5, %v735_v28 }
 0x141   : > { %v4157_v38 = vsub.f32 %v3224_v35, %v732_v18  ;;  %v4171_v35 = vsub.f32 %v3226_v60, %v734_v19  ;;  %v1165_v18 = vsel %vm320_vm0, %v987_v63, 0.0  ;;  %v6197_v63 = vld [vmem:[#allocation12_spill] sm:$0xff] }
 0x142   : > { %6193 = vst [vmem:[#allocation5_spill] sm:$0xff] %v4168_v55  ;;  %v739_v19 = vmul.f32 0.010416667, %v6197_v63 }
 0x143   : > { %1154 = vadd.xlane.f32.xlu1 %v1153_v29  ;;  %1151 = vadd.xlane.f32.xlu0 %v1150_v45  ;;  %6192 = vst [vmem:[#allocation7_spill] sm:$0xff] %v4157_v38  ;;  %v1159_v29 = vsel %vm320_vm0, %v985_v34, 0.0  ;;  %v1156_v45 = vsel %vm320_vm0, %v984_v23, 0.0  ;;  %6194 = vst [vmem:[#allocation8_spill] sm:$0xff] %v4171_v35  ;;  %v989_v23 = vmul.f32 %v4150_v47, %v4150_v47  ;;  %v6195_v34 = vld [vmem:[#allocation10_spill] sm:$0xff] }
 0x144   : > { %v4145_v33 = vpop.xlane.xlu1 %559  ;;  %v4147_v58 = vpop.xlane.xlu0 %556  ;;  %v988_v28 = vmul.f32 %v4157_v38, %v4157_v38  ;;  %v990_v17 = vmul.f32 %v4171_v35, %v4171_v35 }
 0x145   : > { %v1171_v47 = vsel %vm320_vm0, %v989_v23, 0.0 }
 0x146   : > { %v1168_v6 = vsel %vm320_vm0, %v988_v28, 0.0 }
 0x147   : > { %1160 = vadd.xlane.f32.xlu1 %v1159_v29  ;;  %1157 = vadd.xlane.f32.xlu0 %v1156_v45  ;;  %v737_v29 = vmul.f32 0.010416667, %v6195_v34  ;;  %v6196_v45 = vld [vmem:[#allocation11_spill] sm:$0xff]  ;;  %v991_v34 = vmul.f32 %v4168_v55, %v4168_v55  ;;  %v3229_v55 = vld [vmem:[%s3474_s26 + $0x108] sm:$0xff] }
 0x148   : > { %v4163_v44 = vpop.xlane.xlu1 %565  ;;  %v4165_v46 = vpop.xlane.xlu0 %562  ;;  %v736_v3 = vmul.f32 0.010416667, %v6196_v45  ;;  %v3227_v45 = vld [vmem:[%s3474_s26 + $0xf8] sm:$0xff]  ;;  %v4204_v35 = vsub.f32 %v3229_v55, %v739_v19 }
 0x149   : > { %v4192_v38 = vsub.f32 %v3227_v45, %v737_v29  ;;  %v741_v29 = vmul.f32 0.010416667, %v6202_v11  ;;  %v1177_v45 = vsel %vm320_vm0, %v991_v34, 0.0  ;;  %v3231_v19 = vld [vmem:[%s3474_s26 + $0x118] sm:$0xff] }
 0x14a   : > { %6201 = vst [vmem:[#allocation11_spill] sm:$0xff] %v4204_v35 }
 0x14b   : > { %1166 = vadd.xlane.f32.xlu1 %v1165_v18  ;;  %1163 = vadd.xlane.f32.xlu0 %v1162_v13  ;;  %6198 = vst [vmem:[#allocation9_spill] sm:$0xff] %v4192_v38  ;;  %v3228_v13 = vld [vmem:[%s3474_s26 + $0xf0] sm:$0xff]  ;;  %v993_v28 = vmul.f32 %v4192_v38, %v4192_v38  ;;  %v4222_v34 = vsub.f32 %v3231_v19, %v741_v29 }
 0x14c   : > { %v4181_v5 = vpop.xlane.xlu1 %571  ;;  %v4183_v60 = vpop.xlane.xlu0 %568  ;;  %v4195_v18 = vsub.f32 %v3228_v13, %v736_v3  ;;  %v1174_v3 = vsel %vm320_vm0, %v990_v17, 0.0  ;;  %v4210_v13 = vsub.f32 %v3230_v12, %v738_v54  ;;  %v6206_v54 = vld [vmem:[#allocation16_spill] sm:$0xff]  ;;  %v6207_v12 = vld [vmem:[#allocation17_spill] sm:$0xff]  ;;  %v995_v38 = vmul.f32 %v4204_v35, %v4204_v35  ;;  %v3234_v35 = vld [vmem:[%s3474_s26 + $0x120] sm:$0xff] }
 0x14d   : > { %6205 = vst [vmem:[#allocation13_spill] sm:$0xff] %v4222_v34  ;;  %v743_v17 = vmul.f32 0.010416667, %v6206_v54  ;;  %v3233_v54 = vld [vmem:[%s3474_s26 + $0x128] sm:$0xff] }
 0x14e   : > { %6199 = vst [vmem:[#allocation10_spill] sm:$0xff] %v4195_v18  ;;  %6203 = vst [vmem:[#allocation12_spill] sm:$0xff] %v4210_v13  ;;  %v992_v22 = vmul.f32 %v4195_v18, %v4195_v18  ;;  %v994_v52 = vmul.f32 %v4210_v13, %v4210_v13 }
 0x14f   : > { %1172 = vadd.xlane.f32.xlu1 %v1171_v47  ;;  %1169 = vadd.xlane.f32.xlu0 %v1168_v6  ;;  %v6204_v47 = vld [vmem:[#allocation15_spill] sm:$0xff] }
 0x150   : > { %v4199_v23 = vpop.xlane.xlu1 %577  ;;  %v4201_v63 = vpop.xlane.xlu0 %574  ;;  %v740_v6 = vmul.f32 0.010416667, %v6204_v47  ;;  %v742_v47 = vmul.f32 0.010416667, %v6207_v12  ;;  %v4240_v12 = vsub.f32 %v3233_v54, %v743_v17  ;;  %v1186_v48 = vsel %vm320_vm0, %v994_v52, 0.0 }
 0x152   : > { %v4229_v18 = vsub.f32 %v3232_v53, %v740_v6  ;;  %6209 = vst [vmem:[#allocation15_spill] sm:$0xff] %v4240_v12  ;;  %v4243_v53 = vsub.f32 %v3234_v35, %v742_v47  ;;  %v1189_v6 = vsel %vm320_vm0, %v995_v38, 0.0  ;;  %v6213_v38 = vld [vmem:[#allocation20_spill] sm:$0xff] }
 0x153   : > { %1178 = vadd.xlane.f32.xlu1 %v1177_v45  ;;  %1175 = vadd.xlane.f32.xlu0 %v1174_v3  ;;  %v1183_v45 = vsel %vm320_vm0, %v993_v28, 0.0  ;;  %v1180_v3 = vsel %vm320_vm0, %v992_v22, 0.0  ;;  %v997_v22 = vmul.f32 %v4222_v34, %v4222_v34  ;;  %v6211_v28 = vld [vmem:[#allocation18_spill] sm:$0xff]  ;;  %v747_v47 = vmul.f32 0.010416667, %v6213_v38 }
 0x154   : > { %v4217_v55 = vpop.xlane.xlu1 %583  ;;  %v4219_v11 = vpop.xlane.xlu0 %580  ;;  %6208 = vst [vmem:[#allocation14_spill] sm:$0xff] %v4229_v18  ;;  %6210 = vst [vmem:[#allocation16_spill] sm:$0xff] %v4243_v53  ;;  %v996_v17 = vmul.f32 %v4229_v18, %v4229_v18  ;;  %v998_v52 = vmul.f32 %v4243_v53, %v4243_v53 }
 0x155   : > { %v1195_v34 = vsel %vm320_vm0, %v997_v22, 0.0 }
 0x156   : > { %v1192_v56 = vsel %vm320_vm0, %v996_v17, 0.0 }
 0x157   : > { %1184 = vadd.xlane.f32.xlu1 %v1183_v45  ;;  %1181 = vadd.xlane.f32.xlu0 %v1180_v3  ;;  %v745_v45 = vmul.f32 0.010416667, %v6211_v28  ;;  %v6212_v3 = vld [vmem:[#allocation19_spill] sm:$0xff]  ;;  %v999_v28 = vmul.f32 %v4240_v12, %v4240_v12  ;;  %v3237_v12 = vld [vmem:[%s3474_s26 + $0x148] sm:$0xff] }
 0x158   : > { %v4235_v29 = vpop.xlane.xlu1 %589  ;;  %v4237_v19 = vpop.xlane.xlu0 %586  ;;  %v744_v13 = vmul.f32 0.010416667, %v6212_v3  ;;  %v3235_v3 = vld [vmem:[%s3474_s26 + $0x138] sm:$0xff]  ;;  %v4276_v53 = vsub.f32 %v3237_v12, %v747_v47 }
 0x159   : > { %v4264_v18 = vsub.f32 %v3235_v3, %v745_v45  ;;  %v749_v45 = vmul.f32 0.010416667, %v6218_v42  ;;  %v1201_v3 = vsel %vm320_vm0, %v999_v28, 0.0  ;;  %v3239_v47 = vld [vmem:[%s3474_s26 + $0x158] sm:$0xff] }
 0x15a   : > { %6217 = vst [vmem:[#allocation19_spill] sm:$0xff] %v4276_v53 }
 0x15b   : > { %1190 = vadd.xlane.f32.xlu1 %v1189_v6  ;;  %1187 = vadd.xlane.f32.xlu0 %v1186_v48  ;;  %6214 = vst [vmem:[#allocation17_spill] sm:$0xff] %v4264_v18  ;;  %v3236_v48 = vld [vmem:[%s3474_s26 + $0x130] sm:$0xff]  ;;  %v1001_v17 = vmul.f32 %v4264_v18, %v4264_v18  ;;  %v4294_v28 = vsub.f32 %v3239_v47, %v749_v45 }
 0x15c   : > { %v4253_v54 = vpop.xlane.xlu1 %595  ;;  %v4255_v35 = vpop.xlane.xlu0 %592  ;;  %v4267_v6 = vsub.f32 %v3236_v48, %v744_v13  ;;  %v1198_v13 = vsel %vm320_vm0, %v998_v52, 0.0  ;;  %v4282_v48 = vsub.f32 %v3238_v2, %v746_v30  ;;  %v6222_v30 = vld [vmem:[#allocation24_spill] sm:$0xff]  ;;  %v6223_v2 = vld [vmem:[#allocation25_spill] sm:$0xff]  ;;  %v1003_v18 = vmul.f32 %v4276_v53, %v4276_v53  ;;  %v3242_v53 = vld [vmem:[%s3474_s26 + $0x160] sm:$0xff] }
 0x15d   : > { %6221 = vst [vmem:[#allocation21_spill] sm:$0xff] %v4294_v28  ;;  %v751_v52 = vmul.f32 0.010416667, %v6222_v30  ;;  %v3241_v30 = vld [vmem:[%s3474_s26 + $0x168] sm:$0xff] }
 0x15e   : > { %6215 = vst [vmem:[#allocation18_spill] sm:$0xff] %v4267_v6  ;;  %6219 = vst [vmem:[#allocation20_spill] sm:$0xff] %v4282_v48  ;;  %v1000_v0 = vmul.f32 %v4267_v6, %v4267_v6  ;;  %v1002_v49 = vmul.f32 %v4282_v48, %v4282_v48 }
 0x15f   : > { %1196 = vadd.xlane.f32.xlu1 %v1195_v34  ;;  %1193 = vadd.xlane.f32.xlu0 %v1192_v56  ;;  %v6220_v34 = vld [vmem:[#allocation23_spill] sm:$0xff] }
 0x160   : > { %v4271_v22 = vpop.xlane.xlu1 %601  ;;  %v4273_v38 = vpop.xlane.xlu0 %598  ;;  %v748_v56 = vmul.f32 0.010416667, %v6220_v34  ;;  %v750_v34 = vmul.f32 0.010416667, %v6223_v2  ;;  %v4312_v2 = vsub.f32 %v3241_v30, %v751_v52  ;;  %v1210_v26 = vsel %vm320_vm0, %v1002_v49, 0.0 }
 0x162   : > { %v4301_v6 = vsub.f32 %v3240_v1, %v748_v56  ;;  %6227 = vst [vmem:[#allocation25_spill] sm:$0xff] %v4312_v2  ;;  %v4315_v1 = vsub.f32 %v3242_v53, %v750_v34  ;;  %v1213_v56 = vsel %vm320_vm0, %v1003_v18, 0.0  ;;  %v6231_v53 = vld [vmem:[#allocation28_spill] sm:$0xff] }
 0x163   : > { %1202 = vadd.xlane.f32.xlu1 %v1201_v3  ;;  %1199 = vadd.xlane.f32.xlu0 %v1198_v13  ;;  %v1207_v3 = vsel %vm320_vm0, %v1001_v17, 0.0  ;;  %v1204_v13 = vsel %vm320_vm0, %v1000_v0, 0.0  ;;  %v1005_v0 = vmul.f32 %v4294_v28, %v4294_v28  ;;  %v6229_v17 = vld [vmem:[#allocation26_spill] sm:$0xff]  ;;  %v755_v34 = vmul.f32 0.010416667, %v6231_v53  ;;  %v6236_v53 = vld [vmem:[#allocation29_spill] sm:$0xff] }
 0x164   : > { %v4289_v12 = vpop.xlane.xlu1 %607  ;;  %v4291_v42 = vpop.xlane.xlu0 %604  ;;  %6224 = vst [vmem:[#allocation22_spill] sm:$0xff] %v4301_v6  ;;  %6228 = vst [vmem:[#allocation56_spill] sm:$0xff] %v4315_v1  ;;  %v1004_v52 = vmul.f32 %v4301_v6, %v4301_v6  ;;  %v1006_v49 = vmul.f32 %v4315_v1, %v4315_v1  ;;  %v754_v31 = vmul.f32 0.010416667, %v6236_v53 }
 0x165   : > { %v1219_v28 = vsel %vm320_vm0, %v1005_v0, 0.0  ;;  %v3245_v0 = vld [vmem:[%s3474_s26 + $0x188] sm:$0xff] }
 0x167   : > { %1208 = vadd.xlane.f32.xlu1 %v1207_v3  ;;  %1205 = vadd.xlane.f32.xlu0 %v1204_v13  ;;  %v753_v3 = vmul.f32 0.010416667, %v6229_v17  ;;  %v6230_v13 = vld [vmem:[#allocation27_spill] sm:$0xff]  ;;  %v1007_v17 = vmul.f32 %v4312_v2, %v4312_v2  ;;  %v6238_v2 = vld [vmem:[#allocation30_spill] sm:$0xff] }
 0x168   : > { %v4307_v45 = vpop.xlane.xlu1 %613  ;;  %v4309_v47 = vpop.xlane.xlu0 %610  ;;  %v752_v48 = vmul.f32 0.010416667, %v6230_v13  ;;  %v3243_v13 = vld [vmem:[%s3474_s26 + $0x178] sm:$0xff] }
 0x169   : > { %6225 = vst [vmem:[#allocation23_spill] sm:$0xff] %v4307_v45  ;;  %6226 = vst [vmem:[#allocation24_spill] sm:$0xff] %v4309_v47  ;;  %v4336_v6 = vsub.f32 %v3243_v13, %v753_v3  ;;  %v757_v47 = vmul.f32 0.010416667, %v6238_v2  ;;  %v1225_v3 = vsel %vm320_vm0, %v1007_v17, 0.0  ;;  %v3246_v13 = vld [vmem:[%s3474_s26 + $0x180] sm:$0xff] }
 0x16b   : > { %1214 = vadd.xlane.f32.xlu1 %v1213_v56  ;;  %1211 = vadd.xlane.f32.xlu0 %v1210_v26  ;;  %6234 = vst [vmem:[#allocation28_spill] sm:$0xff] %v4336_v6  ;;  %v3244_v56 = vld [vmem:[%s3474_s26 + $0x170] sm:$0xff] }
 0x16c   : > { %v4326_v30 = vpop.xlane.xlu1 %619  ;;  %v4328_v18 = vpop.xlane.xlu0 %616  ;;  %v4339_v26 = vsub.f32 %v3244_v56, %v752_v48  ;;  %v1222_v48 = vsel %vm320_vm0, %v1006_v49, 0.0  ;;  %v4354_v56 = vsub.f32 %v3246_v13, %v754_v31  ;;  %v758_v13 = vmul.f32 0.010416667, %v3915_v10 }
 0x16d   : > { %6232 = vst [vmem:[#allocation26_spill] sm:$0xff] %v4326_v30  ;;  %6233 = vst [vmem:[#allocation27_spill] sm:$0xff] %v4328_v18  ;;  %v1216_v30 = vsel %vm320_vm0, %v1004_v52, 0.0  ;;  %v4344_v18 = vsub.f32 %v3245_v0, %v755_v34  ;;  %v1009_v34 = vmul.f32 %v4336_v6, %v4336_v6  ;;  %v759_v0 = vmul.f32 0.010416667, %v3913_v7 }
 0x16e   : > { %6235 = vst [vmem:[#allocation57_spill] sm:$0xff] %v4339_v26  ;;  %6239 = vst [vmem:[#allocation30_spill] sm:$0xff] %v4354_v56  ;;  %v1008_v2 = vmul.f32 %v4339_v26, %v4339_v26  ;;  %v762_v6 = vmul.f32 0.010416667, %v3949_v27  ;;  %v3251_v27 = vld [vmem:[%s3474_s26 + $0x1b8] sm:$0xff] }
 0x16f   : > { %1220 = vadd.xlane.f32.xlu1 %v1219_v28  ;;  %1217 = vadd.xlane.f32.xlu0 %v1216_v30  ;;  %6237 = vst [vmem:[#allocation29_spill] sm:$0xff] %v4344_v18  ;;  %v6240_v28 = vld [vmem:[#allocation31_spill] sm:$0xff]  ;;  %v3247_v30 = vld [vmem:[%s3474_s26 + $0x198] sm:$0xff]  ;;  %v1011_v31 = vmul.f32 %v4344_v18, %v4344_v18 }
 0x170   : > { %v4347_v1 = vpop.xlane.xlu1 %625  ;;  %v4349_v45 = vpop.xlane.xlu0 %622  ;;  %v756_v52 = vmul.f32 0.010416667, %v6240_v28  ;;  %v4362_v53 = vsub.f32 %v3247_v30, %v757_v47  ;;  %v3248_v28 = vld [vmem:[%s3474_s26 + $0x190] sm:$0xff]  ;;  %v1228_v47 = vsel %vm320_vm0, %v1008_v2, 0.0 }
 0x171   : > { %v1237_v7 = vsel %vm320_vm0, %v1011_v31, 0.0 }
 0x172   : > { %6241 = vst [vmem:[#allocation31_spill] sm:$0xff] %v4362_v53  ;;  %v4373_v26 = vsub.f32 %v3248_v28, %v756_v52  ;;  %v1013_v10 = vmul.f32 %v4362_v53, %v4362_v53  ;;  %v3249_v52 = vld [vmem:[%s3474_s26 + $0x1a8] sm:$0xff]  ;;  %v3254_v53 = vld [vmem:[%s3474_s26 + $0x1c0] sm:$0xff] }
 0x173   : > { %1226 = vadd.xlane.f32.xlu1 %v1225_v3  ;;  %1223 = vadd.xlane.f32.xlu0 %v1222_v48  ;;  %v1231_v3 = vsel %vm320_vm0, %v1009_v34, 0.0  ;;  %v1010_v48 = vmul.f32 %v4354_v56, %v4354_v56  ;;  %v4387_v28 = vsub.f32 %v3249_v52, %v759_v0  ;;  %v3250_v34 = vld [vmem:[%s3474_s26 + $0x1a0] sm:$0xff]  ;;  %v763_v56 = vmul.f32 0.010416667, %v3947_v57 }
 0x174   : > { %v4364_v17 = vpop.xlane.xlu1 %631  ;;  %v4366_v49 = vpop.xlane.xlu0 %628  ;;  %6242 = vst [vmem:[#allocation58_spill] sm:$0xff] %v4373_v26  ;;  %v4390_v2 = vsub.f32 %v3250_v34, %v758_v13  ;;  %v1012_v0 = vmul.f32 %v4373_v26, %v4373_v26  ;;  %v765_v52 = vmul.f32 0.010416667, %v3965_v8  ;;  %v764_v13 = vmul.f32 0.010416667, %v3967_v9  ;;  %v3252_v34 = vld [vmem:[%s3474_s26 + $0x1b0] sm:$0xff] }
 0x175   : > { %6243 = vst [vmem:[#allocation59_spill] sm:$0xff] %v4387_v28  ;;  %v1234_v31 = vsel %vm320_vm0, %v1010_v48, 0.0  ;;  %v1243_v57 = vsel %vm320_vm0, %v1013_v10, 0.0  ;;  %v1015_v8 = vmul.f32 %v4387_v28, %v4387_v28  ;;  %v767_v10 = vmul.f32 0.010416667, %v3983_v59  ;;  %v3269_v28 = vld [vmem:[%s3474_s26 + $0x248] sm:$0xff] }
 0x176   : > { %6244 = vst [vmem:[#allocation60_spill] sm:$0xff] %v4390_v2  ;;  %v1014_v9 = vmul.f32 %v4390_v2, %v4390_v2  ;;  %v766_v2 = vmul.f32 0.010416667, %v3985_v43  ;;  %v769_v43 = vmul.f32 0.010416667, %v4001_v16 }
 0x177   : > { %1232 = vadd.xlane.f32.xlu1 %v1231_v3  ;;  %1229 = vadd.xlane.f32.xlu0 %v1228_v47  ;;  %v761_v3 = vmul.f32 0.010416667, %v3929_v39  ;;  %v760_v47 = vmul.f32 0.010416667, %v3931_v50 }
 0x178   : > { %v4379_v30 = vpop.xlane.xlu1 %637  ;;  %v4381_v18 = vpop.xlane.xlu0 %634  ;;  %v1246_v59 = vsel %vm320_vm0, %v1014_v9, 0.0  ;;  %v768_v9 = vmul.f32 0.010416667, %v4003_v4 }
 0x179   : > { %v4407_v48 = vsub.f32 %v3251_v27, %v761_v3  ;;  %v4410_v26 = vsub.f32 %v3252_v34, %v760_v47  ;;  %v1240_v3 = vsel %vm320_vm0, %v1012_v0, 0.0  ;;  %v3255_v27 = vld [vmem:[%s3474_s26 + $0x1d8] sm:$0xff]  ;;  %v3256_v34 = vld [vmem:[%s3474_s26 + $0x1d0] sm:$0xff] }
 0x17a   : > { %v4425_v47 = vsub.f32 %v3255_v27, %v765_v52  ;;  %v3258_v27 = vld [vmem:[%s3474_s26 + $0x1e0] sm:$0xff] }
 0x17b   : > { %1238 = vadd.xlane.f32.xlu1 %v1237_v7  ;;  %1235 = vadd.xlane.f32.xlu0 %v1234_v31  ;;  %6247 = vst [vmem:[#allocation63_spill] sm:$0xff] %v4407_v48  ;;  %6248 = vst [vmem:[#allocation64_spill] sm:$0xff] %v4410_v26  ;;  %v3253_v7 = vld [vmem:[%s3474_s26 + $0x1c8] sm:$0xff]  ;;  %v1017_v0 = vmul.f32 %v4407_v48, %v4407_v48  ;;  %v1016_v52 = vmul.f32 %v4410_v26, %v4410_v26  ;;  %v771_v26 = vmul.f32 0.010416667, %v4019_v20 }
 0x17c   : > { %v4401_v39 = vpop.xlane.xlu1 %643  ;;  %v4403_v50 = vpop.xlane.xlu0 %640  ;;  %v4417_v31 = vsub.f32 %v3253_v7, %v763_v56  ;;  %6251 = vst [vmem:[#allocation67_spill] sm:$0xff] %v4425_v47 }
 0x17d   : > { %6245 = vst [vmem:[#allocation61_spill] sm:$0xff] %v4401_v39  ;;  %6246 = vst [vmem:[#allocation62_spill] sm:$0xff] %v4403_v50  ;;  %v4420_v50 = vsub.f32 %v3254_v53, %v762_v6  ;;  %v4428_v39 = vsub.f32 %v3256_v34, %v764_v13  ;;  %v1249_v53 = vsel %vm320_vm0, %v1015_v8, 0.0  ;;  %v3257_v13 = vld [vmem:[%s3474_s26 + $0x1e8] sm:$0xff]  ;;  %v4455_v34 = vsub.f32 %v3258_v27, %v766_v2  ;;  %v3260_v2 = vld [vmem:[%s3474_s26 + $0x1f0] sm:$0xff] }
 0x17e   : > { %6249 = vst [vmem:[#allocation65_spill] sm:$0xff] %v4417_v31  ;;  %v1019_v7 = vmul.f32 %v4417_v31, %v4417_v31  ;;  %v1252_v4 = vsel %vm320_vm0, %v1016_v52, 0.0  ;;  %v3259_v31 = vld [vmem:[%s3474_s26 + $0x1f8] sm:$0xff]  ;;  %v4471_v27 = vsub.f32 %v3260_v2, %v768_v9  ;;  %v774_v9 = vmul.f32 0.010416667, %v4057_v21 }
 0x17f   : > { %6250 = vst [vmem:[#allocation66_spill] sm:$0xff] %v4420_v50  ;;  %6252 = vst [vmem:[#allocation68_spill] sm:$0xff] %v4428_v39  ;;  %1244 = vadd.xlane.f32.xlu1 %v1243_v57  ;;  %1241 = vadd.xlane.f32.xlu0 %v1240_v3  ;;  %v4442_v57 = vsub.f32 %v3257_v13, %v767_v10  ;;  %v1018_v8 = vmul.f32 %v4420_v50, %v4420_v50  ;;  %v1255_v50 = vsel %vm320_vm0, %v1017_v0, 0.0 }
 0x180   : > { %v4431_v56 = vpop.xlane.xlu1 %649  ;;  %v4433_v6 = vpop.xlane.xlu0 %646  ;;  %v1021_v3 = vmul.f32 %v4425_v47, %v4425_v47  ;;  %v1020_v10 = vmul.f32 %v4428_v39, %v4428_v39  ;;  %6254 = vst [vmem:[#allocation70_spill] sm:$0xff] %v4455_v34  ;;  %6256 = vst [vmem:[#allocation72_spill] sm:$0xff] %v4471_v27  ;;  %v1022_v20 = vmul.f32 %v4455_v34, %v4455_v34  ;;  %v781_v2 = vmul.f32 0.010416667, %v4109_v40  ;;  %v3268_v34 = vld [vmem:[%s3474_s26 + $0x230] sm:$0xff] }
 0x181   : > { %6253 = vst [vmem:[#allocation69_spill] sm:$0xff] %v4442_v57  ;;  %v1258_v47 = vsel %vm320_vm0, %v1018_v8, 0.0  ;;  %v1023_v39 = vmul.f32 %v4442_v57, %v4442_v57  ;;  %v1024_v21 = vmul.f32 %v4471_v27, %v4471_v27 }
 0x182   : > { %v1267_v0 = vsel %vm320_vm0, %v1021_v3, 0.0  ;;  %v1264_v52 = vsel %vm320_vm0, %v1020_v10, 0.0 }
 0x183   : > { %1250 = vadd.xlane.f32.xlu1 %v1249_v53  ;;  %1247 = vadd.xlane.f32.xlu0 %v1246_v59  ;;  %v4464_v53 = vsub.f32 %v3259_v31, %v769_v43  ;;  %v1261_v59 = vsel %vm320_vm0, %v1019_v7, 0.0  ;;  %v770_v31 = vmul.f32 0.010416667, %v4021_v15  ;;  %v773_v43 = vmul.f32 0.010416667, %v4037_v24 }
 0x184   : > { %v4457_v16 = vpop.xlane.xlu1 %655  ;;  %v4459_v13 = vpop.xlane.xlu0 %652  ;;  %v772_v7 = vmul.f32 0.010416667, %v4039_v25  ;;  %v777_v15 = vmul.f32 0.010416667, %v4073_v32  ;;  %v776_v24 = vmul.f32 0.010416667, %v4075_v62 }
 0x185   : > { %6255 = vst [vmem:[#allocation71_spill] sm:$0xff] %v4464_v53  ;;  %v779_v25 = vmul.f32 0.010416667, %v4091_v36  ;;  %v1273_v3 = vsel %vm320_vm0, %v1023_v39, 0.0  ;;  %v1025_v10 = vmul.f32 %v4464_v53, %v4464_v53  ;;  %v3261_v32 = vld [vmem:[%s3474_s26 + $0x208] sm:$0xff]  ;;  %v3262_v36 = vld [vmem:[%s3474_s26 + $0x200] sm:$0xff] }
 0x186   : > { %v4499_v62 = vsub.f32 %v3261_v32, %v771_v26  ;;  %v4502_v39 = vsub.f32 %v3262_v36, %v770_v31  ;;  %v3265_v26 = vld [vmem:[%s3474_s26 + $0x228] sm:$0xff]  ;;  %v3266_v31 = vld [vmem:[%s3474_s26 + $0x220] sm:$0xff]  ;;  %v4525_v48 = vsub.f32 %v3268_v34, %v776_v24  ;;  %v1276_v34 = vsel %vm320_vm0, %v1024_v21, 0.0 }
 0x187   : > { %1256 = vadd.xlane.f32.xlu1 %v1255_v50  ;;  %1253 = vadd.xlane.f32.xlu0 %v1252_v4  ;;  %v775_v50 = vmul.f32 0.010416667, %v4055_v51  ;;  %v778_v4 = vmul.f32 0.010416667, %v4093_v14  ;;  %v780_v51 = vmul.f32 0.010416667, %v4111_v41  ;;  %v4519_v36 = vsub.f32 %v3266_v31, %v774_v9 }
 0x188   : > { %v4479_v8 = vpop.xlane.xlu1 %661  ;;  %v4481_v57 = vpop.xlane.xlu0 %658  ;;  %6257 = vst [vmem:[#allocation73_spill] sm:$0xff] %v4499_v62  ;;  %6258 = vst [vmem:[#allocation74_spill] sm:$0xff] %v4502_v39  ;;  %v3263_v14 = vld [vmem:[%s3474_s26 + $0x218] sm:$0xff]  ;;  %v3272_v9 = vld [vmem:[%s3474_s26 + $0x250] sm:$0xff]  ;;  %v785_v31 = vmul.f32 0.010416667, %v4145_v33 }
 0x189   : > { %v4505_v40 = vsub.f32 %v3263_v14, %v773_v43  ;;  %v4516_v32 = vsub.f32 %v3265_v26, %v775_v50  ;;  %6264 = vst [vmem:[#allocation80_spill] sm:$0xff] %v4519_v36  ;;  %v3267_v43 = vld [vmem:[%s3474_s26 + $0x238] sm:$0xff]  ;;  %6266 = vst [vmem:[#allocation82_spill] sm:$0xff] %v4525_v48 }
 0x18a   : > { %v4522_v14 = vsub.f32 %v3267_v43, %v777_v15  ;;  %v3271_v50 = vld [vmem:[%s3474_s26 + $0x258] sm:$0xff]  ;;  %v4539_v15 = vsub.f32 %v3272_v9, %v780_v51  ;;  %v3273_v51 = vld [vmem:[%s3474_s26 + $0x268] sm:$0xff]  ;;  %v1032_v43 = vmul.f32 %v4525_v48, %v4525_v48 }
 0x18b   : > { %1262 = vadd.xlane.f32.xlu1 %v1261_v59  ;;  %1259 = vadd.xlane.f32.xlu0 %v1258_v47  ;;  %6259 = vst [vmem:[#allocation75_spill] sm:$0xff] %v4505_v40  ;;  %v1270_v47 = vsel %vm320_vm0, %v1022_v20, 0.0  ;;  %v3264_v59 = vld [vmem:[%s3474_s26 + $0x210] sm:$0xff]  ;;  %6263 = vst [vmem:[#allocation79_spill] sm:$0xff] %v4516_v32  ;;  %v783_v20 = vmul.f32 0.010416667, %v4127_v61  ;;  %v4536_v26 = vsub.f32 %v3271_v50, %v781_v2 }
 0x18c   : > { %v4507_v53 = vpop.xlane.xlu1 %667  ;;  %v4509_v41 = vpop.xlane.xlu0 %664  ;;  %v4513_v27 = vsub.f32 %v3264_v59, %v772_v7  ;;  %6265 = vst [vmem:[#allocation81_spill] sm:$0xff] %v4522_v14  ;;  %v1279_v7 = vsel %vm320_vm0, %v1025_v10, 0.0  ;;  %v3270_v59 = vld [vmem:[%s3474_s26 + $0x240] sm:$0xff]  ;;  %6270 = vst [vmem:[#allocation86_spill] sm:$0xff] %v4539_v15  ;;  %v1026_v10 = vmul.f32 %v4502_v39, %v4502_v39  ;;  %v1033_v2 = vmul.f32 %v4522_v14, %v4522_v14 }
 0x18d   : > { %6260 = vst [vmem:[#allocation76_spill] sm:$0xff] %v4507_v53  ;;  %6261 = vst [vmem:[#allocation77_spill] sm:$0xff] %v4509_v41  ;;  %v4528_v41 = vsub.f32 %v3269_v28, %v779_v25  ;;  %v4533_v53 = vsub.f32 %v3270_v59, %v778_v4  ;;  %v782_v28 = vmul.f32 0.010416667, %v4129_v37  ;;  %v1027_v25 = vmul.f32 %v4499_v62, %v4499_v62 }
 0x18e   : > { %6262 = vst [vmem:[#allocation78_spill] sm:$0xff] %v4513_v27  ;;  %6269 = vst [vmem:[#allocation85_spill] sm:$0xff] %v4536_v26  ;;  %v1029_v4 = vmul.f32 %v4505_v40, %v4505_v40  ;;  %v1031_v37 = vmul.f32 %v4516_v32, %v4516_v32  ;;  %v4562_v21 = vsub.f32 %v3273_v51, %v783_v20  ;;  %v784_v50 = vmul.f32 0.010416667, %v4147_v58  ;;  %v3274_v51 = vld [vmem:[%s3474_s26 + $0x260] sm:$0xff]  ;;  %v3283_v32 = vld [vmem:[%s3474_s26 + $0x2b8] sm:$0xff] }
 0x18f   : > { %6267 = vst [vmem:[#allocation83_spill] sm:$0xff] %v4528_v41  ;;  %6268 = vst [vmem:[#allocation84_spill] sm:$0xff] %v4533_v53  ;;  %1268 = vadd.xlane.f32.xlu1 %v1267_v0  ;;  %1265 = vadd.xlane.f32.xlu0 %v1264_v52  ;;  %v1028_v0 = vmul.f32 %v4513_v27, %v4513_v27  ;;  %v1030_v52 = vmul.f32 %v4519_v36, %v4519_v36  ;;  %v1285_v58 = vsel %vm320_vm0, %v1027_v25, 0.0 }
 0x190   : > { %v4543_v24 = vpop.xlane.xlu1 %673  ;;  %v4545_v61 = vpop.xlane.xlu0 %670  ;;  %6271 = vst [vmem:[#allocation87_spill] sm:$0xff] %v4562_v21  ;;  %v1035_v59 = vmul.f32 %v4528_v41, %v4528_v41  ;;  %v1034_v9 = vmul.f32 %v4533_v53, %v4533_v53  ;;  %v1037_v20 = vmul.f32 %v4536_v26, %v4536_v26  ;;  %v1036_v33 = vmul.f32 %v4539_v15, %v4539_v15  ;;  %v3275_v53 = vld [vmem:[%s3474_s26 + $0x278] sm:$0xff] }
 0x191   : > { %v4577_v48 = vsub.f32 %v3274_v51, %v782_v28  ;;  %v4589_v26 = vsel %vm320_vm0, %v1028_v0, 0.0  ;;  %v4592_v15 = vsel %vm320_vm0, %v1031_v37, 0.0  ;;  %v4595_v28 = vsel %vm320_vm0, %v1030_v52, 0.0  ;;  %v3276_v0 = vld [vmem:[%s3474_s26 + $0x270] sm:$0xff] }
 0x192   : > { %v4598_v51 = vsel %vm320_vm0, %v1033_v2, 0.0  ;;  %v4601_v36 = vsub.f32 %v3275_v53, %v785_v31  ;;  %v4604_v25 = vsel %vm320_vm0, %v1032_v43, 0.0  ;;  %v4612_v37 = vsub.f32 %v3276_v0, %v784_v50 }
 0x193   : > { %1274 = vadd.xlane.f32.xlu1 %v1273_v3  ;;  %1271 = vadd.xlane.f32.xlu0 %v1270_v47  ;;  %6272 = vst [vmem:[#allocation88_spill] sm:$0xff] %v4577_v48  ;;  %v1282_v3 = vsel %vm320_vm0, %v1026_v10, 0.0  ;;  %v4586_v47 = vsel %vm320_vm0, %v1029_v4, 0.0  ;;  %v4607_v10 = vsel %vm320_vm0, %v1035_v59, 0.0  ;;  %v1039_v4 = vmul.f32 %v4562_v21, %v4562_v21 }
 0x194   : > { %v4579_v14 = vpop.xlane.xlu1 %679  ;;  %v4581_v41 = vpop.xlane.xlu0 %676  ;;  %6273 = vst [vmem:[#allocation89_spill] sm:$0xff] %v4601_v36  ;;  %6274 = vst [vmem:[#allocation90_spill] sm:$0xff] %v4612_v37  ;;  %v4615_v52 = vsel %vm320_vm0, %v1034_v9, 0.0  ;;  %v4618_v53 = vsel %vm320_vm0, %v1037_v20, 0.0  ;;  %v4621_v2 = vsel %vm320_vm0, %v1036_v33, 0.0  ;;  %v1041_v33 = vmul.f32 %v4601_v36, %v4601_v36 }
 0x195   : > { %v787_v31 = vmul.f32 0.010416667, %v4163_v44  ;;  %v786_v43 = vmul.f32 0.010416667, %v4165_v46  ;;  %v789_v59 = vmul.f32 0.010416667, %v4181_v5 }
 0x196   : > { %v788_v50 = vmul.f32 0.010416667, %v4183_v60  ;;  %v791_v9 = vmul.f32 0.010416667, %v4199_v23  ;;  %v790_v20 = vmul.f32 0.010416667, %v4201_v63  ;;  %v1040_v63 = vmul.f32 %v4612_v37, %v4612_v37 }
 0x197   : > { %1280 = vadd.xlane.f32.xlu1 %v1279_v7  ;;  %1277 = vadd.xlane.f32.xlu0 %v1276_v34  ;;  %v1038_v34 = vmul.f32 %v4577_v48, %v4577_v48  ;;  %v793_v44 = vmul.f32 0.010416667, %v4217_v55  ;;  %v792_v46 = vmul.f32 0.010416667, %v4219_v11  ;;  %v4638_v5 = vsel %vm320_vm0, %v1039_v4, 0.0  ;;  %v3277_v55 = vld [vmem:[%s3474_s26 + $0x288] sm:$0xff] }
 0x198   : > { %v4626_v21 = vpop.xlane.xlu1 %685  ;;  %v4628_v7 = vpop.xlane.xlu0 %682  ;;  %v795_v0 = vmul.f32 0.010416667, %v4235_v29  ;;  %v794_v60 = vmul.f32 0.010416667, %v4237_v19  ;;  %v797_v23 = vmul.f32 0.010416667, %v4253_v54  ;;  %v4648_v11 = vsub.f32 %v3277_v55, %v787_v31 }
 0x199   : > { %v3278_v4 = vld [vmem:[%s3474_s26 + $0x280] sm:$0xff]  ;;  %v796_v29 = vmul.f32 0.010416667, %v4255_v35  ;;  %v3280_v31 = vld [vmem:[%s3474_s26 + $0x290] sm:$0xff]  ;;  %v4674_v27 = vsub.f32 %v3283_v32, %v793_v44  ;;  %v4695_v32 = vsel %vm320_vm0, %v1040_v63, 0.0 }
 0x19a   : > { %6275 = vst [vmem:[#allocation91_spill] sm:$0xff] %v4648_v11  ;;  %v4651_v36 = vsub.f32 %v3278_v4, %v786_v43  ;;  %v4665_v55 = vsub.f32 %v3280_v31, %v788_v50  ;;  %v3281_v43 = vld [vmem:[%s3474_s26 + $0x2a8] sm:$0xff]  ;;  %v3282_v35 = vld [vmem:[%s3474_s26 + $0x2a0] sm:$0xff]  ;;  %v806_v39 = vmul.f32 0.010416667, %v4349_v45 }
 0x19b   : > { %1286 = vadd.xlane.f32.xlu1 %v1285_v58  ;;  %1283 = vadd.xlane.f32.xlu0 %v1282_v3  ;;  %v4659_v58 = vsel %vm320_vm0, %v1038_v34, 0.0  ;;  %v3279_v3 = vld [vmem:[%s3474_s26 + $0x298] sm:$0xff]  ;;  %v4668_v4 = vsub.f32 %v3281_v43, %v791_v9  ;;  %v4671_v48 = vsub.f32 %v3282_v35, %v790_v20  ;;  %6281 = vst [vmem:[#allocation97_spill] sm:$0xff] %v4674_v27  ;;  %v3284_v34 = vld [vmem:[%s3474_s26 + $0x2b0] sm:$0xff]  ;;  %v3285_v50 = vld [vmem:[%s3474_s26 + $0x2c8] sm:$0xff] }
 0x19c   : > { %6276 = vst [vmem:[#allocation92_spill] sm:$0xff] %v4651_v36  ;;  %v4654_v19 = vpop.xlane.xlu1 %691  ;;  %v4656_v54 = vpop.xlane.xlu0 %688  ;;  %v4662_v37 = vsub.f32 %v3279_v3, %v789_v59  ;;  %6278 = vst [vmem:[#allocation94_spill] sm:$0xff] %v4665_v55  ;;  %v4677_v40 = vsub.f32 %v3284_v34, %v792_v46  ;;  %v799_v59 = vmul.f32 0.010416667, %v4271_v22  ;;  %v4681_v3 = vsel %vm320_vm0, %v1041_v33, 0.0  ;;  %v3286_v9 = vld [vmem:[%s3474_s26 + $0x2c0] sm:$0xff] }
 0x19d   : > { %6279 = vst [vmem:[#allocation95_spill] sm:$0xff] %v4668_v4  ;;  %6280 = vst [vmem:[#allocation96_spill] sm:$0xff] %v4671_v48  ;;  %v4684_v31 = vsub.f32 %v3285_v50, %v795_v0  ;;  %v4687_v43 = vsub.f32 %v3286_v9, %v794_v60  ;;  %v3287_v20 = vld [vmem:[%s3474_s26 + $0x2d8] sm:$0xff]  ;;  %v3288_v22 = vld [vmem:[%s3474_s26 + $0x2d0] sm:$0xff]  ;;  %v798_v46 = vmul.f32 0.010416667, %v4273_v38  ;;  %v1043_v60 = vmul.f32 %v4648_v11, %v4648_v11 }
 0x19e   : > { %6277 = vst [vmem:[#allocation93_spill] sm:$0xff] %v4662_v37  ;;  %6282 = vst [vmem:[#allocation98_spill] sm:$0xff] %v4677_v40  ;;  %v4690_v35 = vsub.f32 %v3287_v20, %v797_v23  ;;  %v4698_v44 = vsub.f32 %v3288_v22, %v796_v29  ;;  %v1044_v23 = vmul.f32 %v4665_v55, %v4665_v55  ;;  %v3289_v29 = vld [vmem:[%s3474_s26 + $0x2e8] sm:$0xff]  ;;  %v801_v50 = vmul.f32 0.010416667, %v4289_v12 }
 0x19f   : > { %6283 = vst [vmem:[#allocation99_spill] sm:$0xff] %v4684_v31  ;;  %6284 = vst [vmem:[#allocation100_spill] sm:$0xff] %v4687_v43  ;;  %1292 = vadd.xlane.f32.xlu1 %v4586_v47  ;;  %1289 = vadd.xlane.f32.xlu0 %v4589_v26  ;;  %v1042_v47 = vmul.f32 %v4651_v36, %v4651_v36  ;;  %v1045_v26 = vmul.f32 %v4662_v37, %v4662_v37  ;;  %v800_v22 = vmul.f32 0.010416667, %v4291_v42 }
 0x1a0   : > { %6285 = vst [vmem:[#allocation101_spill] sm:$0xff] %v4690_v35  ;;  %6286 = vst [vmem:[#allocation102_spill] sm:$0xff] %v4698_v44  ;;  %v4701_v33 = vpop.xlane.xlu1 %697  ;;  %v4703_v0 = vpop.xlane.xlu0 %694  ;;  %v1047_v38 = vmul.f32 %v4668_v4, %v4668_v4  ;;  %v1046_v63 = vmul.f32 %v4671_v48, %v4671_v48  ;;  %v4718_v34 = vsub.f32 %v3289_v29, %v799_v59  ;;  %v3290_v29 = vld [vmem:[%s3474_s26 + $0x2e0] sm:$0xff]  ;;  %v809_v45 = vmul.f32 0.010416667, %v4364_v17 }
 0x1a1   : > { %v1049_v9 = vmul.f32 %v4674_v27, %v4674_v27  ;;  %v1048_v20 = vmul.f32 %v4677_v40, %v4677_v40  ;;  %v1051_v48 = vmul.f32 %v4684_v31, %v4684_v31  ;;  %v1050_v59 = vmul.f32 %v4687_v43, %v4687_v43 }
 0x1a2   : > { %6287 = vst [vmem:[#allocation103_spill] sm:$0xff] %v4718_v34  ;;  %v1053_v12 = vmul.f32 %v4690_v35, %v4690_v35  ;;  %v4735_v27 = vsub.f32 %v3290_v29, %v798_v46  ;;  %v1052_v43 = vmul.f32 %v4698_v44, %v4698_v44  ;;  %v4750_v31 = vsel %vm320_vm0, %v1045_v26, 0.0 }
 0x1a3   : > { %1298 = vadd.xlane.f32.xlu1 %v4592_v15  ;;  %1295 = vadd.xlane.f32.xlu0 %v4595_v28  ;;  %v4742_v15 = vsel %vm320_vm0, %v1043_v60, 0.0  ;;  %v4745_v28 = vsel %vm320_vm0, %v1042_v47, 0.0  ;;  %v4753_v35 = vsel %vm320_vm0, %v1044_v23, 0.0  ;;  %v4756_v46 = vsel %vm320_vm0, %v1047_v38, 0.0  ;;  %v3291_v60 = vld [vmem:[%s3474_s26 + $0x2f8] sm:$0xff]  ;;  %v3292_v23 = vld [vmem:[%s3474_s26 + $0x2f0] sm:$0xff] }
 0x1a4   : > { %6288 = vst [vmem:[#allocation104_spill] sm:$0xff] %v4735_v27  ;;  %v4737_v40 = vpop.xlane.xlu1 %703  ;;  %v4739_v42 = vpop.xlane.xlu0 %700  ;;  %v4759_v29 = vsel %vm320_vm0, %v1046_v63, 0.0  ;;  %v4762_v4 = vsub.f32 %v3291_v60, %v801_v50  ;;  %v4765_v47 = vsel %vm320_vm0, %v1049_v9, 0.0  ;;  %v4768_v44 = vsel %vm320_vm0, %v1048_v20, 0.0  ;;  %v6293_v9 = vld [vmem:[#allocation23_spill] sm:$0xff]  ;;  %v6294_v60 = vld [vmem:[#allocation24_spill] sm:$0xff] }
 0x1a5   : > { %6289 = vst [vmem:[#allocation105_spill] sm:$0xff] %v4737_v40  ;;  %6290 = vst [vmem:[#allocation106_spill] sm:$0xff] %v4739_v42  ;;  %v1055_v26 = vmul.f32 %v4718_v34, %v4718_v34  ;;  %v4773_v55 = vsub.f32 %v3292_v23, %v800_v22  ;;  %v4778_v38 = vsel %vm320_vm0, %v1051_v48, 0.0  ;;  %v4781_v63 = vsel %vm320_vm0, %v1050_v59, 0.0  ;;  %v3298_v42 = vld [vmem:[%s3474_s26 + $0x320] sm:$0xff] }
 0x1a6   : > { %6291 = vst [vmem:[#allocation107_spill] sm:$0xff] %v4762_v4  ;;  %v4784_v50 = vsel %vm320_vm0, %v1053_v12, 0.0  ;;  %v803_v20 = vmul.f32 0.010416667, %v6293_v9  ;;  %v802_v34 = vmul.f32 0.010416667, %v6294_v60  ;;  %v1054_v48 = vmul.f32 %v4735_v27, %v4735_v27 }
 0x1a7   : > { %6292 = vst [vmem:[#allocation108_spill] sm:$0xff] %v4773_v55  ;;  %1304 = vadd.xlane.f32.xlu1 %v4598_v51  ;;  %1301 = vadd.xlane.f32.xlu0 %v4604_v25  ;;  %v4789_v51 = vsel %vm320_vm0, %v1052_v43, 0.0  ;;  %v6295_v25 = vld [vmem:[#allocation26_spill] sm:$0xff]  ;;  %v6296_v12 = vld [vmem:[#allocation27_spill] sm:$0xff]  ;;  %v807_v9 = vmul.f32 0.010416667, %v4347_v1  ;;  %v1057_v43 = vmul.f32 %v4762_v4, %v4762_v4 }
 0x1a8   : > { %v1095_v37 = vpop.xlane.xlu1 %1094  ;;  %v1092_v22 = vpop.xlane.xlu0 %1091  ;;  %v805_v59 = vmul.f32 0.010416667, %v6295_v25  ;;  %v804_v11 = vmul.f32 0.010416667, %v6296_v12  ;;  %v4797_v60 = vsel %vm320_vm0, %v1055_v26, 0.0  ;;  %v3293_v1 = vld [vmem:[%s3474_s26 + $0x308] sm:$0xff] }
 0x1a9   : > { %v1475_v23 = vmul.f32 0.010416667, %v1095_v37  ;;  %v1474_v36 = vmul.f32 0.010416667, %v1092_v22  ;;  %v1056_v37 = vmul.f32 %v4773_v55, %v4773_v55  ;;  %v4807_v26 = vsub.f32 %v3293_v1, %v803_v20  ;;  %v3294_v22 = vld [vmem:[%s3474_s26 + $0x300] sm:$0xff]  ;;  %v3295_v12 = vld [vmem:[%s3474_s26 + $0x318] sm:$0xff] }
 0x1aa   : > { %v4810_v25 = vsub.f32 %v3294_v22, %v802_v34  ;;  %v3296_v20 = vld [vmem:[%s3474_s26 + $0x310] sm:$0xff]  ;;  %v3297_v34 = vld [vmem:[%s3474_s26 + $0x328] sm:$0xff]  ;;  %v4826_v17 = vsel %vm320_vm0, %v1057_v43, 0.0 }
 0x1ab   : > { %v1603_v62 = vadd.f32 1e-05, %v1475_v23  ;;  %v1602_v27 = vadd.f32 1e-05, %v1474_v36  ;;  %1310 = vadd.xlane.f32.xlu1 %v4607_v10  ;;  %1307 = vadd.xlane.f32.xlu0 %v4615_v52  ;;  %6297 = vst [vmem:[#allocation23_spill] sm:$0xff] %v4807_v26  ;;  %v4814_v10 = vsel %vm320_vm0, %v1054_v48, 0.0  ;;  %v4817_v52 = vsub.f32 %v3295_v12, %v805_v59 }
 0x1ac   : > { %6298 = vst [vmem:[#allocation24_spill] sm:$0xff] %v4810_v25  ;;  %v1101_v23 = vpop.xlane.xlu1 %1100  ;;  %v1098_v36 = vpop.xlane.xlu0 %1097  ;;  %v4820_v1 = vsub.f32 %v3296_v20, %v804_v11  ;;  %v4823_v22 = vsub.f32 %v3297_v34, %v807_v9  ;;  %v4829_v48 = vsub.f32 %v3298_v42, %v806_v39  ;;  %v3299_v11 = vld [vmem:[%s3474_s26 + $0x338] sm:$0xff]  ;;  %v1059_v39 = vmul.f32 %v4807_v26, %v4807_v26 }
 0x1ad   : > { %6299 = vst [vmem:[#allocation26_spill] sm:$0xff] %v4817_v52  ;;  %2968 = vrsqrt.f32 %v1603_v62  ;;  %v1477_v55 = vmul.f32 0.010416667, %v1101_v23  ;;  %v1476_v4 = vmul.f32 0.010416667, %v1098_v36  ;;  %v4834_v62 = vsel %vm320_vm0, %v1056_v37, 0.0 }
 0x1ae   : > { %6300 = vst [vmem:[#allocation27_spill] sm:$0xff] %v4820_v1  ;;  %6301 = vst [vmem:[#allocation109_spill] sm:$0xff] %v4823_v22  ;;  %2970 = vrsqrt.f32 %v1602_v27  ;;  %v4837_v23 = vsub.f32 %v3299_v11, %v809_v45  ;;  %v808_v27 = vmul.f32 0.010416667, %v4366_v49  ;;  %v811_v42 = vmul.f32 0.010416667, %v4379_v30 }
 0x1af   : > { %6302 = vst [vmem:[#allocation110_spill] sm:$0xff] %v4829_v48  ;;  %v1605_v40 = vadd.f32 1e-05, %v1477_v55  ;;  %v1604_v59 = vadd.f32 1e-05, %v1476_v4  ;;  %1316 = vadd.xlane.f32.xlu1 %v4618_v53  ;;  %1313 = vadd.xlane.f32.xlu0 %v4621_v2  ;;  %v1058_v55 = vmul.f32 %v4810_v25, %v4810_v25  ;;  %v1061_v4 = vmul.f32 %v4817_v52, %v4817_v52 }
 0x1b0   : > { %6303 = vst [vmem:[#allocation111_spill] sm:$0xff] %v4837_v23  ;;  %v1107_v9 = vpop.xlane.xlu1 %1106  ;;  %v1104_v43 = vpop.xlane.xlu0 %1103  ;;  %v1060_v49 = vmul.f32 %v4820_v1, %v4820_v1  ;;  %v1063_v37 = vmul.f32 %v4823_v22, %v4823_v22  ;;  %v810_v45 = vmul.f32 0.010416667, %v4381_v18  ;;  %v1062_v30 = vmul.f32 %v4829_v48, %v4829_v48 }
 0x1b1   : > { %2972 = vrsqrt.f32 %v1605_v40  ;;  %v1479_v53 = vmul.f32 0.010416667, %v1107_v9  ;;  %v1478_v2 = vmul.f32 0.010416667, %v1104_v43  ;;  %v3300_v40 = vld [vmem:[%s3474_s26 + $0x330] sm:$0xff]  ;;  %v4860_v11 = vsel %vm320_vm0, %v1059_v39, 0.0 }
 0x1b2   : > { %2974 = vrsqrt.f32 %v1604_v59  ;;  %v4857_v20 = vsub.f32 %v3300_v40, %v808_v27  ;;  %v4863_v18 = vsel %vm320_vm0, %v1058_v55, 0.0  ;;  %v4869_v43 = vsel %vm320_vm0, %v1061_v4, 0.0  ;;  %v3301_v27 = vld [vmem:[%s3474_s26 + $0x348] sm:$0xff]  ;;  %v4877_v39 = vld [vmem:[%s6016_s1] ss:$0 sm:$0xff] }
 0x1b3   : > { %v1607_v36 = vadd.f32 1e-05, %v1479_v53  ;;  %v1606_v12 = vadd.f32 1e-05, %v1478_v2  ;;  %1322 = vadd.xlane.f32.xlu1 %v4638_v5  ;;  %1319 = vadd.xlane.f32.xlu0 %v4659_v58  ;;  %v1065_v5 = vmul.f32 %v4837_v23, %v4837_v23  ;;  %v4872_v53 = vsub.f32 %v3301_v27, %v811_v42  ;;  %v3302_v40 = vld [vmem:[%s3474_s26 + $0x340] sm:$0xff]  ;;  %v6307_v27 = vld [vmem:[#allocation61_spill] sm:$0xff] }
 0x1b4   : > { %6304 = vst [vmem:[#allocation112_spill] sm:$0xff] %v4857_v20  ;;  %v1113_v34 = vpop.xlane.xlu1 %1112  ;;  %v1110_v59 = vpop.xlane.xlu0 %1109  ;;  %v4880_v55 = vsel %vm320_vm0, %v1060_v49, 0.0  ;;  %v4883_v2 = vsel %vm320_vm0, %v1063_v37, 0.0  ;;  %v4891_v42 = vsel %vm320_vm0, %v1062_v30, 0.0  ;;  %v813_v49 = vmul.f32 0.010416667, %v6307_v27 }
 0x1b5   : > { %2976 = vrsqrt.f32 %v1607_v36  ;;  %v1481_v58 = vmul.f32 0.010416667, %v1113_v34  ;;  %v1480_v9 = vmul.f32 0.010416667, %v1110_v59  ;;  %6305 = vst [vmem:[#allocation113_spill] sm:$0xff] %v4872_v53  ;;  %v4886_v34 = vsub.f32 %v3302_v40, %v810_v45  ;;  %v6308_v37 = vld [vmem:[#allocation33_spill] sm:$0xff] }
 0x1b6   : > { %2978 = vrsqrt.f32 %v1606_v12  ;;  %v4898_v45 = vsel %vm320_vm0, %v1065_v5, 0.0  ;;  %v6309_v30 = vld [vmem:[#allocation32_spill] sm:$0xff]  ;;  %v1067_v5 = vmul.f32 %v4872_v53, %v4872_v53 }
 0x1b7   : > { %v2969_v36 = vpop.eup %2968  ;;  %6306 = vst [vmem:[#allocation114_spill] sm:$0xff] %v4886_v34  ;;  %v1609_v4 = vadd.f32 1e-05, %v1481_v58  ;;  %v1608_v59 = vadd.f32 1e-05, %v1480_v9  ;;  %1328 = vadd.xlane.f32.xlu1 %v4681_v3  ;;  %1325 = vadd.xlane.f32.xlu0 %v4695_v32  ;;  %v1064_v3 = vmul.f32 %v4857_v20, %v4857_v20 }
 0x1b8   : > { %v2971_v12 = vpop.eup %2970  ;;  %v1859_v23 = vmul.f32 %v2969_v36, %v6308_v37  ;;  %v1119_v48 = vpop.xlane.xlu1 %1118  ;;  %v4905_v32 = vld [vmem:[%s6017_s2] ss:$0 sm:$0xff]  ;;  %v6310_v36 = vld [vmem:[#allocation62_spill] sm:$0xff] }
 0x1b9   : > { %v1116_v22 = vpop.xlane.xlu0 %1115  ;;  %v1858_v58 = vmul.f32 %v2971_v12, %v6309_v30  ;;  %2980 = vrsqrt.f32 %v1609_v4  ;;  %v1483_v9 = vmul.f32 0.010416667, %v1119_v48  ;;  %v812_v27 = vmul.f32 0.010416667, %v6310_v36  ;;  %v6311_v12 = vld [vmem:[#allocation35_spill] sm:$0xff] }
 0x1ba   : > { %v1482_v40 = vmul.f32 0.010416667, %v1116_v22  ;;  %v1994_v37 = vmul.f32 %v4877_v39, %v1859_v23  ;;  %2982 = vrsqrt.f32 %v1608_v59  ;;  %v1066_v22 = vmul.f32 %v4886_v34, %v4886_v34  ;;  %v3303_v23 = vld [vmem:[%s3474_s26 + $0x358] sm:$0xff]  ;;  %v3304_v34 = vld [vmem:[%s3474_s26 + $0x350] sm:$0xff] }
 0x1bb   : > { %v2973_v20 = vpop.eup %2972  ;;  %v1993_v1 = vmul.f32 %v4877_v39, %v1858_v58  ;;  %v1611_v52 = vadd.f32 1e-05, %v1483_v9  ;;  %1334 = vadd.xlane.f32.xlu1 %v4742_v15  ;;  %1331 = vadd.xlane.f32.xlu0 %v4745_v28  ;;  %v4918_v4 = vsub.f32 %v3303_v23, %v813_v49  ;;  %v6312_v28 = vld [vmem:[#allocation34_spill] sm:$0xff]  ;;  %v4928_v26 = vsub.f32 %v3304_v34, %v812_v27  ;;  %v6313_v23 = vld [vmem:[#allocation36_spill] sm:$0xff] }
 0x1bc   : > { %v1610_v25 = vadd.f32 1e-05, %v1482_v40  ;;  %v2975_v48 = vpop.eup %2974  ;;  %v2129_v59 = vadd.f32 %v4905_v32, %v1994_v37  ;;  %v1861_v30 = vmul.f32 %v2973_v20, %v6311_v12  ;;  %v1125_v58 = vpop.xlane.xlu1 %1124  ;;  %v4923_v40 = vsel %vm320_vm0, %v1064_v3, 0.0 }
 0x1bd   : > { %v1122_v9 = vpop.xlane.xlu0 %1121  ;;  %v2128_v15 = vadd.f32 %v4905_v32, %v1993_v1  ;;  %v1860_v36 = vmul.f32 %v2975_v48, %v6312_v28  ;;  %2984 = vrsqrt.f32 %v1611_v52  ;;  %v1485_v53 = vmul.f32 0.010416667, %v1125_v58 }
 0x1be   : > { %2257 = vst.msk [vmem:[%s4931_s6 + $0x8] sm:$0xff] %vm320_vm0, %v2129_v59  ;;  %v1996_v20 = vmul.f32 %v4877_v39, %v1861_v30  ;;  %2986 = vrsqrt.f32 %v1610_v25  ;;  %v1484_v49 = vmul.f32 0.010416667, %v1122_v9  ;;  %v4942_v34 = vsel %vm320_vm0, %v1067_v5, 0.0 }
 0x1bf   : > { %v2977_v3 = vpop.eup %2976  ;;  %2256 = vst.msk [vmem:[%s4931_s6] sm:$0xff] %vm320_vm0, %v2128_v15  ;;  %v1995_v1 = vmul.f32 %v4877_v39, %v1860_v36  ;;  %v1613_v52 = vadd.f32 1e-05, %v1485_v53  ;;  %1340 = vadd.xlane.f32.xlu1 %v4750_v31  ;;  %1337 = vadd.xlane.f32.xlu0 %v4753_v35  ;;  %v4945_v27 = vsel %vm320_vm0, %v1066_v22, 0.0  ;;  %v815_v25 = vmul.f32 0.010416667, %v4431_v56 }
 0x1c0   : > { %v2979_v37 = vpop.eup %2978  ;;  %v2131_v48 = vadd.f32 %v4905_v32, %v1996_v20  ;;  %v1863_v59 = vmul.f32 %v2977_v3, %v6313_v23  ;;  %v1612_v53 = vadd.f32 1e-05, %v1484_v49  ;;  %v1131_v12 = vpop.xlane.xlu1 %1130  ;;  %v6314_v35 = vld [vmem:[#allocation37_spill] sm:$0xff]  ;;  %v814_v22 = vmul.f32 0.010416667, %v4433_v6  ;;  %v3305_v3 = vld [vmem:[%s3474_s26 + $0x368] sm:$0xff] }
 0x1c1   : > { %v1128_v31 = vpop.xlane.xlu0 %1127  ;;  %v2130_v30 = vadd.f32 %v4905_v32, %v1995_v1  ;;  %v1862_v58 = vmul.f32 %v2979_v37, %v6314_v35  ;;  %2988 = vrsqrt.f32 %v1613_v52  ;;  %v1487_v5 = vmul.f32 0.010416667, %v1131_v12  ;;  %v6315_v37 = vld [vmem:[#allocation38_spill] sm:$0xff] }
 0x1c2   : > { %2259 = vst.msk [vmem:[%s4931_s6 + $0x18] sm:$0xff] %vm320_vm0, %v2131_v48  ;;  %v1998_v56 = vmul.f32 %v4877_v39, %v1863_v59  ;;  %2990 = vrsqrt.f32 %v1612_v53  ;;  %v1486_v9 = vmul.f32 0.010416667, %v1128_v31  ;;  %v1069_v6 = vmul.f32 %v4918_v4, %v4918_v4  ;;  %v6316_v53 = vld [vmem:[#allocation39_spill] sm:$0xff] }
 0x1c3   : > { %v2981_v15 = vpop.eup %2980  ;;  %2258 = vst.msk [vmem:[%s4931_s6 + $0x10] sm:$0xff] %vm320_vm0, %v2130_v30  ;;  %v1997_v28 = vmul.f32 %v4877_v39, %v1862_v58  ;;  %v1615_v36 = vadd.f32 1e-05, %v1487_v5  ;;  %1346 = vadd.xlane.f32.xlu1 %v4756_v46  ;;  %1343 = vadd.xlane.f32.xlu0 %v4759_v29  ;;  %v1068_v20 = vmul.f32 %v4928_v26, %v4928_v26  ;;  %v3306_v30 = vld [vmem:[%s3474_s26 + $0x360] sm:$0xff] }
 0x1c4   : > { %v2983_v49 = vpop.eup %2982  ;;  %v4966_v1 = vsub.f32 %v3305_v3, %v815_v25  ;;  %v2133_v52 = vadd.f32 %v4905_v32, %v1998_v56  ;;  %v1865_v48 = vmul.f32 %v2981_v15, %v6315_v37  ;;  %v1614_v46 = vadd.f32 1e-05, %v1486_v9  ;;  %v1137_v23 = vpop.xlane.xlu1 %1136  ;;  %v6317_v3 = vld [vmem:[#allocation40_spill] sm:$0xff] }
 0x1c5   : > { %v1134_v59 = vpop.xlane.xlu0 %1133  ;;  %v2132_v29 = vadd.f32 %v4905_v32, %v1997_v28  ;;  %v1864_v12 = vmul.f32 %v2983_v49, %v6316_v53  ;;  %2992 = vrsqrt.f32 %v1615_v36  ;;  %v1489_v31 = vmul.f32 0.010416667, %v1137_v23 }
 0x1c6   : > { %v4973_v35 = vsub.f32 %v3306_v30, %v814_v22  ;;  %2261 = vst.msk [vmem:[%s4931_s6 + $0x28] sm:$0xff] %vm320_vm0, %v2133_v52  ;;  %v2000_v25 = vmul.f32 %v4877_v39, %v1865_v48  ;;  %2994 = vrsqrt.f32 %v1614_v46  ;;  %v1488_v58 = vmul.f32 0.010416667, %v1134_v59 }
 0x1c7   : > { %v2985_v5 = vpop.eup %2984  ;;  %2260 = vst.msk [vmem:[%s4931_s6 + $0x20] sm:$0xff] %vm320_vm0, %v2132_v29  ;;  %v1999_v56 = vmul.f32 %v4877_v39, %v1864_v12  ;;  %v1617_v9 = vadd.f32 1e-05, %v1489_v31  ;;  %1352 = vadd.xlane.f32.xlu1 %v4765_v47  ;;  %1349 = vadd.xlane.f32.xlu0 %v4768_v44  ;;  %v4984_v22 = vsel %vm320_vm0, %v1069_v6, 0.0  ;;  %v4987_v15 = vsel %vm320_vm0, %v1068_v20, 0.0  ;;  %v6318_v44 = vld [vmem:[#allocation41_spill] sm:$0xff] }
 0x1c8   : > { %v2987_v28 = vpop.eup %2986  ;;  %v817_v36 = vmul.f32 0.010416667, %v4457_v16  ;;  %v2135_v49 = vadd.f32 %v4905_v32, %v2000_v25  ;;  %v1867_v52 = vmul.f32 %v2985_v5, %v6317_v3  ;;  %v1616_v37 = vadd.f32 1e-05, %v1488_v58  ;;  %v1143_v48 = vpop.xlane.xlu1 %1142  ;;  %v3307_v25 = vld [vmem:[%s3474_s26 + $0x378] sm:$0xff]  ;;  %v6320_v3 = vld [vmem:[#allocation43_spill] sm:$0xff] }
 0x1c9   : > { %v1140_v47 = vpop.xlane.xlu0 %1139  ;;  %v2134_v46 = vadd.f32 %v4905_v32, %v1999_v56  ;;  %v1866_v23 = vmul.f32 %v2987_v28, %v6318_v44  ;;  %2996 = vrsqrt.f32 %v1617_v9  ;;  %v1491_v6 = vmul.f32 0.010416667, %v1143_v48  ;;  %v6319_v56 = vld [vmem:[#allocation42_spill] sm:$0xff]  ;;  %v3308_v48 = vld [vmem:[%s3474_s26 + $0x370] sm:$0xff] }
 0x1ca   : > { %v816_v20 = vmul.f32 0.010416667, %v4459_v13  ;;  %2263 = vst.msk [vmem:[%s4931_s6 + $0x38] sm:$0xff] %vm320_vm0, %v2135_v49  ;;  %v2002_v16 = vmul.f32 %v4877_v39, %v1867_v52  ;;  %2998 = vrsqrt.f32 %v1616_v37  ;;  %v1490_v59 = vmul.f32 0.010416667, %v1140_v47 }
 0x1cb   : > { %v2989_v29 = vpop.eup %2988  ;;  %2262 = vst.msk [vmem:[%s4931_s6 + $0x30] sm:$0xff] %vm320_vm0, %v2134_v46  ;;  %v2001_v53 = vmul.f32 %v4877_v39, %v1866_v23  ;;  %v1619_v12 = vadd.f32 1e-05, %v1491_v6  ;;  %1358 = vadd.xlane.f32.xlu1 %v4778_v38  ;;  %1355 = vadd.xlane.f32.xlu0 %v4781_v63  ;;  %v1071_v13 = vmul.f32 %v4966_v1, %v4966_v1 }
 0x1cc   : > { %v1070_v31 = vmul.f32 %v4973_v35, %v4973_v35  ;;  %v2991_v30 = vpop.eup %2990  ;;  %v5008_v58 = vsub.f32 %v3307_v25, %v817_v36  ;;  %v2137_v5 = vadd.f32 %v4905_v32, %v2002_v16  ;;  %v1869_v9 = vmul.f32 %v2989_v29, %v6319_v56  ;;  %v1149_v28 = vpop.xlane.xlu1 %1148 }
 0x1cd   : > { %v1618_v38 = vadd.f32 1e-05, %v1490_v59  ;;  %v1146_v49 = vpop.xlane.xlu0 %1145  ;;  %v2136_v63 = vadd.f32 %v4905_v32, %v2001_v53  ;;  %v1868_v52 = vmul.f32 %v2991_v30, %v6320_v3  ;;  %3000 = vrsqrt.f32 %v1619_v12  ;;  %v6321_v12 = vld [vmem:[#allocation44_spill] sm:$0xff] }
 0x1ce   : > { %v1493_v37 = vmul.f32 0.010416667, %v1149_v28  ;;  %v5015_v47 = vsub.f32 %v3308_v48, %v816_v20  ;;  %2265 = vst.msk [vmem:[%s4931_s6 + $0x48] sm:$0xff] %vm320_vm0, %v2137_v5  ;;  %v2004_v36 = vmul.f32 %v4877_v39, %v1869_v9  ;;  %v1492_v46 = vmul.f32 0.010416667, %v1146_v49 }
 0x1cf   : > { %3002 = vrsqrt.f32 %v1618_v38  ;;  %v2993_v44 = vpop.eup %2992  ;;  %2264 = vst.msk [vmem:[%s4931_s6 + $0x40] sm:$0xff] %vm320_vm0, %v2136_v63  ;;  %v2003_v23 = vmul.f32 %v4877_v39, %v1868_v52  ;;  %1364 = vadd.xlane.f32.xlu1 %v4784_v50  ;;  %1361 = vadd.xlane.f32.xlu0 %v4789_v51  ;;  %v5026_v20 = vsel %vm320_vm0, %v1071_v13, 0.0  ;;  %v5029_v16 = vsel %vm320_vm0, %v1070_v31, 0.0  ;;  %v6322_v51 = vld [vmem:[#allocation45_spill] sm:$0xff] }
 0x1d0   : > { %v1621_v6 = vadd.f32 1e-05, %v1493_v37  ;;  %v2995_v59 = vpop.eup %2994  ;;  %v819_v29 = vmul.f32 0.010416667, %v4479_v8  ;;  %v2139_v53 = vadd.f32 %v4905_v32, %v2004_v36  ;;  %v1871_v30 = vmul.f32 %v2993_v44, %v6321_v12  ;;  %v1155_v5 = vpop.xlane.xlu1 %1154  ;;  %v3309_v37 = vld [vmem:[%s3474_s26 + $0x388] sm:$0xff] }
 0x1d1   : > { %v1620_v25 = vadd.f32 1e-05, %v1492_v46  ;;  %v1152_v50 = vpop.xlane.xlu0 %1151  ;;  %v2138_v56 = vadd.f32 %v4905_v32, %v2003_v23  ;;  %v1870_v9 = vmul.f32 %v2995_v59, %v6322_v51  ;;  %v1495_v13 = vmul.f32 0.010416667, %v1155_v5  ;;  %v6323_v46 = vld [vmem:[#allocation46_spill] sm:$0xff]  ;;  %v6324_v59 = vld [vmem:[#allocation47_spill] sm:$0xff] }
 0x1d2   : > { %3004 = vrsqrt.f32 %v1621_v6  ;;  %v818_v31 = vmul.f32 0.010416667, %v4481_v57  ;;  %2267 = vst.msk [vmem:[%s4931_s6 + $0x58] sm:$0xff] %vm320_vm0, %v2139_v53  ;;  %v2006_v8 = vmul.f32 %v4877_v39, %v1871_v30  ;;  %v1494_v38 = vmul.f32 0.010416667, %v1152_v50  ;;  %v3310_v30 = vld [vmem:[%s3474_s26 + $0x380] sm:$0xff] }
 0x1d3   : > { %3006 = vrsqrt.f32 %v1620_v25  ;;  %v2997_v28 = vpop.eup %2996  ;;  %2266 = vst.msk [vmem:[%s4931_s6 + $0x50] sm:$0xff] %vm320_vm0, %v2138_v56  ;;  %v2005_v49 = vmul.f32 %v4877_v39, %v1870_v9  ;;  %v1623_v63 = vadd.f32 1e-05, %v1495_v13  ;;  %1370 = vadd.xlane.f32.xlu1 %v4797_v60  ;;  %1367 = vadd.xlane.f32.xlu0 %v4814_v10  ;;  %v1073_v57 = vmul.f32 %v5008_v58, %v5008_v58 }
 0x1d4   : > { %v1072_v3 = vmul.f32 %v5015_v47, %v5015_v47  ;;  %v2999_v52 = vpop.eup %2998  ;;  %v5050_v48 = vsub.f32 %v3309_v37, %v819_v29  ;;  %v2141_v36 = vadd.f32 %v4905_v32, %v2006_v8  ;;  %v1873_v44 = vmul.f32 %v2997_v28, %v6323_v46  ;;  %v1161_v23 = vpop.xlane.xlu1 %1160  ;;  %v6325_v8 = vld [vmem:[#allocation76_spill] sm:$0xff] }
 0x1d5   : > { %v1622_v60 = vadd.f32 1e-05, %v1494_v38  ;;  %v1158_v6 = vpop.xlane.xlu0 %1157  ;;  %v2140_v10 = vadd.f32 %v4905_v32, %v2005_v49  ;;  %v1872_v53 = vmul.f32 %v2999_v52, %v6324_v59  ;;  %3008 = vrsqrt.f32 %v1623_v63  ;;  %v6326_v49 = vld [vmem:[#allocation48_spill] sm:$0xff] }
 0x1d6   : > { %v1497_v12 = vmul.f32 0.010416667, %v1161_v23  ;;  %v5057_v25 = vsub.f32 %v3310_v30, %v818_v31  ;;  %2269 = vst.msk [vmem:[%s4931_s6 + $0x68] sm:$0xff] %vm320_vm0, %v2141_v36  ;;  %v2008_v29 = vmul.f32 %v4877_v39, %v1873_v44  ;;  %v1496_v5 = vmul.f32 0.010416667, %v1158_v6 }
 0x1d7   : > { %3010 = vrsqrt.f32 %v1622_v60  ;;  %v3001_v50 = vpop.eup %3000  ;;  %2268 = vst.msk [vmem:[%s4931_s6 + $0x60] sm:$0xff] %vm320_vm0, %v2140_v10  ;;  %v2007_v56 = vmul.f32 %v4877_v39, %v1872_v53  ;;  %1376 = vadd.xlane.f32.xlu1 %v4826_v17  ;;  %1373 = vadd.xlane.f32.xlu0 %v4834_v62  ;;  %v5068_v9 = vsel %vm320_vm0, %v1073_v57, 0.0  ;;  %v5071_v13 = vsel %vm320_vm0, %v1072_v3, 0.0  ;;  %v6327_v62 = vld [vmem:[#allocation49_spill] sm:$0xff] }
 0x1d8   : > { %v1625_v51 = vadd.f32 1e-05, %v1497_v12  ;;  %v821_v38 = vmul.f32 0.010416667, %v6325_v8  ;;  %v2143_v28 = vadd.f32 %v4905_v32, %v2008_v29  ;;  %v1875_v63 = vmul.f32 %v3001_v50, %v6326_v49  ;;  %v1167_v37 = vpop.xlane.xlu1 %1166  ;;  %v6328_v3 = vld [vmem:[#allocation77_spill] sm:$0xff]  ;;  %v3311_v29 = vld [vmem:[%s3474_s26 + $0x398] sm:$0xff] }
 0x1d9   : > { %v3003_v31 = vpop.eup %3002  ;;  %v1624_v52 = vadd.f32 1e-05, %v1496_v5  ;;  %v1164_v17 = vpop.xlane.xlu0 %1163  ;;  %v2142_v36 = vadd.f32 %v4905_v32, %v2007_v56  ;;  %v1499_v57 = vmul.f32 0.010416667, %v1167_v37  ;;  %v820_v44 = vmul.f32 0.010416667, %v6328_v3 }
 0x1da   : > { %v1874_v46 = vmul.f32 %v3003_v31, %v6327_v62  ;;  %3012 = vrsqrt.f32 %v1625_v51  ;;  %2271 = vst.msk [vmem:[%s4931_s6 + $0x78] sm:$0xff] %vm320_vm0, %v2143_v28  ;;  %v2010_v60 = vmul.f32 %v4877_v39, %v1875_v63  ;;  %v1498_v23 = vmul.f32 0.010416667, %v1164_v17  ;;  %v6329_v56 = vld [vmem:[#allocation50_spill] sm:$0xff]  ;;  %v6330_v28 = vld [vmem:[#allocation51_spill] sm:$0xff] }
 0x1db   : > { %3014 = vrsqrt.f32 %v1624_v52  ;;  %2270 = vst.msk [vmem:[%s4931_s6 + $0x70] sm:$0xff] %vm320_vm0, %v2142_v36  ;;  %v1627_v59 = vadd.f32 1e-05, %v1499_v57  ;;  %1382 = vadd.xlane.f32.xlu1 %v4860_v11  ;;  %1379 = vadd.xlane.f32.xlu0 %v4863_v18  ;;  %v1075_v53 = vmul.f32 %v5050_v48, %v5050_v48  ;;  %v1074_v12 = vmul.f32 %v5057_v25, %v5057_v25  ;;  %v3312_v52 = vld [vmem:[%s3474_s26 + $0x390] sm:$0xff] }
 0x1dc   : > { %v3005_v6 = vpop.eup %3004  ;;  %v2009_v10 = vmul.f32 %v4877_v39, %v1874_v46  ;;  %v5092_v5 = vsub.f32 %v3311_v29, %v821_v38  ;;  %v2145_v50 = vadd.f32 %v4905_v32, %v2010_v60  ;;  %v1626_v11 = vadd.f32 1e-05, %v1498_v23  ;;  %v1173_v31 = vpop.xlane.xlu1 %1172 }
 0x1dd   : > { %v3007_v30 = vpop.eup %3006  ;;  %v1877_v51 = vmul.f32 %v3005_v6, %v6329_v56  ;;  %v1170_v8 = vpop.xlane.xlu0 %1169  ;;  %3016 = vrsqrt.f32 %v1627_v59  ;;  %v1501_v63 = vmul.f32 0.010416667, %v1173_v31  ;;  %v5099_v37 = vsub.f32 %v3312_v52, %v820_v44  ;;  %v6331_v6 = vld [vmem:[#allocation52_spill] sm:$0xff]  ;;  %v6333_v52 = vld [vmem:[#allocation54_spill] sm:$0xff] }
 0x1de   : > { %v2144_v18 = vadd.f32 %v4905_v32, %v2009_v10  ;;  %v1876_v49 = vmul.f32 %v3007_v30, %v6330_v28  ;;  %2273 = vst.msk [vmem:[%s4931_s6 + $0x88] sm:$0xff] %vm320_vm0, %v2145_v50  ;;  %3018 = vrsqrt.f32 %v1626_v11  ;;  %v1500_v17 = vmul.f32 0.010416667, %v1170_v8  ;;  %v3313_v28 = vld [vmem:[%s3474_s26 + $0x3a8] sm:$0xff] }
 0x1df   : > { %v2012_v38 = vmul.f32 %v4877_v39, %v1877_v51  ;;  %v3009_v36 = vpop.eup %3008  ;;  %v1629_v46 = vadd.f32 1e-05, %v1501_v63  ;;  %1388 = vadd.xlane.f32.xlu1 %v4869_v43  ;;  %1385 = vadd.xlane.f32.xlu0 %v4880_v55  ;;  %v5110_v57 = vsel %vm320_vm0, %v1075_v53, 0.0  ;;  %v5113_v3 = vsel %vm320_vm0, %v1074_v12, 0.0  ;;  %v6332_v55 = vld [vmem:[#allocation53_spill] sm:$0xff] }
 0x1e0   : > { %2272 = vst.msk [vmem:[%s4931_s6 + $0x80] sm:$0xff] %vm320_vm0, %v2144_v18  ;;  %v2011_v62 = vmul.f32 %v4877_v39, %v1876_v49  ;;  %v823_v60 = vmul.f32 0.010416667, %v4543_v24  ;;  %v1879_v10 = vmul.f32 %v3009_v36, %v6331_v6  ;;  %v1628_v59 = vadd.f32 1e-05, %v1500_v17  ;;  %v1179_v30 = vpop.xlane.xlu1 %1178 }
 0x1e1   : > { %v3011_v44 = vpop.eup %3010  ;;  %v2147_v23 = vadd.f32 %v4905_v32, %v2012_v38  ;;  %v1176_v43 = vpop.xlane.xlu0 %1175  ;;  %3020 = vrsqrt.f32 %v1629_v46  ;;  %v1503_v53 = vmul.f32 0.010416667, %v1179_v30  ;;  %v822_v12 = vmul.f32 0.010416667, %v4545_v61 }
 0x1e2   : > { %v2146_v29 = vadd.f32 %v4905_v32, %v2011_v62  ;;  %v1878_v50 = vmul.f32 %v3011_v44, %v6332_v55  ;;  %v2014_v24 = vmul.f32 %v4877_v39, %v1879_v10  ;;  %3022 = vrsqrt.f32 %v1628_v59  ;;  %v6334_v62 = vld [vmem:[#allocation55_spill] sm:$0xff] }
 0x1e3   : > { %2275 = vst.msk [vmem:[%s4931_s6 + $0x98] sm:$0xff] %vm320_vm0, %v2147_v23  ;;  %v1502_v56 = vmul.f32 0.010416667, %v1176_v43  ;;  %v1631_v31 = vadd.f32 1e-05, %v1503_v53  ;;  %1394 = vadd.xlane.f32.xlu1 %v4883_v2  ;;  %1391 = vadd.xlane.f32.xlu0 %v4891_v42  ;;  %v1077_v61 = vmul.f32 %v5092_v5, %v5092_v5  ;;  %v1076_v8 = vmul.f32 %v5099_v37, %v5099_v37  ;;  %v3314_v23 = vld [vmem:[%s3474_s26 + $0x3a0] sm:$0xff] }
 0x1e4   : > { %v3013_v51 = vpop.eup %3012  ;;  %2274 = vst.msk [vmem:[%s4931_s6 + $0x90] sm:$0xff] %vm320_vm0, %v2146_v29  ;;  %v2013_v11 = vmul.f32 %v4877_v39, %v1878_v50  ;;  %v5134_v49 = vsub.f32 %v3313_v28, %v823_v60  ;;  %v2149_v63 = vadd.f32 %v4905_v32, %v2014_v24  ;;  %v1185_v17 = vpop.xlane.xlu1 %1184  ;;  %v5141_v6 = vsub.f32 %v3314_v23, %v822_v12  ;;  %v6335_v24 = vld [vmem:[#allocation3_spill] sm:$0xff] }
 0x1e5   : > { %v3015_v18 = vpop.eup %3014  ;;  %v1881_v38 = vmul.f32 %v3013_v51, %v6333_v52  ;;  %v1630_v2 = vadd.f32 1e-05, %v1502_v56  ;;  %v1182_v36 = vpop.xlane.xlu0 %1181  ;;  %3024 = vrsqrt.f32 %v1631_v31  ;;  %v1505_v44 = vmul.f32 0.010416667, %v1185_v17 }
 0x1e6   : > { %v2148_v42 = vadd.f32 %v4905_v32, %v2013_v11  ;;  %v1880_v46 = vmul.f32 %v3015_v18, %v6334_v62  ;;  %2277 = vst.msk [vmem:[%s4931_s6 + $0xa8] sm:$0xff] %vm320_vm0, %v2149_v63  ;;  %v1504_v10 = vmul.f32 0.010416667, %v1182_v36  ;;  %v5152_v29 = vsel %vm320_vm0, %v1077_v61, 0.0  ;;  %v3315_v36 = vld [vmem:[%s3474_s26 + $0x3b8] sm:$0xff] }
 0x1e7   : > { %v2016_v60 = vmul.f32 %v4877_v39, %v1881_v38  ;;  %3026 = vrsqrt.f32 %v1630_v2  ;;  %v3017_v59 = vpop.eup %3016  ;;  %v1633_v43 = vadd.f32 1e-05, %v1505_v44  ;;  %1400 = vadd.xlane.f32.xlu1 %v4898_v45  ;;  %1397 = vadd.xlane.f32.xlu0 %v4923_v40  ;;  %v5155_v55 = vsel %vm320_vm0, %v1076_v8, 0.0  ;;  %v6336_v40 = vld [vmem:[#allocation6_spill] sm:$0xff] }
 0x1e8   : > { %2276 = vst.msk [vmem:[%s4931_s6 + $0xa0] sm:$0xff] %vm320_vm0, %v2148_v42  ;;  %v2015_v30 = vmul.f32 %v4877_v39, %v1880_v46  ;;  %v3019_v50 = vpop.eup %3018  ;;  %v825_v53 = vmul.f32 0.010416667, %v4579_v14  ;;  %v1883_v56 = vmul.f32 %v3017_v59, %v6335_v24  ;;  %v1632_v51 = vadd.f32 1e-05, %v1504_v10  ;;  %v1191_v11 = vpop.xlane.xlu1 %1190  ;;  %v6337_v46 = vld [vmem:[#allocation4_spill] sm:$0xff] }
 0x1e9   : > { %v2151_v12 = vadd.f32 %v4905_v32, %v2016_v60  ;;  %v1188_v45 = vpop.xlane.xlu0 %1187  ;;  %v1882_v18 = vmul.f32 %v3019_v50, %v6336_v40  ;;  %3028 = vrsqrt.f32 %v1633_v43  ;;  %v1507_v61 = vmul.f32 0.010416667, %v1191_v11  ;;  %v6338_v10 = vld [vmem:[#allocation7_spill] sm:$0xff]  ;;  %v3316_v43 = vld [vmem:[%s3474_s26 + $0x3b0] sm:$0xff] }
 0x1ea   : > { %v2150_v31 = vadd.f32 %v4905_v32, %v2015_v30  ;;  %v824_v8 = vmul.f32 0.010416667, %v4581_v41  ;;  %v2018_v14 = vmul.f32 %v4877_v39, %v1883_v56  ;;  %3030 = vrsqrt.f32 %v1632_v51 }
 0x1eb   : > { %2279 = vst.msk [vmem:[%s4931_s6 + $0xb8] sm:$0xff] %vm320_vm0, %v2151_v12  ;;  %v1506_v28 = vmul.f32 0.010416667, %v1188_v45  ;;  %v3021_v63 = vpop.eup %3020  ;;  %v2017_v52 = vmul.f32 %v4877_v39, %v1882_v18  ;;  %v1635_v38 = vadd.f32 1e-05, %v1507_v61  ;;  %1406 = vadd.xlane.f32.xlu1 %v4942_v34  ;;  %1403 = vadd.xlane.f32.xlu0 %v4945_v27  ;;  %v1079_v41 = vmul.f32 %v5134_v49, %v5134_v49  ;;  %v6339_v61 = vld [vmem:[#allocation5_spill] sm:$0xff] }
 0x1ec   : > { %2278 = vst.msk [vmem:[%s4931_s6 + $0xb0] sm:$0xff] %vm320_vm0, %v2150_v31  ;;  %v1078_v2 = vmul.f32 %v5141_v6, %v5141_v6  ;;  %v3023_v17 = vpop.eup %3022  ;;  %v5176_v42 = vsub.f32 %v3315_v36, %v825_v53  ;;  %v2153_v62 = vadd.f32 %v4905_v32, %v2018_v14  ;;  %v1885_v44 = vmul.f32 %v3021_v63, %v6337_v46  ;;  %v1197_v23 = vpop.xlane.xlu1 %1196 }
 0x1ed   : > { %v1634_v34 = vadd.f32 1e-05, %v1506_v28  ;;  %v1194_v60 = vpop.xlane.xlu0 %1193  ;;  %v2152_v27 = vadd.f32 %v4905_v32, %v2017_v52  ;;  %v1884_v59 = vmul.f32 %v3023_v17, %v6338_v10  ;;  %3032 = vrsqrt.f32 %v1635_v38 }
 0x1ee   : > { %v1509_v30 = vmul.f32 0.010416667, %v1197_v23  ;;  %v5183_v50 = vsub.f32 %v3316_v43, %v824_v8  ;;  %2281 = vst.msk [vmem:[%s4931_s6 + $0xc8] sm:$0xff] %vm320_vm0, %v2153_v62  ;;  %v2020_v53 = vmul.f32 %v4877_v39, %v1885_v44  ;;  %v1508_v12 = vmul.f32 0.010416667, %v1194_v60  ;;  %v6342_v43 = vld [vmem:[#allocation10_spill] sm:$0xff] }
 0x1ef   : > { %3034 = vrsqrt.f32 %v1634_v34  ;;  %v3025_v24 = vpop.eup %3024  ;;  %2280 = vst.msk [vmem:[%s4931_s6 + $0xc0] sm:$0xff] %vm320_vm0, %v2152_v27  ;;  %v2019_v56 = vmul.f32 %v4877_v39, %v1884_v59  ;;  %1412 = vadd.xlane.f32.xlu1 %v4984_v22  ;;  %1409 = vadd.xlane.f32.xlu0 %v4987_v15  ;;  %v5194_v11 = vsel %vm320_vm0, %v1079_v41, 0.0  ;;  %v5197_v45 = vsel %vm320_vm0, %v1078_v2, 0.0  ;;  %v6340_v15 = vld [vmem:[#allocation8_spill] sm:$0xff]  ;;  %v6341_v27 = vld [vmem:[#allocation9_spill] sm:$0xff] }
 0x1f0   : > { %v1637_v51 = vadd.f32 1e-05, %v1509_v30  ;;  %v827_v40 = vmul.f32 0.010416667, %v4626_v21  ;;  %v2155_v18 = vadd.f32 %v4905_v32, %v2020_v53  ;;  %v1887_v8 = vmul.f32 %v3025_v24, %v6339_v61  ;;  %v1203_v28 = vpop.xlane.xlu1 %1202  ;;  %v3317_v34 = vld [vmem:[%s3474_s26 + $0x3c8] sm:$0xff]  ;;  %v3318_v24 = vld [vmem:[%s3474_s26 + $0x3c0] sm:$0xff] }
 0x1f1   : > { %v3027_v31 = vpop.eup %3026  ;;  %v1636_v14 = vadd.f32 1e-05, %v1508_v12  ;;  %v1200_v22 = vpop.xlane.xlu0 %1199  ;;  %v2154_v63 = vadd.f32 %v4905_v32, %v2019_v56  ;;  %v1511_v38 = vmul.f32 0.010416667, %v1203_v28  ;;  %v826_v41 = vmul.f32 0.010416667, %v4628_v7 }
 0x1f2   : > { %v1886_v52 = vmul.f32 %v3027_v31, %v6340_v15  ;;  %3036 = vrsqrt.f32 %v1637_v51  ;;  %2283 = vst.msk [vmem:[%s4931_s6 + $0xd8] sm:$0xff] %vm320_vm0, %v2155_v18  ;;  %v2022_v21 = vmul.f32 %v4877_v39, %v1887_v8  ;;  %v1510_v2 = vmul.f32 0.010416667, %v1200_v22  ;;  %v6343_v15 = vld [vmem:[#allocation11_spill] sm:$0xff] }
 0x1f3   : > { %3038 = vrsqrt.f32 %v1636_v14  ;;  %v3029_v17 = vpop.eup %3028  ;;  %2282 = vst.msk [vmem:[%s4931_s6 + $0xd0] sm:$0xff] %vm320_vm0, %v2154_v63  ;;  %v1639_v62 = vadd.f32 1e-05, %v1511_v38  ;;  %1418 = vadd.xlane.f32.xlu1 %v5026_v20  ;;  %1415 = vadd.xlane.f32.xlu0 %v5029_v16  ;;  %v1081_v7 = vmul.f32 %v5176_v42, %v5176_v42  ;;  %v1080_v46 = vmul.f32 %v5183_v50, %v5183_v50 }
 0x1f4   : > { %v2021_v36 = vmul.f32 %v4877_v39, %v1886_v52  ;;  %v3031_v44 = vpop.eup %3030  ;;  %v5218_v23 = vsub.f32 %v3317_v34, %v827_v40  ;;  %v2157_v60 = vadd.f32 %v4905_v32, %v2022_v21  ;;  %v1889_v10 = vmul.f32 %v3029_v17, %v6341_v27  ;;  %v1209_v59 = vpop.xlane.xlu1 %1208  ;;  %v3319_v27 = vld [vmem:[%s3474_s26 + $0x3d8] sm:$0xff] }
 0x1f5   : > { %v1638_v20 = vadd.f32 1e-05, %v1510_v2  ;;  %v1206_v30 = vpop.xlane.xlu0 %1205  ;;  %v1888_v53 = vmul.f32 %v3031_v44, %v6342_v43  ;;  %3040 = vrsqrt.f32 %v1639_v62  ;;  %v1513_v12 = vmul.f32 0.010416667, %v1209_v59  ;;  %v6345_v59 = vld [vmem:[#allocation13_spill] sm:$0xff] }
 0x1f6   : > { %v2156_v16 = vadd.f32 %v4905_v32, %v2021_v36  ;;  %v5225_v56 = vsub.f32 %v3318_v24, %v826_v41  ;;  %2285 = vst.msk [vmem:[%s4931_s6 + $0xe8] sm:$0xff] %vm320_vm0, %v2157_v60  ;;  %v2024_v51 = vmul.f32 %v4877_v39, %v1889_v10  ;;  %v1512_v31 = vmul.f32 0.010416667, %v1206_v30 }
 0x1f7   : > { %3042 = vrsqrt.f32 %v1638_v20  ;;  %v3033_v40 = vpop.eup %3032  ;;  %v2023_v18 = vmul.f32 %v4877_v39, %v1888_v53  ;;  %v1641_v61 = vadd.f32 1e-05, %v1513_v12  ;;  %1424 = vadd.xlane.f32.xlu1 %v5068_v9  ;;  %1421 = vadd.xlane.f32.xlu0 %v5071_v13  ;;  %v5236_v8 = vsel %vm320_vm0, %v1081_v7, 0.0  ;;  %v6344_v13 = vld [vmem:[#allocation12_spill] sm:$0xff]  ;;  %v6346_v53 = vld [vmem:[#allocation14_spill] sm:$0xff] }
 0x1f8   : > { %2284 = vst.msk [vmem:[%s4931_s6 + $0xe0] sm:$0xff] %vm320_vm0, %v2156_v16  ;;  %v5239_v14 = vsel %vm320_vm0, %v1080_v46, 0.0  ;;  %v829_v22 = vmul.f32 0.010416667, %v4654_v19  ;;  %v2159_v63 = vadd.f32 %v4905_v32, %v2024_v51  ;;  %v1891_v52 = vmul.f32 %v3033_v40, %v6343_v15  ;;  %v1215_v41 = vpop.xlane.xlu1 %1214  ;;  %v3320_v51 = vld [vmem:[%s3474_s26 + $0x3d0] sm:$0xff] }
 0x1f9   : > { %v3035_v28 = vpop.eup %3034  ;;  %v1640_v38 = vadd.f32 1e-05, %v1512_v31  ;;  %v1212_v9 = vpop.xlane.xlu0 %1211  ;;  %v2158_v21 = vadd.f32 %v4905_v32, %v2023_v18  ;;  %3044 = vrsqrt.f32 %v1641_v61  ;;  %v1515_v17 = vmul.f32 0.010416667, %v1215_v41 }
 0x1fa   : > { %v1890_v2 = vmul.f32 %v3035_v28, %v6344_v13  ;;  %v828_v36 = vmul.f32 0.010416667, %v4656_v54  ;;  %2287 = vst.msk [vmem:[%s4931_s6 + $0xf8] sm:$0xff] %vm320_vm0, %v2159_v63  ;;  %v2026_v19 = vmul.f32 %v4877_v39, %v1891_v52  ;;  %v1514_v62 = vmul.f32 0.010416667, %v1212_v9  ;;  %v6347_v9 = vld [vmem:[#allocation15_spill] sm:$0xff] }
 0x1fb   : > { %3046 = vrsqrt.f32 %v1640_v38  ;;  %2286 = vst.msk [vmem:[%s4931_s6 + $0xf0] sm:$0xff] %vm320_vm0, %v2158_v21  ;;  %v1643_v44 = vadd.f32 1e-05, %v1515_v17  ;;  %1430 = vadd.xlane.f32.xlu1 %v5110_v57  ;;  %1427 = vadd.xlane.f32.xlu0 %v5113_v3  ;;  %v1083_v54 = vmul.f32 %v5218_v23, %v5218_v23  ;;  %v1082_v34 = vmul.f32 %v5225_v56, %v5225_v56 }
 0x1fc   : > { %v3037_v7 = vpop.eup %3036  ;;  %v2025_v46 = vmul.f32 %v4877_v39, %v1890_v2  ;;  %v5260_v10 = vsub.f32 %v3319_v27, %v829_v22  ;;  %v2161_v20 = vadd.f32 %v4905_v32, %v2026_v19  ;;  %v1642_v57 = vadd.f32 1e-05, %v1514_v62  ;;  %v1221_v16 = vpop.xlane.xlu1 %1220  ;;  %v3321_v27 = vld [vmem:[%s3474_s26 + $0x3e8] sm:$0xff] }
 0x1fd   : > { %v3039_v60 = vpop.eup %3038  ;;  %v1893_v30 = vmul.f32 %v3037_v7, %v6345_v59  ;;  %v1218_v43 = vpop.xlane.xlu0 %1217  ;;  %3048 = vrsqrt.f32 %v1643_v44  ;;  %v1517_v24 = vmul.f32 0.010416667, %v1221_v16  ;;  %v5267_v31 = vsub.f32 %v3320_v51, %v828_v36 }
 0x1fe   : > { %v2160_v3 = vadd.f32 %v4905_v32, %v2025_v46  ;;  %v1892_v12 = vmul.f32 %v3039_v60, %v6346_v53  ;;  %2289 = vst.msk [vmem:[%s4931_s6 + $0x108] sm:$0xff] %vm320_vm0, %v2161_v20  ;;  %3050 = vrsqrt.f32 %v1642_v57  ;;  %v1516_v18 = vmul.f32 0.010416667, %v1218_v43 }
 0x1ff   : > { %v2028_v40 = vmul.f32 %v4877_v39, %v1893_v30  ;;  %v3041_v61 = vpop.eup %3040  ;;  %v1645_v22 = vadd.f32 1e-05, %v1517_v24  ;;  %1436 = vadd.xlane.f32.xlu1 %v5152_v29  ;;  %1433 = vadd.xlane.f32.xlu0 %v5155_v55  ;;  %v5278_v63 = vsel %vm320_vm0, %v1083_v54, 0.0  ;;  %v5281_v15 = vsel %vm320_vm0, %v1082_v34, 0.0  ;;  %v6348_v55 = vld [vmem:[#allocation16_spill] sm:$0xff]  ;;  %v6349_v30 = vld [vmem:[#allocation17_spill] sm:$0xff] }
 0x200   : > { %2288 = vst.msk [vmem:[%s4931_s6 + $0x100] sm:$0xff] %vm320_vm0, %v2160_v3  ;;  %v2027_v28 = vmul.f32 %v4877_v39, %v1892_v12  ;;  %v831_v38 = vmul.f32 0.010416667, %v4701_v33  ;;  %v1895_v21 = vmul.f32 %v3041_v61, %v6347_v9  ;;  %v1644_v13 = vadd.f32 1e-05, %v1516_v18  ;;  %v1227_v2 = vpop.xlane.xlu1 %1226  ;;  %v6350_v3 = vld [vmem:[#allocation18_spill] sm:$0xff] }
 0x201   : > { %v3043_v52 = vpop.eup %3042  ;;  %v2163_v41 = vadd.f32 %v4905_v32, %v2028_v40  ;;  %v1224_v29 = vpop.xlane.xlu0 %1223  ;;  %3052 = vrsqrt.f32 %v1645_v22  ;;  %v1519_v19 = vmul.f32 0.010416667, %v1227_v2  ;;  %v830_v62 = vmul.f32 0.010416667, %v4703_v0  ;;  %v3322_v24 = vld [vmem:[%s3474_s26 + $0x3e0] sm:$0xff]  ;;  %v6351_v9 = vld [vmem:[#allocation105_spill] sm:$0xff] }
 0x202   : > { %v2162_v17 = vadd.f32 %v4905_v32, %v2027_v28  ;;  %v1894_v36 = vmul.f32 %v3043_v52, %v6348_v55  ;;  %v2030_v33 = vmul.f32 %v4877_v39, %v1895_v21  ;;  %3054 = vrsqrt.f32 %v1644_v13  ;;  %v6352_v2 = vld [vmem:[#allocation19_spill] sm:$0xff] }
 0x203   : > { %2291 = vst.msk [vmem:[%s4931_s6 + $0x118] sm:$0xff] %vm320_vm0, %v2163_v41  ;;  %v1518_v7 = vmul.f32 0.010416667, %v1224_v29  ;;  %v3045_v46 = vpop.eup %3044  ;;  %v1647_v54 = vadd.f32 1e-05, %v1519_v19  ;;  %1442 = vadd.xlane.f32.xlu1 %v5194_v11  ;;  %1439 = vadd.xlane.f32.xlu0 %v5197_v45  ;;  %v1085_v0 = vmul.f32 %v5260_v10, %v5260_v10  ;;  %v1084_v34 = vmul.f32 %v5267_v31, %v5267_v31  ;;  %v6353_v19 = vld [vmem:[#allocation20_spill] sm:$0xff] }
 0x204   : > { %2290 = vst.msk [vmem:[%s4931_s6 + $0x110] sm:$0xff] %vm320_vm0, %v2162_v17  ;;  %v2029_v44 = vmul.f32 %v4877_v39, %v1894_v36  ;;  %v5302_v20 = vsub.f32 %v3321_v27, %v831_v38  ;;  %v2165_v59 = vadd.f32 %v4905_v32, %v2030_v33  ;;  %v1897_v57 = vmul.f32 %v3045_v46, %v6349_v30  ;;  %v1233_v16 = vpop.xlane.xlu1 %1232  ;;  %v6354_v33 = vld [vmem:[#allocation106_spill] sm:$0xff] }
 0x205   : > { %v3047_v60 = vpop.eup %3046  ;;  %v1646_v11 = vadd.f32 1e-05, %v1518_v7  ;;  %v1230_v43 = vpop.xlane.xlu0 %1229  ;;  %3056 = vrsqrt.f32 %v1647_v54  ;;  %v1521_v12 = vmul.f32 0.010416667, %v1233_v16  ;;  %v5309_v51 = vsub.f32 %v3322_v24, %v830_v62  ;;  %v3323_v30 = vld [vmem:[%s3474_s26 + $0x3f8] sm:$0xff]  ;;  %v3324_v24 = vld [vmem:[%s3474_s26 + $0x3f0] sm:$0xff] }
 0x206   : > { %v2164_v45 = vadd.f32 %v4905_v32, %v2029_v44  ;;  %v1896_v53 = vmul.f32 %v3047_v60, %v6350_v3  ;;  %2293 = vst.msk [vmem:[%s4931_s6 + $0x128] sm:$0xff] %vm320_vm0, %v2165_v59  ;;  %v2032_v40 = vmul.f32 %v4877_v39, %v1897_v57  ;;  %v1520_v18 = vmul.f32 0.010416667, %v1230_v43  ;;  %v6356_v3 = vld [vmem:[#allocation22_spill] sm:$0xff] }
 0x207   : > { %3058 = vrsqrt.f32 %v1646_v11  ;;  %v3049_v61 = vpop.eup %3048  ;;  %v1649_v22 = vadd.f32 1e-05, %v1521_v12  ;;  %1448 = vadd.xlane.f32.xlu1 %v5236_v8  ;;  %1445 = vadd.xlane.f32.xlu0 %v5239_v14  ;;  %v1459_v52 = vsel %vm320_vm0, %v1085_v0, 0.0  ;;  %v1456_v38 = vsel %vm320_vm0, %v1084_v34, 0.0 }
 0x208   : > { %2292 = vst.msk [vmem:[%s4931_s6 + $0x120] sm:$0xff] %vm320_vm0, %v2164_v45  ;;  %v2031_v28 = vmul.f32 %v4877_v39, %v1896_v53  ;;  %v3051_v41 = vpop.eup %3050  ;;  %v833_v21 = vmul.f32 0.010416667, %v6351_v9  ;;  %v2167_v13 = vadd.f32 %v4905_v32, %v2032_v40  ;;  %v1899_v29 = vmul.f32 %v3049_v61, %v6352_v2  ;;  %v1239_v55 = vpop.xlane.xlu1 %1238  ;;  %v5365_v2 = vld [vmem:[%s6017_s2] ss:$0 sm:$0xff] }
 0x209   : > { %v1648_v17 = vadd.f32 1e-05, %v1520_v18  ;;  %v1236_v36 = vpop.xlane.xlu0 %1235  ;;  %v1898_v62 = vmul.f32 %v3051_v41, %v6353_v19  ;;  %3060 = vrsqrt.f32 %v1649_v22  ;;  %v1523_v14 = vmul.f32 0.010416667, %v1239_v55  ;;  %v5354_v18 = vld [vmem:[%s6016_s1] ss:$0 sm:$0xff] }
 0x20a   : > { %v2166_v8 = vadd.f32 %v4905_v32, %v2031_v28  ;;  %v832_v7 = vmul.f32 0.010416667, %v6354_v33  ;;  %2295 = vst.msk [vmem:[%s4931_s6 + $0x138] sm:$0xff] %vm320_vm0, %v2167_v13  ;;  %v2034_v46 = vmul.f32 %v4877_v39, %v1899_v29  ;;  %v1522_v44 = vmul.f32 0.010416667, %v1236_v36 }
 0x20b   : > { %3062 = vrsqrt.f32 %v1648_v17  ;;  %v3053_v54 = vpop.eup %3052  ;;  %v2033_v0 = vmul.f32 %v4877_v39, %v1898_v62  ;;  %v1651_v34 = vadd.f32 1e-05, %v1523_v14  ;;  %1454 = vadd.xlane.f32.xlu1 %v5278_v63  ;;  %1451 = vadd.xlane.f32.xlu0 %v5281_v15  ;;  %v1087_v60 = vmul.f32 %v5302_v20, %v5302_v20  ;;  %v6355_v39 = vld [vmem:[#allocation21_spill] sm:$0xff]  ;;  %v6358_v62 = vld [vmem:[#allocation56_spill] sm:$0xff] }
 0x20c   : > { %2294 = vst.msk [vmem:[%s4931_s6 + $0x130] sm:$0xff] %vm320_vm0, %v2166_v8  ;;  %v1086_v27 = vmul.f32 %v5309_v51, %v5309_v51  ;;  %v3055_v59 = vpop.eup %3054  ;;  %v5340_v57 = vsub.f32 %v3323_v30, %v833_v21  ;;  %v2169_v11 = vadd.f32 %v4905_v32, %v2034_v46  ;;  %v1901_v16 = vmul.f32 %v3053_v54, %v6355_v39  ;;  %v1245_v43 = vpop.xlane.xlu1 %1244  ;;  %v6357_v17 = vld [vmem:[#allocation25_spill] sm:$0xff] }
 0x20d   : > { %v1650_v63 = vadd.f32 1e-05, %v1522_v44  ;;  %v1242_v45 = vpop.xlane.xlu0 %1241  ;;  %v2168_v15 = vadd.f32 %v4905_v32, %v2033_v0  ;;  %v1900_v53 = vmul.f32 %v3055_v59, %v6356_v3  ;;  %3064 = vrsqrt.f32 %v1651_v34  ;;  %v6359_v59 = vld [vmem:[#allocation28_spill] sm:$0xff] }
 0x20e   : > { %v1525_v12 = vmul.f32 0.010416667, %v1245_v43  ;;  %v5347_v40 = vsub.f32 %v3324_v24, %v832_v7  ;;  %2297 = vst.msk [vmem:[%s4931_s6 + $0x148] sm:$0xff] %vm320_vm0, %v2169_v11  ;;  %v2036_v61 = vmul.f32 %v5354_v18, %v1901_v16  ;;  %v1524_v28 = vmul.f32 0.010416667, %v1242_v45  ;;  %v6360_v45 = vld [vmem:[#allocation57_spill] sm:$0xff] }
 0x20f   : > { %3066 = vrsqrt.f32 %v1650_v63  ;;  %v3057_v22 = vpop.eup %3056  ;;  %2296 = vst.msk [vmem:[%s4931_s6 + $0x140] sm:$0xff] %vm320_vm0, %v2168_v15  ;;  %v2035_v32 = vmul.f32 %v5354_v18, %v1900_v53  ;;  %1460 = vadd.xlane.f32.xlu1 %v1459_v52  ;;  %1457 = vadd.xlane.f32.xlu0 %v1456_v38  ;;  %v1465_v9 = vsel %vm320_vm0, %v1087_v60, 0.0  ;;  %v1462_v21 = vsel %vm320_vm0, %v1086_v27, 0.0 }
 0x210   : > { %v1653_v41 = vadd.f32 1e-05, %v1525_v12  ;;  %v2171_v29 = vadd.f32 %v5365_v2, %v2036_v61  ;;  %v1903_v55 = vmul.f32 %v3057_v22, %v6357_v17  ;;  %v1652_v36 = vadd.f32 1e-05, %v1524_v28  ;;  %v1251_v8 = vpop.xlane.xlu1 %1250 }
 0x211   : > { %v3059_v13 = vpop.eup %3058  ;;  %v1248_v52 = vpop.xlane.xlu0 %1247  ;;  %v1089_v38 = vmul.f32 %v5340_v57, %v5340_v57  ;;  %v2170_v19 = vadd.f32 %v5365_v2, %v2035_v32  ;;  %v1527_v33 = vmul.f32 0.010416667, %v1251_v8  ;;  %v1088_v44 = vmul.f32 %v5347_v40, %v5347_v40 }
 0x212   : > { %v1902_v14 = vmul.f32 %v3059_v13, %v6358_v62  ;;  %3068 = vrsqrt.f32 %v1653_v41  ;;  %2299 = vst.msk [vmem:[%s4931_s6 + $0x158] sm:$0xff] %vm320_vm0, %v2171_v29  ;;  %v2038_v7 = vmul.f32 %v5354_v18, %v1903_v55  ;;  %v1526_v46 = vmul.f32 0.010416667, %v1248_v52 }
 0x213   : > { %3070 = vrsqrt.f32 %v1652_v36  ;;  %v3061_v54 = vpop.eup %3060  ;;  %2298 = vst.msk [vmem:[%s4931_s6 + $0x150] sm:$0xff] %vm320_vm0, %v2170_v19  ;;  %v1655_v34 = vadd.f32 1e-05, %v1527_v33  ;;  %1466 = vadd.xlane.f32.xlu1 %v1465_v9  ;;  %1463 = vadd.xlane.f32.xlu0 %v1462_v21  ;;  %v1471_v63 = vsel %vm320_vm0, %v1089_v38, 0.0  ;;  %v1468_v24 = vsel %vm320_vm0, %v1088_v44, 0.0  ;;  %v6361_v9 = vld [vmem:[#allocation29_spill] sm:$0xff] }
 0x214   : > { %v2037_v0 = vmul.f32 %v5354_v18, %v1902_v14  ;;  %v2173_v27 = vadd.f32 %v5365_v2, %v2038_v7  ;;  %v1905_v30 = vmul.f32 %v3061_v54, %v6359_v59  ;;  %v1654_v11 = vadd.f32 1e-05, %v1526_v46  ;;  %v1257_v39 = vpop.xlane.xlu1 %1256  ;;  %v6362_v36 = vld [vmem:[#allocation30_spill] sm:$0xff]  ;;  %v6363_v44 = vld [vmem:[#allocation31_spill] sm:$0xff] }
 0x215   : > { %v3063_v60 = vpop.eup %3062  ;;  %v1254_v16 = vpop.xlane.xlu0 %1253  ;;  %3072 = vrsqrt.f32 %v1655_v34  ;;  %v1529_v3 = vmul.f32 0.010416667, %v1257_v39  ;;  %v6364_v59 = vld [vmem:[#allocation58_spill] sm:$0xff] }
 0x216   : > { %v2172_v43 = vadd.f32 %v5365_v2, %v2037_v0  ;;  %v1904_v15 = vmul.f32 %v3063_v60, %v6360_v45  ;;  %2301 = vst.msk [vmem:[%s4931_s6 + $0x168] sm:$0xff] %vm320_vm0, %v2173_v27  ;;  %v2040_v53 = vmul.f32 %v5354_v18, %v1905_v30  ;;  %3074 = vrsqrt.f32 %v1654_v11 }
 0x217   : > { %v1528_v12 = vmul.f32 0.010416667, %v1254_v16  ;;  %v3065_v61 = vpop.eup %3064  ;;  %v1657_v22 = vadd.f32 1e-05, %v1529_v3  ;;  %1472 = vadd.xlane.f32.xlu1 %v1471_v63  ;;  %1469 = vadd.xlane.f32.xlu0 %v1468_v24 }
 0x218   : > { %2300 = vst.msk [vmem:[%s4931_s6 + $0x160] sm:$0xff] %vm320_vm0, %v2172_v43  ;;  %v2039_v28 = vmul.f32 %v5354_v18, %v1904_v15  ;;  %v2175_v41 = vadd.f32 %v5365_v2, %v2040_v53  ;;  %v1907_v21 = vmul.f32 %v3065_v61, %v6361_v9  ;;  %v1263_v29 = vpop.xlane.xlu1 %1262  ;;  %v6365_v53 = vld [vmem:[#allocation59_spill] sm:$0xff] }
 0x219   : > { %v3067_v32 = vpop.eup %3066  ;;  %v1656_v13 = vadd.f32 1e-05, %v1528_v12  ;;  %v1260_v17 = vpop.xlane.xlu0 %1259  ;;  %3076 = vrsqrt.f32 %v1657_v22  ;;  %v1531_v52 = vmul.f32 0.010416667, %v1263_v29 }
 0x21a   : > { %v2174_v55 = vadd.f32 %v5365_v2, %v2039_v28  ;;  %v1906_v8 = vmul.f32 %v3067_v32, %v6362_v36  ;;  %2303 = vst.msk [vmem:[%s4931_s6 + $0x178] sm:$0xff] %vm320_vm0, %v2175_v41  ;;  %v2042_v38 = vmul.f32 %v5354_v18, %v1907_v21  ;;  %v1530_v19 = vmul.f32 0.010416667, %v1260_v17  ;;  %v6366_v32 = vld [vmem:[#allocation60_spill] sm:$0xff] }
 0x21b   : > { %3078 = vrsqrt.f32 %v1656_v13  ;;  %v1659_v33 = vadd.f32 1e-05, %v1531_v52  ;;  %v6367_v52 = vld [vmem:[#allocation63_spill] sm:$0xff] }
 0x21c   : > { %v3069_v62 = vpop.eup %3068  ;;  %2302 = vst.msk [vmem:[%s4931_s6 + $0x170] sm:$0xff] %vm320_vm0, %v2174_v55  ;;  %v2041_v14 = vmul.f32 %v5354_v18, %v1906_v8  ;;  %v2177_v46 = vadd.f32 %v5365_v2, %v2042_v38  ;;  %v1658_v0 = vadd.f32 1e-05, %v1530_v19  ;;  %v1269_v34 = vpop.xlane.xlu1 %1268 }
 0x21d   : > { %v3071_v7 = vpop.eup %3070  ;;  %v1909_v54 = vmul.f32 %v3069_v62, %v6363_v44  ;;  %v1266_v60 = vpop.xlane.xlu0 %1265  ;;  %3080 = vrsqrt.f32 %v1659_v33  ;;  %v1533_v11 = vmul.f32 0.010416667, %v1269_v34 }
 0x21e   : > { %v2176_v27 = vadd.f32 %v5365_v2, %v2041_v14  ;;  %v1908_v30 = vmul.f32 %v3071_v7, %v6364_v59  ;;  %2305 = vst.msk [vmem:[%s4931_s6 + $0x188] sm:$0xff] %vm320_vm0, %v2177_v46  ;;  %3082 = vrsqrt.f32 %v1658_v0  ;;  %v1532_v16 = vmul.f32 0.010416667, %v1266_v60  ;;  %v6368_v7 = vld [vmem:[#allocation64_spill] sm:$0xff] }
 0x21f   : > { %v2044_v39 = vmul.f32 %v5354_v18, %v1909_v54  ;;  %v3073_v63 = vpop.eup %3072  ;;  %v1661_v45 = vadd.f32 1e-05, %v1533_v11  ;;  %v6369_v11 = vld [vmem:[#allocation65_spill] sm:$0xff] }
 0x220   : > { %2304 = vst.msk [vmem:[%s4931_s6 + $0x180] sm:$0xff] %vm320_vm0, %v2176_v27  ;;  %v2043_v43 = vmul.f32 %v5354_v18, %v1908_v30  ;;  %v3075_v15 = vpop.eup %3074  ;;  %v1911_v12 = vmul.f32 %v3073_v63, %v6365_v53  ;;  %v1660_v24 = vadd.f32 1e-05, %v1532_v16  ;;  %v1275_v61 = vpop.xlane.xlu1 %1274 }
 0x221   : > { %v2179_v3 = vadd.f32 %v5365_v2, %v2044_v39  ;;  %v1272_v28 = vpop.xlane.xlu0 %1271  ;;  %v1910_v41 = vmul.f32 %v3075_v15, %v6366_v32  ;;  %3084 = vrsqrt.f32 %v1661_v45  ;;  %v1535_v9 = vmul.f32 0.010416667, %v1275_v61  ;;  %v6370_v15 = vld [vmem:[#allocation66_spill] sm:$0xff] }
 0x222   : > { %v2178_v22 = vadd.f32 %v5365_v2, %v2043_v43  ;;  %v2046_v21 = vmul.f32 %v5354_v18, %v1911_v12  ;;  %3086 = vrsqrt.f32 %v1660_v24  ;;  %v1534_v13 = vmul.f32 0.010416667, %v1272_v28 }
 0x223   : > { %2307 = vst.msk [vmem:[%s4931_s6 + $0x198] sm:$0xff] %vm320_vm0, %v2179_v3  ;;  %v3077_v29 = vpop.eup %3076  ;;  %v2045_v17 = vmul.f32 %v5354_v18, %v1910_v41  ;;  %v1663_v55 = vadd.f32 1e-05, %v1535_v9  ;;  %v6371_v9 = vld [vmem:[#allocation67_spill] sm:$0xff] }
 0x224   : > { %2306 = vst.msk [vmem:[%s4931_s6 + $0x190] sm:$0xff] %vm320_vm0, %v2178_v22  ;;  %v2181_v8 = vadd.f32 %v5365_v2, %v2046_v21  ;;  %v1913_v38 = vmul.f32 %v3077_v29, %v6367_v52  ;;  %v1662_v19 = vadd.f32 1e-05, %v1534_v13  ;;  %v1281_v62 = vpop.xlane.xlu1 %1280 }
 0x225   : > { %v3079_v36 = vpop.eup %3078  ;;  %v1278_v14 = vpop.xlane.xlu0 %1277  ;;  %v2180_v33 = vadd.f32 %v5365_v2, %v2045_v17  ;;  %3088 = vrsqrt.f32 %v1663_v55  ;;  %v1537_v44 = vmul.f32 0.010416667, %v1281_v62 }
 0x226   : > { %v1912_v46 = vmul.f32 %v3079_v36, %v6368_v7  ;;  %2309 = vst.msk [vmem:[%s4931_s6 + $0x1a8] sm:$0xff] %vm320_vm0, %v2181_v8  ;;  %v2048_v54 = vmul.f32 %v5354_v18, %v1913_v38  ;;  %3090 = vrsqrt.f32 %v1662_v19  ;;  %v1536_v0 = vmul.f32 0.010416667, %v1278_v14  ;;  %v6372_v36 = vld [vmem:[#allocation68_spill] sm:$0xff] }
 0x227   : > { %v3081_v34 = vpop.eup %3080  ;;  %2308 = vst.msk [vmem:[%s4931_s6 + $0x1a0] sm:$0xff] %vm320_vm0, %v2180_v33  ;;  %v1665_v27 = vadd.f32 1e-05, %v1537_v44  ;;  %v6373_v44 = vld [vmem:[#allocation69_spill] sm:$0xff] }
 0x228   : > { %v2047_v60 = vmul.f32 %v5354_v18, %v1912_v46  ;;  %v3083_v59 = vpop.eup %3082  ;;  %v2183_v30 = vadd.f32 %v5365_v2, %v2048_v54  ;;  %v1915_v39 = vmul.f32 %v3081_v34, %v6369_v11  ;;  %v1664_v16 = vadd.f32 1e-05, %v1536_v0  ;;  %v1287_v63 = vpop.xlane.xlu1 %1286 }
 0x229   : > { %v1284_v43 = vpop.xlane.xlu0 %1283  ;;  %v1914_v3 = vmul.f32 %v3083_v59, %v6370_v15  ;;  %3092 = vrsqrt.f32 %v1665_v27  ;;  %v1539_v53 = vmul.f32 0.010416667, %v1287_v63  ;;  %v6374_v59 = vld [vmem:[#allocation70_spill] sm:$0xff] }
 0x22a   : > { %v2182_v45 = vadd.f32 %v5365_v2, %v2047_v60  ;;  %2311 = vst.msk [vmem:[%s4931_s6 + $0x1b8] sm:$0xff] %vm320_vm0, %v2183_v30  ;;  %v2050_v12 = vmul.f32 %v5354_v18, %v1915_v39  ;;  %3094 = vrsqrt.f32 %v1664_v16  ;;  %v1538_v24 = vmul.f32 0.010416667, %v1284_v43 }
 0x22b   : > { %v3085_v61 = vpop.eup %3084  ;;  %v2049_v28 = vmul.f32 %v5354_v18, %v1914_v3  ;;  %v1667_v22 = vadd.f32 1e-05, %v1539_v53  ;;  %v6375_v53 = vld [vmem:[#allocation71_spill] sm:$0xff] }
 0x22c   : > { %2310 = vst.msk [vmem:[%s4931_s6 + $0x1b0] sm:$0xff] %vm320_vm0, %v2182_v45  ;;  %v3087_v32 = vpop.eup %3086  ;;  %v2185_v41 = vadd.f32 %v5365_v2, %v2050_v12  ;;  %v1917_v21 = vmul.f32 %v3085_v61, %v6371_v9  ;;  %v1666_v13 = vadd.f32 1e-05, %v1538_v24  ;;  %v1293_v29 = vpop.xlane.xlu1 %1292 }
 0x22d   : > { %v1290_v17 = vpop.xlane.xlu0 %1289  ;;  %v2184_v55 = vadd.f32 %v5365_v2, %v2049_v28  ;;  %v1916_v8 = vmul.f32 %v3087_v32, %v6372_v36  ;;  %3096 = vrsqrt.f32 %v1667_v22  ;;  %v1541_v52 = vmul.f32 0.010416667, %v1293_v29  ;;  %v6376_v32 = vld [vmem:[#allocation72_spill] sm:$0xff] }
 0x22e   : > { %2313 = vst.msk [vmem:[%s4931_s6 + $0x1c8] sm:$0xff] %vm320_vm0, %v2185_v41  ;;  %v2052_v38 = vmul.f32 %v5354_v18, %v1917_v21  ;;  %3098 = vrsqrt.f32 %v1666_v13  ;;  %v1540_v19 = vmul.f32 0.010416667, %v1290_v17 }
 0x22f   : > { %v3089_v62 = vpop.eup %3088  ;;  %2312 = vst.msk [vmem:[%s4931_s6 + $0x1c0] sm:$0xff] %vm320_vm0, %v2184_v55  ;;  %v2051_v14 = vmul.f32 %v5354_v18, %v1916_v8  ;;  %v1669_v33 = vadd.f32 1e-05, %v1541_v52  ;;  %v6377_v52 = vld [vmem:[#allocation73_spill] sm:$0xff] }
 0x230   : > { %v3091_v7 = vpop.eup %3090  ;;  %v2187_v46 = vadd.f32 %v5365_v2, %v2052_v38  ;;  %v1919_v54 = vmul.f32 %v3089_v62, %v6373_v44  ;;  %v1668_v0 = vadd.f32 1e-05, %v1540_v19  ;;  %v1299_v34 = vpop.xlane.xlu1 %1298 }
 0x231   : > { %v1296_v60 = vpop.xlane.xlu0 %1295  ;;  %v2186_v27 = vadd.f32 %v5365_v2, %v2051_v14  ;;  %v1918_v30 = vmul.f32 %v3091_v7, %v6374_v59  ;;  %3100 = vrsqrt.f32 %v1669_v33  ;;  %v1543_v11 = vmul.f32 0.010416667, %v1299_v34  ;;  %v6378_v7 = vld [vmem:[#allocation74_spill] sm:$0xff] }
 0x232   : > { %2315 = vst.msk [vmem:[%s4931_s6 + $0x1d8] sm:$0xff] %vm320_vm0, %v2187_v46  ;;  %v2054_v39 = vmul.f32 %v5354_v18, %v1919_v54  ;;  %3102 = vrsqrt.f32 %v1668_v0  ;;  %v1542_v16 = vmul.f32 0.010416667, %v1296_v60 }
 0x233   : > { %v3093_v63 = vpop.eup %3092  ;;  %2314 = vst.msk [vmem:[%s4931_s6 + $0x1d0] sm:$0xff] %vm320_vm0, %v2186_v27  ;;  %v2053_v43 = vmul.f32 %v5354_v18, %v1918_v30  ;;  %v1671_v45 = vadd.f32 1e-05, %v1543_v11  ;;  %v6379_v11 = vld [vmem:[#allocation75_spill] sm:$0xff] }
 0x234   : > { %v3095_v15 = vpop.eup %3094  ;;  %v2189_v3 = vadd.f32 %v5365_v2, %v2054_v39  ;;  %v1921_v12 = vmul.f32 %v3093_v63, %v6375_v53  ;;  %v1670_v24 = vadd.f32 1e-05, %v1542_v16  ;;  %v1305_v61 = vpop.xlane.xlu1 %1304 }
 0x235   : > { %v1302_v28 = vpop.xlane.xlu0 %1301  ;;  %v2188_v22 = vadd.f32 %v5365_v2, %v2053_v43  ;;  %v1920_v41 = vmul.f32 %v3095_v15, %v6376_v32  ;;  %3104 = vrsqrt.f32 %v1671_v45  ;;  %v1545_v9 = vmul.f32 0.010416667, %v1305_v61  ;;  %v6380_v15 = vld [vmem:[#allocation78_spill] sm:$0xff] }
 0x236   : > { %2317 = vst.msk [vmem:[%s4931_s6 + $0x1e8] sm:$0xff] %vm320_vm0, %v2189_v3  ;;  %v2056_v21 = vmul.f32 %v5354_v18, %v1921_v12  ;;  %3106 = vrsqrt.f32 %v1670_v24  ;;  %v1544_v13 = vmul.f32 0.010416667, %v1302_v28 }
 0x237   : > { %v3097_v29 = vpop.eup %3096  ;;  %2316 = vst.msk [vmem:[%s4931_s6 + $0x1e0] sm:$0xff] %vm320_vm0, %v2188_v22  ;;  %v2055_v17 = vmul.f32 %v5354_v18, %v1920_v41  ;;  %v1673_v55 = vadd.f32 1e-05, %v1545_v9  ;;  %v6381_v9 = vld [vmem:[#allocation79_spill] sm:$0xff] }
 0x238   : > { %v3099_v36 = vpop.eup %3098  ;;  %v2191_v8 = vadd.f32 %v5365_v2, %v2056_v21  ;;  %v1923_v38 = vmul.f32 %v3097_v29, %v6377_v52  ;;  %v1672_v19 = vadd.f32 1e-05, %v1544_v13  ;;  %v1311_v62 = vpop.xlane.xlu1 %1310 }
 0x239   : > { %v1308_v14 = vpop.xlane.xlu0 %1307  ;;  %v2190_v33 = vadd.f32 %v5365_v2, %v2055_v17  ;;  %v1922_v46 = vmul.f32 %v3099_v36, %v6378_v7  ;;  %3108 = vrsqrt.f32 %v1673_v55  ;;  %v1547_v44 = vmul.f32 0.010416667, %v1311_v62  ;;  %v6382_v36 = vld [vmem:[#allocation80_spill] sm:$0xff] }
 0x23a   : > { %2319 = vst.msk [vmem:[%s4931_s6 + $0x1f8] sm:$0xff] %vm320_vm0, %v2191_v8  ;;  %v2058_v54 = vmul.f32 %v5354_v18, %v1923_v38  ;;  %3110 = vrsqrt.f32 %v1672_v19  ;;  %v1546_v0 = vmul.f32 0.010416667, %v1308_v14 }
 0x23b   : > { %v3101_v34 = vpop.eup %3100  ;;  %2318 = vst.msk [vmem:[%s4931_s6 + $0x1f0] sm:$0xff] %vm320_vm0, %v2190_v33  ;;  %v2057_v60 = vmul.f32 %v5354_v18, %v1922_v46  ;;  %v1675_v27 = vadd.f32 1e-05, %v1547_v44  ;;  %v6383_v44 = vld [vmem:[#allocation81_spill] sm:$0xff] }
 0x23c   : > { %v3103_v59 = vpop.eup %3102  ;;  %v2193_v30 = vadd.f32 %v5365_v2, %v2058_v54  ;;  %v1925_v39 = vmul.f32 %v3101_v34, %v6379_v11  ;;  %v1674_v16 = vadd.f32 1e-05, %v1546_v0  ;;  %v1317_v63 = vpop.xlane.xlu1 %1316 }
 0x23d   : > { %v1314_v43 = vpop.xlane.xlu0 %1313  ;;  %v2192_v45 = vadd.f32 %v5365_v2, %v2057_v60  ;;  %v1924_v3 = vmul.f32 %v3103_v59, %v6380_v15  ;;  %3112 = vrsqrt.f32 %v1675_v27  ;;  %v1549_v53 = vmul.f32 0.010416667, %v1317_v63  ;;  %v6384_v59 = vld [vmem:[#allocation82_spill] sm:$0xff] }
 0x23e   : > { %2321 = vst.msk [vmem:[%s4931_s6 + $0x208] sm:$0xff] %vm320_vm0, %v2193_v30  ;;  %v2060_v12 = vmul.f32 %v5354_v18, %v1925_v39  ;;  %3114 = vrsqrt.f32 %v1674_v16  ;;  %v1548_v24 = vmul.f32 0.010416667, %v1314_v43 }
 0x23f   : > { %v3105_v61 = vpop.eup %3104  ;;  %2320 = vst.msk [vmem:[%s4931_s6 + $0x200] sm:$0xff] %vm320_vm0, %v2192_v45  ;;  %v2059_v28 = vmul.f32 %v5354_v18, %v1924_v3  ;;  %v1677_v22 = vadd.f32 1e-05, %v1549_v53  ;;  %v6385_v53 = vld [vmem:[#allocation83_spill] sm:$0xff] }
 0x240   : > { %v3107_v32 = vpop.eup %3106  ;;  %v2195_v41 = vadd.f32 %v5365_v2, %v2060_v12  ;;  %v1927_v21 = vmul.f32 %v3105_v61, %v6381_v9  ;;  %v1676_v13 = vadd.f32 1e-05, %v1548_v24  ;;  %v1323_v29 = vpop.xlane.xlu1 %1322 }
 0x241   : > { %v1320_v17 = vpop.xlane.xlu0 %1319  ;;  %v2194_v55 = vadd.f32 %v5365_v2, %v2059_v28  ;;  %v1926_v8 = vmul.f32 %v3107_v32, %v6382_v36  ;;  %3116 = vrsqrt.f32 %v1677_v22  ;;  %v1551_v52 = vmul.f32 0.010416667, %v1323_v29  ;;  %v6386_v32 = vld [vmem:[#allocation84_spill] sm:$0xff] }
 0x242   : > { %2323 = vst.msk [vmem:[%s4931_s6 + $0x218] sm:$0xff] %vm320_vm0, %v2195_v41  ;;  %v2062_v38 = vmul.f32 %v5354_v18, %v1927_v21  ;;  %3118 = vrsqrt.f32 %v1676_v13  ;;  %v1550_v19 = vmul.f32 0.010416667, %v1320_v17 }
 0x243   : > { %v3109_v62 = vpop.eup %3108  ;;  %2322 = vst.msk [vmem:[%s4931_s6 + $0x210] sm:$0xff] %vm320_vm0, %v2194_v55  ;;  %v2061_v14 = vmul.f32 %v5354_v18, %v1926_v8  ;;  %v1679_v33 = vadd.f32 1e-05, %v1551_v52  ;;  %v6387_v52 = vld [vmem:[#allocation85_spill] sm:$0xff] }
 0x244   : > { %v3111_v7 = vpop.eup %3110  ;;  %v2197_v46 = vadd.f32 %v5365_v2, %v2062_v38  ;;  %v1929_v54 = vmul.f32 %v3109_v62, %v6383_v44  ;;  %v1678_v0 = vadd.f32 1e-05, %v1550_v19  ;;  %v1329_v34 = vpop.xlane.xlu1 %1328 }
 0x245   : > { %v1326_v60 = vpop.xlane.xlu0 %1325  ;;  %v2196_v27 = vadd.f32 %v5365_v2, %v2061_v14  ;;  %v1928_v30 = vmul.f32 %v3111_v7, %v6384_v59  ;;  %3120 = vrsqrt.f32 %v1679_v33  ;;  %v1553_v11 = vmul.f32 0.010416667, %v1329_v34  ;;  %v6388_v7 = vld [vmem:[#allocation86_spill] sm:$0xff] }
 0x246   : > { %2325 = vst.msk [vmem:[%s4931_s6 + $0x228] sm:$0xff] %vm320_vm0, %v2197_v46  ;;  %v2064_v39 = vmul.f32 %v5354_v18, %v1929_v54  ;;  %3122 = vrsqrt.f32 %v1678_v0  ;;  %v1552_v16 = vmul.f32 0.010416667, %v1326_v60 }
 0x247   : > { %v3113_v63 = vpop.eup %3112  ;;  %2324 = vst.msk [vmem:[%s4931_s6 + $0x220] sm:$0xff] %vm320_vm0, %v2196_v27  ;;  %v2063_v43 = vmul.f32 %v5354_v18, %v1928_v30  ;;  %v1681_v45 = vadd.f32 1e-05, %v1553_v11  ;;  %v6389_v11 = vld [vmem:[#allocation87_spill] sm:$0xff] }
 0x248   : > { %v3115_v15 = vpop.eup %3114  ;;  %v2199_v3 = vadd.f32 %v5365_v2, %v2064_v39  ;;  %v1931_v12 = vmul.f32 %v3113_v63, %v6385_v53  ;;  %v1680_v24 = vadd.f32 1e-05, %v1552_v16  ;;  %v1335_v61 = vpop.xlane.xlu1 %1334 }
 0x249   : > { %v1332_v28 = vpop.xlane.xlu0 %1331  ;;  %v2198_v22 = vadd.f32 %v5365_v2, %v2063_v43  ;;  %v1930_v41 = vmul.f32 %v3115_v15, %v6386_v32  ;;  %3124 = vrsqrt.f32 %v1681_v45  ;;  %v1555_v9 = vmul.f32 0.010416667, %v1335_v61  ;;  %v6390_v15 = vld [vmem:[#allocation88_spill] sm:$0xff] }
 0x24a   : > { %2327 = vst.msk [vmem:[%s4931_s6 + $0x238] sm:$0xff] %vm320_vm0, %v2199_v3  ;;  %v2066_v21 = vmul.f32 %v5354_v18, %v1931_v12  ;;  %3126 = vrsqrt.f32 %v1680_v24  ;;  %v1554_v13 = vmul.f32 0.010416667, %v1332_v28 }
 0x24b   : > { %v3117_v29 = vpop.eup %3116  ;;  %2326 = vst.msk [vmem:[%s4931_s6 + $0x230] sm:$0xff] %vm320_vm0, %v2198_v22  ;;  %v2065_v17 = vmul.f32 %v5354_v18, %v1930_v41  ;;  %v1683_v55 = vadd.f32 1e-05, %v1555_v9  ;;  %v6391_v9 = vld [vmem:[#allocation89_spill] sm:$0xff] }
 0x24c   : > { %v3119_v36 = vpop.eup %3118  ;;  %v2201_v8 = vadd.f32 %v5365_v2, %v2066_v21  ;;  %v1933_v38 = vmul.f32 %v3117_v29, %v6387_v52  ;;  %v1682_v19 = vadd.f32 1e-05, %v1554_v13  ;;  %v1341_v62 = vpop.xlane.xlu1 %1340 }
 0x24d   : > { %v1338_v14 = vpop.xlane.xlu0 %1337  ;;  %v2200_v33 = vadd.f32 %v5365_v2, %v2065_v17  ;;  %v1932_v46 = vmul.f32 %v3119_v36, %v6388_v7  ;;  %3128 = vrsqrt.f32 %v1683_v55  ;;  %v1557_v44 = vmul.f32 0.010416667, %v1341_v62  ;;  %v6392_v36 = vld [vmem:[#allocation90_spill] sm:$0xff] }
 0x24e   : > { %2329 = vst.msk [vmem:[%s4931_s6 + $0x248] sm:$0xff] %vm320_vm0, %v2201_v8  ;;  %v2068_v54 = vmul.f32 %v5354_v18, %v1933_v38  ;;  %3130 = vrsqrt.f32 %v1682_v19  ;;  %v1556_v0 = vmul.f32 0.010416667, %v1338_v14 }
 0x24f   : > { %v3121_v34 = vpop.eup %3120  ;;  %2328 = vst.msk [vmem:[%s4931_s6 + $0x240] sm:$0xff] %vm320_vm0, %v2200_v33  ;;  %v2067_v60 = vmul.f32 %v5354_v18, %v1932_v46  ;;  %v1685_v27 = vadd.f32 1e-05, %v1557_v44  ;;  %v6393_v44 = vld [vmem:[#allocation91_spill] sm:$0xff] }
 0x250   : > { %v3123_v59 = vpop.eup %3122  ;;  %v2203_v30 = vadd.f32 %v5365_v2, %v2068_v54  ;;  %v1935_v39 = vmul.f32 %v3121_v34, %v6389_v11  ;;  %v1684_v16 = vadd.f32 1e-05, %v1556_v0  ;;  %v1347_v63 = vpop.xlane.xlu1 %1346 }
 0x251   : > { %v1344_v43 = vpop.xlane.xlu0 %1343  ;;  %v2202_v45 = vadd.f32 %v5365_v2, %v2067_v60  ;;  %v1934_v3 = vmul.f32 %v3123_v59, %v6390_v15  ;;  %3132 = vrsqrt.f32 %v1685_v27  ;;  %v1559_v53 = vmul.f32 0.010416667, %v1347_v63  ;;  %v6394_v59 = vld [vmem:[#allocation92_spill] sm:$0xff] }
 0x252   : > { %2331 = vst.msk [vmem:[%s4931_s6 + $0x258] sm:$0xff] %vm320_vm0, %v2203_v30  ;;  %v2070_v12 = vmul.f32 %v5354_v18, %v1935_v39  ;;  %3134 = vrsqrt.f32 %v1684_v16  ;;  %v1558_v24 = vmul.f32 0.010416667, %v1344_v43 }
 0x253   : > { %v3125_v61 = vpop.eup %3124  ;;  %2330 = vst.msk [vmem:[%s4931_s6 + $0x250] sm:$0xff] %vm320_vm0, %v2202_v45  ;;  %v2069_v28 = vmul.f32 %v5354_v18, %v1934_v3  ;;  %v1687_v22 = vadd.f32 1e-05, %v1559_v53  ;;  %v6395_v53 = vld [vmem:[#allocation93_spill] sm:$0xff] }
 0x254   : > { %v3127_v32 = vpop.eup %3126  ;;  %v2205_v41 = vadd.f32 %v5365_v2, %v2070_v12  ;;  %v1937_v21 = vmul.f32 %v3125_v61, %v6391_v9  ;;  %v1686_v13 = vadd.f32 1e-05, %v1558_v24  ;;  %v1353_v29 = vpop.xlane.xlu1 %1352 }
 0x255   : > { %v1350_v17 = vpop.xlane.xlu0 %1349  ;;  %v2204_v55 = vadd.f32 %v5365_v2, %v2069_v28  ;;  %v1936_v8 = vmul.f32 %v3127_v32, %v6392_v36  ;;  %3136 = vrsqrt.f32 %v1687_v22  ;;  %v1561_v52 = vmul.f32 0.010416667, %v1353_v29  ;;  %v6396_v32 = vld [vmem:[#allocation94_spill] sm:$0xff] }
 0x256   : > { %2333 = vst.msk [vmem:[%s4931_s6 + $0x268] sm:$0xff] %vm320_vm0, %v2205_v41  ;;  %v2072_v38 = vmul.f32 %v5354_v18, %v1937_v21  ;;  %3138 = vrsqrt.f32 %v1686_v13  ;;  %v1560_v19 = vmul.f32 0.010416667, %v1350_v17 }
 0x257   : > { %v3129_v62 = vpop.eup %3128  ;;  %2332 = vst.msk [vmem:[%s4931_s6 + $0x260] sm:$0xff] %vm320_vm0, %v2204_v55  ;;  %v2071_v14 = vmul.f32 %v5354_v18, %v1936_v8  ;;  %v1689_v33 = vadd.f32 1e-05, %v1561_v52  ;;  %v6397_v52 = vld [vmem:[#allocation95_spill] sm:$0xff] }
 0x258   : > { %v3131_v7 = vpop.eup %3130  ;;  %v2207_v46 = vadd.f32 %v5365_v2, %v2072_v38  ;;  %v1939_v54 = vmul.f32 %v3129_v62, %v6393_v44  ;;  %v1688_v0 = vadd.f32 1e-05, %v1560_v19  ;;  %v1359_v34 = vpop.xlane.xlu1 %1358 }
 0x259   : > { %v1356_v60 = vpop.xlane.xlu0 %1355  ;;  %v2206_v27 = vadd.f32 %v5365_v2, %v2071_v14  ;;  %v1938_v30 = vmul.f32 %v3131_v7, %v6394_v59  ;;  %3140 = vrsqrt.f32 %v1689_v33  ;;  %v1563_v11 = vmul.f32 0.010416667, %v1359_v34  ;;  %v6398_v7 = vld [vmem:[#allocation96_spill] sm:$0xff] }
 0x25a   : > { %2335 = vst.msk [vmem:[%s4931_s6 + $0x278] sm:$0xff] %vm320_vm0, %v2207_v46  ;;  %v2074_v39 = vmul.f32 %v5354_v18, %v1939_v54  ;;  %3142 = vrsqrt.f32 %v1688_v0  ;;  %v1562_v16 = vmul.f32 0.010416667, %v1356_v60 }
 0x25b   : > { %v3133_v63 = vpop.eup %3132  ;;  %2334 = vst.msk [vmem:[%s4931_s6 + $0x270] sm:$0xff] %vm320_vm0, %v2206_v27  ;;  %v2073_v43 = vmul.f32 %v5354_v18, %v1938_v30  ;;  %v1691_v45 = vadd.f32 1e-05, %v1563_v11  ;;  %v6399_v11 = vld [vmem:[#allocation97_spill] sm:$0xff] }
 0x25c   : > { %v3135_v15 = vpop.eup %3134  ;;  %v2209_v3 = vadd.f32 %v5365_v2, %v2074_v39  ;;  %v1941_v12 = vmul.f32 %v3133_v63, %v6395_v53  ;;  %v1690_v24 = vadd.f32 1e-05, %v1562_v16  ;;  %v1365_v61 = vpop.xlane.xlu1 %1364 }
 0x25d   : > { %v1362_v28 = vpop.xlane.xlu0 %1361  ;;  %v2208_v22 = vadd.f32 %v5365_v2, %v2073_v43  ;;  %v1940_v41 = vmul.f32 %v3135_v15, %v6396_v32  ;;  %3144 = vrsqrt.f32 %v1691_v45  ;;  %v1565_v9 = vmul.f32 0.010416667, %v1365_v61  ;;  %v6400_v15 = vld [vmem:[#allocation98_spill] sm:$0xff] }
 0x25e   : > { %2337 = vst.msk [vmem:[%s4931_s6 + $0x288] sm:$0xff] %vm320_vm0, %v2209_v3  ;;  %v2076_v21 = vmul.f32 %v5354_v18, %v1941_v12  ;;  %3146 = vrsqrt.f32 %v1690_v24  ;;  %v1564_v13 = vmul.f32 0.010416667, %v1362_v28 }
 0x25f   : > { %v3137_v29 = vpop.eup %3136  ;;  %2336 = vst.msk [vmem:[%s4931_s6 + $0x280] sm:$0xff] %vm320_vm0, %v2208_v22  ;;  %v2075_v17 = vmul.f32 %v5354_v18, %v1940_v41  ;;  %v1693_v55 = vadd.f32 1e-05, %v1565_v9  ;;  %v6401_v9 = vld [vmem:[#allocation99_spill] sm:$0xff] }
 0x260   : > { %v3139_v36 = vpop.eup %3138  ;;  %v2211_v8 = vadd.f32 %v5365_v2, %v2076_v21  ;;  %v1943_v38 = vmul.f32 %v3137_v29, %v6397_v52  ;;  %v1692_v19 = vadd.f32 1e-05, %v1564_v13  ;;  %v1371_v62 = vpop.xlane.xlu1 %1370 }
 0x261   : > { %v1368_v14 = vpop.xlane.xlu0 %1367  ;;  %v2210_v33 = vadd.f32 %v5365_v2, %v2075_v17  ;;  %v1942_v46 = vmul.f32 %v3139_v36, %v6398_v7  ;;  %3148 = vrsqrt.f32 %v1693_v55  ;;  %v1567_v44 = vmul.f32 0.010416667, %v1371_v62  ;;  %v6402_v36 = vld [vmem:[#allocation100_spill] sm:$0xff] }
 0x262   : > { %2339 = vst.msk [vmem:[%s4931_s6 + $0x298] sm:$0xff] %vm320_vm0, %v2211_v8  ;;  %v2078_v54 = vmul.f32 %v5354_v18, %v1943_v38  ;;  %3150 = vrsqrt.f32 %v1692_v19  ;;  %v1566_v0 = vmul.f32 0.010416667, %v1368_v14 }
 0x263   : > { %v3141_v34 = vpop.eup %3140  ;;  %2338 = vst.msk [vmem:[%s4931_s6 + $0x290] sm:$0xff] %vm320_vm0, %v2210_v33  ;;  %v2077_v60 = vmul.f32 %v5354_v18, %v1942_v46  ;;  %v1695_v27 = vadd.f32 1e-05, %v1567_v44  ;;  %v6403_v44 = vld [vmem:[#allocation101_spill] sm:$0xff] }
 0x264   : > { %v3143_v59 = vpop.eup %3142  ;;  %v2213_v30 = vadd.f32 %v5365_v2, %v2078_v54  ;;  %v1945_v39 = vmul.f32 %v3141_v34, %v6399_v11  ;;  %v1694_v16 = vadd.f32 1e-05, %v1566_v0  ;;  %v1377_v63 = vpop.xlane.xlu1 %1376 }
 0x265   : > { %v1374_v43 = vpop.xlane.xlu0 %1373  ;;  %v2212_v45 = vadd.f32 %v5365_v2, %v2077_v60  ;;  %v1944_v3 = vmul.f32 %v3143_v59, %v6400_v15  ;;  %3152 = vrsqrt.f32 %v1695_v27  ;;  %v1569_v53 = vmul.f32 0.010416667, %v1377_v63  ;;  %v6404_v59 = vld [vmem:[#allocation102_spill] sm:$0xff] }
 0x266   : > { %2341 = vst.msk [vmem:[%s4931_s6 + $0x2a8] sm:$0xff] %vm320_vm0, %v2213_v30  ;;  %v2080_v12 = vmul.f32 %v5354_v18, %v1945_v39  ;;  %3154 = vrsqrt.f32 %v1694_v16  ;;  %v1568_v24 = vmul.f32 0.010416667, %v1374_v43 }
 0x267   : > { %v3145_v61 = vpop.eup %3144  ;;  %2340 = vst.msk [vmem:[%s4931_s6 + $0x2a0] sm:$0xff] %vm320_vm0, %v2212_v45  ;;  %v2079_v28 = vmul.f32 %v5354_v18, %v1944_v3  ;;  %v1697_v22 = vadd.f32 1e-05, %v1569_v53  ;;  %v6405_v53 = vld [vmem:[#allocation103_spill] sm:$0xff] }
 0x268   : > { %v3147_v32 = vpop.eup %3146  ;;  %v2215_v41 = vadd.f32 %v5365_v2, %v2080_v12  ;;  %v1947_v21 = vmul.f32 %v3145_v61, %v6401_v9  ;;  %v1696_v13 = vadd.f32 1e-05, %v1568_v24  ;;  %v1383_v29 = vpop.xlane.xlu1 %1382 }
 0x269   : > { %v1380_v17 = vpop.xlane.xlu0 %1379  ;;  %v2214_v55 = vadd.f32 %v5365_v2, %v2079_v28  ;;  %v1946_v8 = vmul.f32 %v3147_v32, %v6402_v36  ;;  %3156 = vrsqrt.f32 %v1697_v22  ;;  %v1571_v52 = vmul.f32 0.010416667, %v1383_v29  ;;  %v6406_v32 = vld [vmem:[#allocation104_spill] sm:$0xff] }
 0x26a   : > { %2343 = vst.msk [vmem:[%s4931_s6 + $0x2b8] sm:$0xff] %vm320_vm0, %v2215_v41  ;;  %v2082_v38 = vmul.f32 %v5354_v18, %v1947_v21  ;;  %3158 = vrsqrt.f32 %v1696_v13  ;;  %v1570_v19 = vmul.f32 0.010416667, %v1380_v17 }
 0x26b   : > { %v3149_v62 = vpop.eup %3148  ;;  %2342 = vst.msk [vmem:[%s4931_s6 + $0x2b0] sm:$0xff] %vm320_vm0, %v2214_v55  ;;  %v2081_v14 = vmul.f32 %v5354_v18, %v1946_v8  ;;  %v1699_v33 = vadd.f32 1e-05, %v1571_v52  ;;  %v6407_v52 = vld [vmem:[#allocation107_spill] sm:$0xff] }
 0x26c   : > { %v3151_v7 = vpop.eup %3150  ;;  %v2217_v46 = vadd.f32 %v5365_v2, %v2082_v38  ;;  %v1949_v54 = vmul.f32 %v3149_v62, %v6403_v44  ;;  %v1698_v0 = vadd.f32 1e-05, %v1570_v19  ;;  %v1389_v34 = vpop.xlane.xlu1 %1388 }
 0x26d   : > { %v1386_v60 = vpop.xlane.xlu0 %1385  ;;  %v2216_v27 = vadd.f32 %v5365_v2, %v2081_v14  ;;  %v1948_v30 = vmul.f32 %v3151_v7, %v6404_v59  ;;  %3160 = vrsqrt.f32 %v1699_v33  ;;  %v1573_v11 = vmul.f32 0.010416667, %v1389_v34  ;;  %v6408_v7 = vld [vmem:[#allocation108_spill] sm:$0xff] }
 0x26e   : > { %2345 = vst.msk [vmem:[%s4931_s6 + $0x2c8] sm:$0xff] %vm320_vm0, %v2217_v46  ;;  %v2084_v39 = vmul.f32 %v5354_v18, %v1949_v54  ;;  %3162 = vrsqrt.f32 %v1698_v0  ;;  %v1572_v16 = vmul.f32 0.010416667, %v1386_v60 }
 0x26f   : > { %v3153_v63 = vpop.eup %3152  ;;  %2344 = vst.msk [vmem:[%s4931_s6 + $0x2c0] sm:$0xff] %vm320_vm0, %v2216_v27  ;;  %v2083_v43 = vmul.f32 %v5354_v18, %v1948_v30  ;;  %v1701_v45 = vadd.f32 1e-05, %v1573_v11  ;;  %v6409_v11 = vld [vmem:[#allocation23_spill] sm:$0xff] }
 0x270   : > { %v3155_v15 = vpop.eup %3154  ;;  %v2219_v3 = vadd.f32 %v5365_v2, %v2084_v39  ;;  %v1951_v12 = vmul.f32 %v3153_v63, %v6405_v53  ;;  %v1700_v24 = vadd.f32 1e-05, %v1572_v16  ;;  %v1395_v61 = vpop.xlane.xlu1 %1394 }
 0x271   : > { %v1392_v28 = vpop.xlane.xlu0 %1391  ;;  %v2218_v22 = vadd.f32 %v5365_v2, %v2083_v43  ;;  %v1950_v41 = vmul.f32 %v3155_v15, %v6406_v32  ;;  %3164 = vrsqrt.f32 %v1701_v45  ;;  %v1575_v9 = vmul.f32 0.010416667, %v1395_v61  ;;  %v6410_v15 = vld [vmem:[#allocation24_spill] sm:$0xff] }
 0x272   : > { %2347 = vst.msk [vmem:[%s4931_s6 + $0x2d8] sm:$0xff] %vm320_vm0, %v2219_v3  ;;  %v2086_v21 = vmul.f32 %v5354_v18, %v1951_v12  ;;  %3166 = vrsqrt.f32 %v1700_v24  ;;  %v1574_v13 = vmul.f32 0.010416667, %v1392_v28 }
 0x273   : > { %v3157_v29 = vpop.eup %3156  ;;  %2346 = vst.msk [vmem:[%s4931_s6 + $0x2d0] sm:$0xff] %vm320_vm0, %v2218_v22  ;;  %v2085_v17 = vmul.f32 %v5354_v18, %v1950_v41  ;;  %v1703_v55 = vadd.f32 1e-05, %v1575_v9  ;;  %v6411_v9 = vld [vmem:[#allocation26_spill] sm:$0xff] }
 0x274   : > { %v3159_v36 = vpop.eup %3158  ;;  %v2221_v8 = vadd.f32 %v5365_v2, %v2086_v21  ;;  %v1953_v38 = vmul.f32 %v3157_v29, %v6407_v52  ;;  %v1702_v19 = vadd.f32 1e-05, %v1574_v13  ;;  %v1401_v62 = vpop.xlane.xlu1 %1400 }
 0x275   : > { %v1398_v14 = vpop.xlane.xlu0 %1397  ;;  %v2220_v33 = vadd.f32 %v5365_v2, %v2085_v17  ;;  %v1952_v46 = vmul.f32 %v3159_v36, %v6408_v7  ;;  %3168 = vrsqrt.f32 %v1703_v55  ;;  %v1577_v44 = vmul.f32 0.010416667, %v1401_v62  ;;  %v6412_v36 = vld [vmem:[#allocation27_spill] sm:$0xff] }
 0x276   : > { %2349 = vst.msk [vmem:[%s4931_s6 + $0x2e8] sm:$0xff] %vm320_vm0, %v2221_v8  ;;  %v2088_v54 = vmul.f32 %v5354_v18, %v1953_v38  ;;  %3170 = vrsqrt.f32 %v1702_v19  ;;  %v1576_v0 = vmul.f32 0.010416667, %v1398_v14  ;;  %v5661_v7 = vld [vmem:[%s6017_s2] ss:$0 sm:$0xff] }
 0x277   : > { %v3161_v34 = vpop.eup %3160  ;;  %2348 = vst.msk [vmem:[%s4931_s6 + $0x2e0] sm:$0xff] %vm320_vm0, %v2220_v33  ;;  %v2087_v60 = vmul.f32 %v5354_v18, %v1952_v46  ;;  %v1705_v27 = vadd.f32 1e-05, %v1577_v44  ;;  %v6413_v44 = vld [vmem:[#allocation109_spill] sm:$0xff] }
 0x278   : > { %v3163_v59 = vpop.eup %3162  ;;  %v2223_v30 = vadd.f32 %v5365_v2, %v2088_v54  ;;  %v1955_v39 = vmul.f32 %v3161_v34, %v6409_v11  ;;  %v1704_v16 = vadd.f32 1e-05, %v1576_v0  ;;  %v1407_v63 = vpop.xlane.xlu1 %1406 }
 0x279   : > { %v1404_v43 = vpop.xlane.xlu0 %1403  ;;  %v2222_v45 = vadd.f32 %v5365_v2, %v2087_v60  ;;  %v1954_v3 = vmul.f32 %v3163_v59, %v6410_v15  ;;  %3172 = vrsqrt.f32 %v1705_v27  ;;  %v1579_v53 = vmul.f32 0.010416667, %v1407_v63  ;;  %v6414_v59 = vld [vmem:[#allocation110_spill] sm:$0xff] }
 0x27a   : > { %2351 = vst.msk [vmem:[%s4931_s6 + $0x2f8] sm:$0xff] %vm320_vm0, %v2223_v30  ;;  %v2090_v12 = vmul.f32 %v5354_v18, %v1955_v39  ;;  %3174 = vrsqrt.f32 %v1704_v16  ;;  %v1578_v24 = vmul.f32 0.010416667, %v1404_v43 }
 0x27b   : > { %v3165_v61 = vpop.eup %3164  ;;  %2350 = vst.msk [vmem:[%s4931_s6 + $0x2f0] sm:$0xff] %vm320_vm0, %v2222_v45  ;;  %v2089_v28 = vmul.f32 %v5354_v18, %v1954_v3  ;;  %v1707_v22 = vadd.f32 1e-05, %v1579_v53  ;;  %v5652_v18 = vld [vmem:[%s6016_s1] ss:$0 sm:$0xff] }
 0x27c   : > { %v3167_v32 = vpop.eup %3166  ;;  %v2225_v41 = vadd.f32 %v5365_v2, %v2090_v12  ;;  %v1957_v21 = vmul.f32 %v3165_v61, %v6411_v9  ;;  %v1706_v13 = vadd.f32 1e-05, %v1578_v24  ;;  %v1413_v29 = vpop.xlane.xlu1 %1412  ;;  %v6415_v53 = vld [vmem:[#allocation111_spill] sm:$0xff] }
 0x27d   : > { %v1410_v17 = vpop.xlane.xlu0 %1409  ;;  %v2224_v55 = vadd.f32 %v5365_v2, %v2089_v28  ;;  %v1956_v8 = vmul.f32 %v3167_v32, %v6412_v36  ;;  %3176 = vrsqrt.f32 %v1707_v22  ;;  %v1581_v52 = vmul.f32 0.010416667, %v1413_v29  ;;  %v6416_v32 = vld [vmem:[#allocation112_spill] sm:$0xff] }
 0x27e   : > { %2353 = vst.msk [vmem:[%s4931_s6 + $0x308] sm:$0xff] %vm320_vm0, %v2225_v41  ;;  %v2092_v38 = vmul.f32 %v5652_v18, %v1957_v21  ;;  %3178 = vrsqrt.f32 %v1706_v13  ;;  %v1580_v19 = vmul.f32 0.010416667, %v1410_v17 }
 0x27f   : > { %v3169_v62 = vpop.eup %3168  ;;  %2352 = vst.msk [vmem:[%s4931_s6 + $0x300] sm:$0xff] %vm320_vm0, %v2224_v55  ;;  %v2091_v2 = vmul.f32 %v5652_v18, %v1956_v8  ;;  %v1709_v14 = vadd.f32 1e-05, %v1581_v52  ;;  %v6417_v52 = vld [vmem:[#allocation113_spill] sm:$0xff] }
 0x280   : > { %v3171_v33 = vpop.eup %3170  ;;  %v2227_v46 = vadd.f32 %v5661_v7, %v2092_v38  ;;  %v1959_v54 = vmul.f32 %v3169_v62, %v6413_v44  ;;  %v1708_v0 = vadd.f32 1e-05, %v1580_v19  ;;  %v1419_v34 = vpop.xlane.xlu1 %1418 }
 0x281   : > { %v1416_v60 = vpop.xlane.xlu0 %1415  ;;  %v2226_v27 = vadd.f32 %v5661_v7, %v2091_v2  ;;  %v1958_v30 = vmul.f32 %v3171_v33, %v6414_v59  ;;  %3180 = vrsqrt.f32 %v1709_v14  ;;  %v1583_v11 = vmul.f32 0.010416667, %v1419_v34  ;;  %v6418_v33 = vld [vmem:[#allocation114_spill] sm:$0xff] }
 0x282   : > { %2355 = vst.msk [vmem:[%s4931_s6 + $0x318] sm:$0xff] %vm320_vm0, %v2227_v46  ;;  %v2094_v39 = vmul.f32 %v5652_v18, %v1959_v54  ;;  %3182 = vrsqrt.f32 %v1708_v0  ;;  %v1582_v16 = vmul.f32 0.010416667, %v1416_v60 }
 0x283   : > { %v3173_v63 = vpop.eup %3172  ;;  %2354 = vst.msk [vmem:[%s4931_s6 + $0x310] sm:$0xff] %vm320_vm0, %v2226_v27  ;;  %v2093_v43 = vmul.f32 %v5652_v18, %v1958_v30  ;;  %v1711_v45 = vadd.f32 1e-05, %v1583_v11 }
 0x284   : > { %v3175_v15 = vpop.eup %3174  ;;  %v2229_v3 = vadd.f32 %v5661_v7, %v2094_v39  ;;  %v1961_v12 = vmul.f32 %v3173_v63, %v6415_v53  ;;  %v1710_v24 = vadd.f32 1e-05, %v1582_v16  ;;  %v1425_v61 = vpop.xlane.xlu1 %1424 }
 0x285   : > { %v1422_v28 = vpop.xlane.xlu0 %1421  ;;  %v2228_v22 = vadd.f32 %v5661_v7, %v2093_v43  ;;  %v1960_v41 = vmul.f32 %v3175_v15, %v6416_v32  ;;  %3184 = vrsqrt.f32 %v1711_v45  ;;  %v1585_v9 = vmul.f32 0.010416667, %v1425_v61 }
 0x286   : > { %2357 = vst.msk [vmem:[%s4931_s6 + $0x328] sm:$0xff] %vm320_vm0, %v2229_v3  ;;  %v2096_v21 = vmul.f32 %v5652_v18, %v1961_v12  ;;  %3186 = vrsqrt.f32 %v1710_v24  ;;  %v1584_v13 = vmul.f32 0.010416667, %v1422_v28 }
 0x287   : > { %v3177_v29 = vpop.eup %3176  ;;  %2356 = vst.msk [vmem:[%s4931_s6 + $0x320] sm:$0xff] %vm320_vm0, %v2228_v22  ;;  %v2095_v17 = vmul.f32 %v5652_v18, %v1960_v41  ;;  %v1713_v55 = vadd.f32 1e-05, %v1585_v9 }
 0x288   : > { %v3179_v36 = vpop.eup %3178  ;;  %v2231_v8 = vadd.f32 %v5661_v7, %v2096_v21  ;;  %v1963_v38 = vmul.f32 %v3177_v29, %v6417_v52  ;;  %v1712_v19 = vadd.f32 1e-05, %v1584_v13  ;;  %v1431_v62 = vpop.xlane.xlu1 %1430 }
 0x289   : > { %v1428_v2 = vpop.xlane.xlu0 %1427  ;;  %v2230_v14 = vadd.f32 %v5661_v7, %v2095_v17  ;;  %v1962_v46 = vmul.f32 %v3179_v36, %v6418_v33  ;;  %3188 = vrsqrt.f32 %v1713_v55  ;;  %v1587_v44 = vmul.f32 0.010416667, %v1431_v62 }
 0x28a   : > { %2359 = vst.msk [vmem:[%s4931_s6 + $0x338] sm:$0xff] %vm320_vm0, %v2231_v8  ;;  %v2098_v54 = vmul.f32 %v5652_v18, %v1963_v38  ;;  %3190 = vrsqrt.f32 %v1712_v19  ;;  %v1586_v0 = vmul.f32 0.010416667, %v1428_v2 }
 0x28b   : > { %v3181_v34 = vpop.eup %3180  ;;  %2358 = vst.msk [vmem:[%s4931_s6 + $0x330] sm:$0xff] %vm320_vm0, %v2230_v14  ;;  %v2097_v60 = vmul.f32 %v5652_v18, %v1962_v46  ;;  %v1715_v27 = vadd.f32 1e-05, %v1587_v44 }
 0x28c   : > { %v3183_v59 = vpop.eup %3182  ;;  %v2233_v30 = vadd.f32 %v5661_v7, %v2098_v54  ;;  %v1965_v11 = vmul.f32 %v3181_v34, %v4918_v4  ;;  %v1714_v39 = vadd.f32 1e-05, %v1586_v0  ;;  %v1437_v16 = vpop.xlane.xlu1 %1436 }
 0x28d   : > { %v1434_v63 = vpop.xlane.xlu0 %1433  ;;  %v2232_v43 = vadd.f32 %v5661_v7, %v2097_v60  ;;  %v1964_v45 = vmul.f32 %v3183_v59, %v4928_v26  ;;  %3192 = vrsqrt.f32 %v1715_v27  ;;  %v1589_v15 = vmul.f32 0.010416667, %v1437_v16 }
 0x28e   : > { %2361 = vst.msk [vmem:[%s4931_s6 + $0x348] sm:$0xff] %vm320_vm0, %v2233_v30  ;;  %v2100_v3 = vmul.f32 %v5652_v18, %v1965_v11  ;;  %3194 = vrsqrt.f32 %v1714_v39  ;;  %v1588_v53 = vmul.f32 0.010416667, %v1434_v63 }
 0x28f   : > { %v3185_v12 = vpop.eup %3184  ;;  %2360 = vst.msk [vmem:[%s4931_s6 + $0x340] sm:$0xff] %vm320_vm0, %v2232_v43  ;;  %v2099_v4 = vmul.f32 %v5652_v18, %v1964_v45  ;;  %v1717_v24 = vadd.f32 1e-05, %v1589_v15 }
 0x290   : > { %v3187_v61 = vpop.eup %3186  ;;  %v2235_v28 = vadd.f32 %v5661_v7, %v2100_v3  ;;  %v1967_v26 = vmul.f32 %v3185_v12, %v4966_v1  ;;  %v1716_v22 = vadd.f32 1e-05, %v1588_v53  ;;  %v1443_v32 = vpop.xlane.xlu1 %1442 }
 0x291   : > { %v1440_v41 = vpop.xlane.xlu0 %1439  ;;  %v2234_v9 = vadd.f32 %v5661_v7, %v2099_v4  ;;  %v1966_v21 = vmul.f32 %v3187_v61, %v4973_v35  ;;  %3196 = vrsqrt.f32 %v1717_v24  ;;  %v1591_v13 = vmul.f32 0.010416667, %v1443_v32 }
 0x292   : > { %2363 = vst.msk [vmem:[%s4931_s6 + $0x358] sm:$0xff] %vm320_vm0, %v2235_v28  ;;  %v2102_v29 = vmul.f32 %v5652_v18, %v1967_v26  ;;  %3198 = vrsqrt.f32 %v1716_v22  ;;  %v1590_v17 = vmul.f32 0.010416667, %v1440_v41 }
 0x293   : > { %v3189_v55 = vpop.eup %3188  ;;  %2362 = vst.msk [vmem:[%s4931_s6 + $0x350] sm:$0xff] %vm320_vm0, %v2234_v9  ;;  %v2101_v1 = vmul.f32 %v5652_v18, %v1966_v21  ;;  %v1719_v36 = vadd.f32 1e-05, %v1591_v13 }
 0x294   : > { %v3191_v8 = vpop.eup %3190  ;;  %v2237_v52 = vadd.f32 %v5661_v7, %v2102_v29  ;;  %v1969_v35 = vmul.f32 %v3189_v55, %v5008_v58  ;;  %v1718_v38 = vadd.f32 1e-05, %v1590_v17  ;;  %v1449_v19 = vpop.xlane.xlu1 %1448 }
 0x295   : > { %v1446_v62 = vpop.xlane.xlu0 %1445  ;;  %v2236_v2 = vadd.f32 %v5661_v7, %v2101_v1  ;;  %v1968_v14 = vmul.f32 %v3191_v8, %v5015_v47  ;;  %3200 = vrsqrt.f32 %v1719_v36  ;;  %v1593_v33 = vmul.f32 0.010416667, %v1449_v19 }
 0x296   : > { %2365 = vst.msk [vmem:[%s4931_s6 + $0x368] sm:$0xff] %vm320_vm0, %v2237_v52  ;;  %v2104_v46 = vmul.f32 %v5652_v18, %v1969_v35  ;;  %3202 = vrsqrt.f32 %v1718_v38  ;;  %v1592_v44 = vmul.f32 0.010416667, %v1446_v62 }
 0x297   : > { %v3193_v54 = vpop.eup %3192  ;;  %2364 = vst.msk [vmem:[%s4931_s6 + $0x360] sm:$0xff] %vm320_vm0, %v2236_v2  ;;  %v2103_v58 = vmul.f32 %v5652_v18, %v1968_v14  ;;  %v1721_v0 = vadd.f32 1e-05, %v1593_v33 }
 0x298   : > { %v3195_v34 = vpop.eup %3194  ;;  %v2239_v60 = vadd.f32 %v5661_v7, %v2104_v46  ;;  %v1971_v47 = vmul.f32 %v3193_v54, %v5050_v48  ;;  %v1720_v27 = vadd.f32 1e-05, %v1592_v44  ;;  %v1455_v59 = vpop.xlane.xlu1 %1454 }
 0x299   : > { %v1452_v30 = vpop.xlane.xlu0 %1451  ;;  %v2238_v11 = vadd.f32 %v5661_v7, %v2103_v58  ;;  %v1970_v39 = vmul.f32 %v3195_v34, %v5057_v25  ;;  %3204 = vrsqrt.f32 %v1721_v0  ;;  %v1595_v16 = vmul.f32 0.010416667, %v1455_v59 }
 0x29a   : > { %2367 = vst.msk [vmem:[%s4931_s6 + $0x378] sm:$0xff] %vm320_vm0, %v2239_v60  ;;  %v2106_v63 = vmul.f32 %v5652_v18, %v1971_v47  ;;  %3206 = vrsqrt.f32 %v1720_v27  ;;  %v1594_v43 = vmul.f32 0.010416667, %v1452_v30 }
 0x29b   : > { %v3197_v45 = vpop.eup %3196  ;;  %2366 = vst.msk [vmem:[%s4931_s6 + $0x370] sm:$0xff] %vm320_vm0, %v2238_v11  ;;  %v2105_v48 = vmul.f32 %v5652_v18, %v1970_v39  ;;  %v1723_v15 = vadd.f32 1e-05, %v1595_v16 }
 0x29c   : > { %v3199_v3 = vpop.eup %3198  ;;  %v2241_v53 = vadd.f32 %v5661_v7, %v2106_v63  ;;  %v1973_v25 = vmul.f32 %v3197_v45, %v5092_v5  ;;  %v1722_v12 = vadd.f32 1e-05, %v1594_v43  ;;  %v1461_v4 = vpop.xlane.xlu1 %1460 }
 0x29d   : > { %v1458_v24 = vpop.xlane.xlu0 %1457  ;;  %v2240_v61 = vadd.f32 %v5661_v7, %v2105_v48  ;;  %v1972_v28 = vmul.f32 %v3199_v3, %v5099_v37  ;;  %3208 = vrsqrt.f32 %v1723_v15  ;;  %v1597_v26 = vmul.f32 0.010416667, %v1461_v4 }
 0x29e   : > { %2369 = vst.msk [vmem:[%s4931_s6 + $0x388] sm:$0xff] %vm320_vm0, %v2241_v53  ;;  %v2108_v22 = vmul.f32 %v5652_v18, %v1973_v25  ;;  %3210 = vrsqrt.f32 %v1722_v12  ;;  %v1596_v32 = vmul.f32 0.010416667, %v1458_v24 }
 0x29f   : > { %v3201_v41 = vpop.eup %3200  ;;  %2368 = vst.msk [vmem:[%s4931_s6 + $0x380] sm:$0xff] %vm320_vm0, %v2240_v61  ;;  %v2107_v5 = vmul.f32 %v5652_v18, %v1972_v28  ;;  %v1725_v9 = vadd.f32 1e-05, %v1597_v26 }
 0x2a0   : > { %v3203_v21 = vpop.eup %3202  ;;  %v2243_v13 = vadd.f32 %v5661_v7, %v2108_v22  ;;  %v1975_v37 = vmul.f32 %v3201_v41, %v5134_v49  ;;  %v1724_v29 = vadd.f32 1e-05, %v1596_v32  ;;  %v1467_v17 = vpop.xlane.xlu1 %1466 }
 0x2a1   : > { %v1464_v55 = vpop.xlane.xlu0 %1463  ;;  %v2242_v1 = vadd.f32 %v5661_v7, %v2107_v5  ;;  %v1974_v36 = vmul.f32 %v3203_v21, %v5141_v6  ;;  %3212 = vrsqrt.f32 %v1725_v9  ;;  %v1599_v8 = vmul.f32 0.010416667, %v1467_v17 }
 0x2a2   : > { %2371 = vst.msk [vmem:[%s4931_s6 + $0x398] sm:$0xff] %vm320_vm0, %v2243_v13  ;;  %v2110_v52 = vmul.f32 %v5652_v18, %v1975_v37  ;;  %3214 = vrsqrt.f32 %v1724_v29  ;;  %v1598_v35 = vmul.f32 0.010416667, %v1464_v55 }
 0x2a3   : > { %v3205_v38 = vpop.eup %3204  ;;  %2370 = vst.msk [vmem:[%s4931_s6 + $0x390] sm:$0xff] %vm320_vm0, %v2242_v1  ;;  %v2109_v49 = vmul.f32 %v5652_v18, %v1974_v36  ;;  %v1727_v19 = vadd.f32 1e-05, %v1599_v8 }
 0x2a4   : > { %v3207_v62 = vpop.eup %3206  ;;  %v2245_v2 = vadd.f32 %v5661_v7, %v2110_v52  ;;  %v1977_v6 = vmul.f32 %v3205_v38, %v5176_v42  ;;  %v1726_v14 = vadd.f32 1e-05, %v1598_v35  ;;  %v1473_v33 = vpop.xlane.xlu1 %1472 }
 0x2a5   : > { %v1470_v46 = vpop.xlane.xlu0 %1469  ;;  %v2244_v44 = vadd.f32 %v5661_v7, %v2109_v49  ;;  %v1976_v54 = vmul.f32 %v3207_v62, %v5183_v50  ;;  %3216 = vrsqrt.f32 %v1727_v19  ;;  %v1601_v58 = vmul.f32 0.010416667, %v1473_v33 }
 0x2a6   : > { %2373 = vst.msk [vmem:[%s4931_s6 + $0x3a8] sm:$0xff] %vm320_vm0, %v2245_v2  ;;  %v2112_v0 = vmul.f32 %v5652_v18, %v1977_v6  ;;  %3218 = vrsqrt.f32 %v1726_v14  ;;  %v1600_v34 = vmul.f32 0.010416667, %v1470_v46 }
 0x2a7   : > { %v3209_v60 = vpop.eup %3208  ;;  %2372 = vst.msk [vmem:[%s4931_s6 + $0x3a0] sm:$0xff] %vm320_vm0, %v2244_v44  ;;  %v2111_v42 = vmul.f32 %v5652_v18, %v1976_v54  ;;  %v1729_v47 = vadd.f32 1e-05, %v1601_v58 }
 0x2a8   : > { %v3211_v27 = vpop.eup %3210  ;;  %v2247_v59 = vadd.f32 %v5661_v7, %v2112_v0  ;;  %v1979_v50 = vmul.f32 %v3209_v60, %v5218_v23  ;;  %v1728_v30 = vadd.f32 1e-05, %v1600_v34 }
 0x2a9   : > { %v2246_v11 = vadd.f32 %v5661_v7, %v2111_v42  ;;  %v1978_v39 = vmul.f32 %v3211_v27, %v5225_v56  ;;  %3220 = vrsqrt.f32 %v1729_v47 }
 0x2aa   : > { %2375 = vst.msk [vmem:[%s4931_s6 + $0x3b8] sm:$0xff] %vm320_vm0, %v2247_v59  ;;  %v2114_v16 = vmul.f32 %v5652_v18, %v1979_v50  ;;  %3222 = vrsqrt.f32 %v1728_v30 }
 0x2ab   : > { %v3213_v63 = vpop.eup %3212  ;;  %2374 = vst.msk [vmem:[%s4931_s6 + $0x3b0] sm:$0xff] %vm320_vm0, %v2246_v11  ;;  %v2113_v43 = vmul.f32 %v5652_v18, %v1978_v39 }
 0x2ac   : > { %v3215_v23 = vpop.eup %3214  ;;  %v2249_v45 = vadd.f32 %v5661_v7, %v2114_v16  ;;  %v1981_v48 = vmul.f32 %v3213_v63, %v5260_v10 }
 0x2ad   : > { %v2248_v56 = vadd.f32 %v5661_v7, %v2113_v43  ;;  %v1980_v15 = vmul.f32 %v3215_v23, %v5267_v31 }
 0x2ae   : > { %2377 = vst.msk [vmem:[%s4931_s6 + $0x3c8] sm:$0xff] %vm320_vm0, %v2249_v45  ;;  %v2116_v3 = vmul.f32 %v5652_v18, %v1981_v48 }
 0x2af   : > { %v3217_v53 = vpop.eup %3216  ;;  %2376 = vst.msk [vmem:[%s4931_s6 + $0x3c0] sm:$0xff] %vm320_vm0, %v2248_v56  ;;  %v2115_v25 = vmul.f32 %v5652_v18, %v1980_v15 }
 0x2b0   : > { %v3219_v12 = vpop.eup %3218  ;;  %v2251_v4 = vadd.f32 %v5661_v7, %v2116_v3  ;;  %v1983_v10 = vmul.f32 %v3217_v53, %v5302_v20 }
 0x2b1   : > { %v2250_v24 = vadd.f32 %v5661_v7, %v2115_v25  ;;  %v1982_v31 = vmul.f32 %v3219_v12, %v5309_v51 }
 0x2b2   : > { %2379 = vst.msk [vmem:[%s4931_s6 + $0x3d8] sm:$0xff] %vm320_vm0, %v2251_v4  ;;  %v2118_v61 = vmul.f32 %v5652_v18, %v1983_v10 }
 0x2b3   : > { %v3221_v28 = vpop.eup %3220  ;;  %2378 = vst.msk [vmem:[%s4931_s6 + $0x3d0] sm:$0xff] %vm320_vm0, %v2250_v24  ;;  %v2117_v26 = vmul.f32 %v5652_v18, %v1982_v31 }
 0x2b4   : > { %v3223_v22 = vpop.eup %3222  ;;  %v2253_v32 = vadd.f32 %v5661_v7, %v2118_v61  ;;  %v1985_v20 = vmul.f32 %v3221_v28, %v5340_v57 }
 0x2b5   : > { %v2252_v41 = vadd.f32 %v5661_v7, %v2117_v26  ;;  %v1984_v51 = vmul.f32 %v3223_v22, %v5347_v40  ;;  %2390 = sbr.rel (!%p3462_p4) target bundleno = 772 (0x304), region = 36 }
 0x2b6   : > { %2381 = vst.msk [vmem:[%s4931_s6 + $0x3e8] sm:$0xff] %vm320_vm0, %v2253_v32  ;;  %v2120_v5 = vmul.f32 %v5652_v18, %v1985_v20 }
 0x2b7   : > { %2380 = vst.msk [vmem:[%s4931_s6 + $0x3e0] sm:$0xff] %vm320_vm0, %v2252_v41  ;;  %v2119_v9 = vmul.f32 %v5652_v18, %v1984_v51 }
 0x2b8   : > { %v2255_v21 = vadd.f32 %v5661_v7, %v2120_v5 }
 0x2b9   : > { %v2254_v13 = vadd.f32 %v5661_v7, %v2119_v9 }
 0x2ba   : > { %2383 = vst.msk [vmem:[%s4931_s6 + $0x3f8] sm:$0xff] %vm320_vm0, %v2255_v21 }
 0x2bb   : > { %2382 = vst.msk [vmem:[%s4931_s6 + $0x3f0] sm:$0xff] %vm320_vm0, %v2254_v13 }
 0x2bc   : > { %s6428_s18 = smov (!%p2393_p8, %s2392_s18), 128 }
 0x2bd   : > { %s2862_s26 = sshll.u32 %s6428_s18, 7 }
 0x2be   : > { %p2865_p9 = scmp.eq.s32.totalorder %s2862_s26, 0 }
 0x2bf   : > { %s5822_s27 = sshrl.u32 (!%p2865_p9), %s6428_s18, 6 }
 0x2c0   : > { %2401 = sbr.rel (%p2865_p9) target bundleno = 772 (0x304), region = 40  ;;  %p2866_p10 = scmp.le.s32.totalorder (!%p2865_p9), %s5822_s27, 0 }
 0x2c7   : > { %2807 = sbr.rel (%p2866_p10) target bundleno = 751 (0x2ef), region = 116  ;;  %s6419_s15 = smov (!%p2866_p10), %s5816_s25 }
 0x2c8   : > { %s6420_s20 = smov (!%p2866_p10), %s4931_s6  ;;  %s5831_s21 = smov (!%p2866_p10), 0  }
 0x2c9   : > { %s5833_s28 = smov (!%p2866_p10), 0  }
 0x2ce LB: >> { %v2589_v57 = vld [vmem:[%s3391_s20] sm:$0xff]  ;;  %v2591_v40 = vld [vmem:[%s3391_s20 + $0x8] sm:$0xff]  ;;  %v2593_v18 = vld [vmem:[%s3391_s20 + $0x10] sm:$0xff]  ;;  %s2717_s29 = sadd.s32 1, %s3395_s21  ;;  %s2583_s28 = sadd.s32 1, %s3399_s28   ;;  %s3399_s28 = sphi %s5833_s28, %s2583_s28   ;;  %s3395_s21 = sphi %s5831_s21, %s6423_s21   ;;  %s3391_s20 = sphi %s6420_s20, %s6422_s20   ;;  %s3387_s15 = sphi %s6419_s15, %s6421_s15  }
 0x2cf   : >> { %2590 = vst [vmem:[%s3387_s15] sm:$0xff] %v2589_v57  ;;  %2592 = vst [vmem:[%s3387_s15 + $0x8] sm:$0xff] %v2591_v40  ;;  %v2595_v7 = vld [vmem:[%s3391_s20 + $0x18] sm:$0xff]  ;;  %v2597_v37 = vld [vmem:[%s3391_s20 + $0x20] sm:$0xff]  ;;  %p2718_p11 = scmp.ge.s32.totalorder %s2717_s29, %s5822_s27  ;;  %p2582_p12 = scmp.ge.s32.totalorder %s2583_s28, %s5822_s27 }
 0x2d0   : >> { %2594 = vst [vmem:[%s3387_s15 + $0x10] sm:$0xff] %v2593_v18  ;;  %v2599_v29 = vld [vmem:[%s3391_s20 + $0x28] sm:$0xff]  ;;  %2596 = vst [vmem:[%s3387_s15 + $0x18] sm:$0xff] %v2595_v7  ;;  %v2601_v17 = vld [vmem:[%s3391_s20 + $0x30] sm:$0xff] }
 0x2d1   : >> { %2598 = vst [vmem:[%s3387_s15 + $0x20] sm:$0xff] %v2597_v37  ;;  %2600 = vst [vmem:[%s3387_s15 + $0x28] sm:$0xff] %v2599_v29  ;;  %v2603_v55 = vld [vmem:[%s3391_s20 + $0x38] sm:$0xff]  ;;  %v2605_v1 = vld [vmem:[%s3391_s20 + $0x40] sm:$0xff]  ;;  %s6430_s29 = smov (%p2718_p11, %s2717_s29), 0 }
 0x2d2   : >> { %2602 = vst [vmem:[%s3387_s15 + $0x30] sm:$0xff] %v2601_v17  ;;  %2604 = vst [vmem:[%s3387_s15 + $0x38] sm:$0xff] %v2603_v55  ;;  %v2607_v36 = vld [vmem:[%s3391_s20 + $0x48] sm:$0xff]  ;;  %v2609_v8 = vld [vmem:[%s3391_s20 + $0x50] sm:$0xff]  ;;  %s2867_s30 = sshll.u32 %s6430_s29, 9  ;;  %s6423_s21 = smov %s6430_s29 }
 0x2d3   : >> { %2606 = vst [vmem:[%s3387_s15 + $0x40] sm:$0xff] %v2605_v1  ;;  %v2611_v52 = vld [vmem:[%s3391_s20 + $0x58] sm:$0xff]  ;;  %2608 = vst [vmem:[%s3387_s15 + $0x48] sm:$0xff] %v2607_v36  ;;  %v2613_v35 = vld [vmem:[%s3391_s20 + $0x60] sm:$0xff]  ;;  %s5889_s4 = scalar_lea.vmem %s4931_s6, %s2867_s30 [#allocation2]   ;;  %s5892_s5 = scalar_lea.vmem %s5816_s25, %s2867_s30  }
 0x2d4   : >> { %2610 = vst [vmem:[%s3387_s15 + $0x50] sm:$0xff] %v2609_v8  ;;  %2612 = vst [vmem:[%s3387_s15 + $0x58] sm:$0xff] %v2611_v52  ;;  %v2615_v38 = vld [vmem:[%s3391_s20 + $0x68] sm:$0xff]  ;;  %v2617_v49 = vld [vmem:[%s3391_s20 + $0x70] sm:$0xff] }
 0x2d5   : >> { %2614 = vst [vmem:[%s3387_s15 + $0x60] sm:$0xff] %v2613_v35  ;;  %2616 = vst [vmem:[%s3387_s15 + $0x68] sm:$0xff] %v2615_v38  ;;  %v2619_v19 = vld [vmem:[%s3391_s20 + $0x78] sm:$0xff]  ;;  %v2621_v62 = vld [vmem:[%s3391_s20 + $0x80] sm:$0xff] }
 0x2d6   : >> { %2618 = vst [vmem:[%s3387_s15 + $0x70] sm:$0xff] %v2617_v49  ;;  %v2623_v2 = vld [vmem:[%s3391_s20 + $0x88] sm:$0xff]  ;;  %2620 = vst [vmem:[%s3387_s15 + $0x78] sm:$0xff] %v2619_v19  ;;  %v2625_v6 = vld [vmem:[%s3391_s20 + $0x90] sm:$0xff] }
 0x2d7   : >> { %2622 = vst [vmem:[%s3387_s15 + $0x80] sm:$0xff] %v2621_v62  ;;  %2624 = vst [vmem:[%s3387_s15 + $0x88] sm:$0xff] %v2623_v2  ;;  %v2627_v14 = vld [vmem:[%s3391_s20 + $0x98] sm:$0xff]  ;;  %v2629_v33 = vld [vmem:[%s3391_s20 + $0xa0] sm:$0xff] }
 0x2d8   : >> { %2626 = vst [vmem:[%s3387_s15 + $0x90] sm:$0xff] %v2625_v6  ;;  %2628 = vst [vmem:[%s3387_s15 + $0x98] sm:$0xff] %v2627_v14  ;;  %v2631_v46 = vld [vmem:[%s3391_s20 + $0xa8] sm:$0xff]  ;;  %v2633_v44 = vld [vmem:[%s3391_s20 + $0xb0] sm:$0xff] }
 0x2d9   : >> { %2630 = vst [vmem:[%s3387_s15 + $0xa0] sm:$0xff] %v2629_v33  ;;  %v2635_v54 = vld [vmem:[%s3391_s20 + $0xb8] sm:$0xff]  ;;  %2632 = vst [vmem:[%s3387_s15 + $0xa8] sm:$0xff] %v2631_v46  ;;  %v2637_v58 = vld [vmem:[%s3391_s20 + $0xc0] sm:$0xff] }
 0x2da   : >> { %2634 = vst [vmem:[%s3387_s15 + $0xb0] sm:$0xff] %v2633_v44  ;;  %2636 = vst [vmem:[%s3387_s15 + $0xb8] sm:$0xff] %v2635_v54  ;;  %v2639_v0 = vld [vmem:[%s3391_s20 + $0xc8] sm:$0xff]  ;;  %v2641_v34 = vld [vmem:[%s3391_s20 + $0xd0] sm:$0xff] }
 0x2db   : >> { %2638 = vst [vmem:[%s3387_s15 + $0xc0] sm:$0xff] %v2637_v58  ;;  %2640 = vst [vmem:[%s3387_s15 + $0xc8] sm:$0xff] %v2639_v0  ;;  %v2643_v60 = vld [vmem:[%s3391_s20 + $0xd8] sm:$0xff]  ;;  %v2645_v42 = vld [vmem:[%s3391_s20 + $0xe0] sm:$0xff] }
 0x2dc   : >> { %2642 = vst [vmem:[%s3387_s15 + $0xd0] sm:$0xff] %v2641_v34  ;;  %v2647_v47 = vld [vmem:[%s3391_s20 + $0xe8] sm:$0xff]  ;;  %2644 = vst [vmem:[%s3387_s15 + $0xd8] sm:$0xff] %v2643_v60  ;;  %v2649_v27 = vld [vmem:[%s3391_s20 + $0xf0] sm:$0xff] }
 0x2dd   : >> { %2646 = vst [vmem:[%s3387_s15 + $0xe0] sm:$0xff] %v2645_v42  ;;  %2648 = vst [vmem:[%s3387_s15 + $0xe8] sm:$0xff] %v2647_v47  ;;  %v2651_v59 = vld [vmem:[%s3391_s20 + $0xf8] sm:$0xff]  ;;  %v2653_v50 = vld [vmem:[%s3391_s20 + $0x100] sm:$0xff] }
 0x2de   : >> { %2650 = vst [vmem:[%s3387_s15 + $0xf0] sm:$0xff] %v2649_v27  ;;  %2652 = vst [vmem:[%s3387_s15 + $0xf8] sm:$0xff] %v2651_v59  ;;  %v2655_v30 = vld [vmem:[%s3391_s20 + $0x108] sm:$0xff]  ;;  %v2657_v11 = vld [vmem:[%s3391_s20 + $0x110] sm:$0xff] }
 0x2df   : >> { %2654 = vst [vmem:[%s3387_s15 + $0x100] sm:$0xff] %v2653_v50  ;;  %v2659_v39 = vld [vmem:[%s3391_s20 + $0x118] sm:$0xff]  ;;  %2656 = vst [vmem:[%s3387_s15 + $0x108] sm:$0xff] %v2655_v30  ;;  %v2661_v16 = vld [vmem:[%s3391_s20 + $0x120] sm:$0xff] }
 0x2e0   : >> { %2658 = vst [vmem:[%s3387_s15 + $0x110] sm:$0xff] %v2657_v11  ;;  %2660 = vst [vmem:[%s3387_s15 + $0x118] sm:$0xff] %v2659_v39  ;;  %v2663_v63 = vld [vmem:[%s3391_s20 + $0x128] sm:$0xff]  ;;  %v2665_v43 = vld [vmem:[%s3391_s20 + $0x130] sm:$0xff] }
 0x2e1   : >> { %2662 = vst [vmem:[%s3387_s15 + $0x120] sm:$0xff] %v2661_v16  ;;  %2664 = vst [vmem:[%s3387_s15 + $0x128] sm:$0xff] %v2663_v63  ;;  %v2667_v23 = vld [vmem:[%s3391_s20 + $0x138] sm:$0xff]  ;;  %v2669_v45 = vld [vmem:[%s3391_s20 + $0x140] sm:$0xff] }
 0x2e2   : >> { %2666 = vst [vmem:[%s3387_s15 + $0x130] sm:$0xff] %v2665_v43  ;;  %v2671_v48 = vld [vmem:[%s3391_s20 + $0x148] sm:$0xff]  ;;  %2668 = vst [vmem:[%s3387_s15 + $0x138] sm:$0xff] %v2667_v23  ;;  %v2673_v56 = vld [vmem:[%s3391_s20 + $0x150] sm:$0xff] }
 0x2e3   : >> { %2670 = vst [vmem:[%s3387_s15 + $0x140] sm:$0xff] %v2669_v45  ;;  %2672 = vst [vmem:[%s3387_s15 + $0x148] sm:$0xff] %v2671_v48  ;;  %v2675_v15 = vld [vmem:[%s3391_s20 + $0x158] sm:$0xff]  ;;  %v2677_v3 = vld [vmem:[%s3391_s20 + $0x160] sm:$0xff] }
 0x2e4   : >> { %2674 = vst [vmem:[%s3387_s15 + $0x150] sm:$0xff] %v2673_v56  ;;  %2676 = vst [vmem:[%s3387_s15 + $0x158] sm:$0xff] %v2675_v15  ;;  %v2679_v53 = vld [vmem:[%s3391_s20 + $0x168] sm:$0xff]  ;;  %v2681_v25 = vld [vmem:[%s3391_s20 + $0x170] sm:$0xff] }
 0x2e5   : >> { %2678 = vst [vmem:[%s3387_s15 + $0x160] sm:$0xff] %v2677_v3  ;;  %v2683_v12 = vld [vmem:[%s3391_s20 + $0x178] sm:$0xff]  ;;  %2680 = vst [vmem:[%s3387_s15 + $0x168] sm:$0xff] %v2679_v53  ;;  %v2685_v4 = vld [vmem:[%s3391_s20 + $0x180] sm:$0xff] }
 0x2e6   : >> { %2682 = vst [vmem:[%s3387_s15 + $0x170] sm:$0xff] %v2681_v25  ;;  %2684 = vst [vmem:[%s3387_s15 + $0x178] sm:$0xff] %v2683_v12  ;;  %v2687_v10 = vld [vmem:[%s3391_s20 + $0x188] sm:$0xff]  ;;  %v2689_v24 = vld [vmem:[%s3391_s20 + $0x190] sm:$0xff] }
 0x2e7   : >> { %2686 = vst [vmem:[%s3387_s15 + $0x180] sm:$0xff] %v2685_v4  ;;  %2688 = vst [vmem:[%s3387_s15 + $0x188] sm:$0xff] %v2687_v10  ;;  %v2691_v31 = vld [vmem:[%s3391_s20 + $0x198] sm:$0xff]  ;;  %v2693_v61 = vld [vmem:[%s3391_s20 + $0x1a0] sm:$0xff] }
 0x2e8   : >> { %2690 = vst [vmem:[%s3387_s15 + $0x190] sm:$0xff] %v2689_v24  ;;  %v2695_v28 = vld [vmem:[%s3391_s20 + $0x1a8] sm:$0xff]  ;;  %2692 = vst [vmem:[%s3387_s15 + $0x198] sm:$0xff] %v2691_v31  ;;  %v2697_v26 = vld [vmem:[%s3391_s20 + $0x1b0] sm:$0xff]  ;;  %2585 = sbr.rel (!%p2582_p12) target bundleno = 718 (0x2ce), region = 122 }
 0x2e9   : >> { %2694 = vst [vmem:[%s3387_s15 + $0x1a0] sm:$0xff] %v2693_v61  ;;  %2696 = vst [vmem:[%s3387_s15 + $0x1a8] sm:$0xff] %v2695_v28  ;;  %v2699_v22 = vld [vmem:[%s3391_s20 + $0x1b8] sm:$0xff]  ;;  %v2701_v32 = vld [vmem:[%s3391_s20 + $0x1c0] sm:$0xff] }
 0x2ea   : >> { %2698 = vst [vmem:[%s3387_s15 + $0x1b0] sm:$0xff] %v2697_v26  ;;  %2700 = vst [vmem:[%s3387_s15 + $0x1b8] sm:$0xff] %v2699_v22  ;;  %v2703_v20 = vld [vmem:[%s3391_s20 + $0x1c8] sm:$0xff]  ;;  %v2705_v41 = vld [vmem:[%s3391_s20 + $0x1d0] sm:$0xff] }
 0x2eb   : >> { %2702 = vst [vmem:[%s3387_s15 + $0x1c0] sm:$0xff] %v2701_v32  ;;  %v2707_v51 = vld [vmem:[%s3391_s20 + $0x1d8] sm:$0xff]  ;;  %2704 = vst [vmem:[%s3387_s15 + $0x1c8] sm:$0xff] %v2703_v20  ;;  %v2709_v5 = vld [vmem:[%s3391_s20 + $0x1e0] sm:$0xff] }
 0x2ec   : >> { %2706 = vst [vmem:[%s3387_s15 + $0x1d0] sm:$0xff] %v2705_v41  ;;  %2708 = vst [vmem:[%s3387_s15 + $0x1d8] sm:$0xff] %v2707_v51  ;;  %v2711_v9 = vld [vmem:[%s3391_s20 + $0x1e8] sm:$0xff]  ;;  %v2713_v21 = vld [vmem:[%s3391_s20 + $0x1f0] sm:$0xff] }
 0x2ed   : >> { %2710 = vst [vmem:[%s3387_s15 + $0x1e0] sm:$0xff] %v2709_v5  ;;  %2712 = vst [vmem:[%s3387_s15 + $0x1e8] sm:$0xff] %v2711_v9  ;;  %v2715_v13 = vld [vmem:[%s3391_s20 + $0x1f8] sm:$0xff]  ;;  %s6422_s20 = smov %s5889_s4 }
 0x2ee   : >> { %2714 = vst [vmem:[%s3387_s15 + $0x1f0] sm:$0xff] %v2713_v21  ;;  %2716 = vst [vmem:[%s3387_s15 + $0x1f8] sm:$0xff] %v2715_v13  ;;  %s6421_s15 = smov %s5892_s5 }
 0x2ef PF: > { %s5997_s7 = sand.u32 63, %s6428_s18   ;;  %s2878_s8 = sshll.u32 %s5822_s27, 9 }
 0x2f0   : > { %s2728_s9 = scalar_lea.vmem %s4931_s6, %s2878_s8 [#allocation2]   ;;  %s2730_s10 = scalar_lea.vmem %s5816_s25, %s2878_s8  }
 0x2f1   : > { %p2872_p13 = scmp.le.s32.totalorder %s5997_s7, 0 }
 0x2f2   : > { %s3401_s11 = smov (!%p2872_p13), %s2730_s10   ;;  %s3405_s12 = smov (!%p2872_p13), %s2728_s9  }
 0x2f3   : > { %2821 = sbr.rel (%p2872_p13) target bundleno = 772 (0x304), region = 127  ;;  %s3409_s14 = smov (!%p2872_p13), 0  }
 0x2f4   : > { %s3413_s17 = smov (!%p2872_p13), 0  }
 0x2fa LB: >> { %v2740_v57 = vld [vmem:[%s3407_s12] sm:$0xff]  ;;  %s2742_s18 = sadd.s32 1, %s3411_s14  ;;  %s2734_s17 = sadd.s32 1, %s3415_s17   ;;  %s3415_s17 = sphi %s3413_s17, %s2734_s17   ;;  %s3411_s14 = sphi %s3409_s14, %s3410_s14   ;;  %s3407_s12 = sphi %s3405_s12, %s2747_s12   ;;  %s3403_s11 = sphi %s3401_s11, %s2748_s11  }
 0x2fb   : >> { %2741 = vst [vmem:[%s3403_s11] sm:$0xff] %v2740_v57  ;;  %p2743_p0 = scmp.ge.s32.totalorder %s2742_s18, %s5997_s7  ;;  %p2733_p1 = scmp.ge.s32.totalorder %s2734_s17, %s5997_s7 }
 0x2fd   : >> { %s6432_s18 = smov (%p2743_p0, %s2742_s18), 0  ;;  %2736 = sbr.rel (!%p2733_p1) target bundleno = 762 (0x2fa), region = 133 }
 0x2fe   : >> { %s2873_s6 = sshll.u32 %s6432_s18, 3  ;;  %s3410_s14 = smov %s6432_s18  }
 0x2ff   : >> { %s2747_s12 = scalar_lea.vmem %s2728_s9, %s2873_s6 [#allocation2]   ;;  %s2748_s11 = scalar_lea.vmem %s2730_s10, %s2873_s6  }
 0x304 PF: > { %p10_p2 = scmp.ge.s32.totalorder %s3452_s16, 9   ;;  %s6424_s12 = smov %s3379_s13 }
 0x305   : > { %s6425_s13 = smov %s3460_s19  ;;  %s6426_s14 = smov %s3452_s16 }
 0x306   :  { %12 = sbr.rel (!%p10_p2) target bundleno = 2 (0x2), region = 144 }

</bundles_post_ra>
